<compile_context>
chip_gen: v7x
topology: tpu7x:2x2x1
jax: 0.10.0
libtpu: 0.0.40
codegen_flags: <defaults>
</compile_context>

<pallas_src>
import math
import jax
import jax.numpy as jnp
from jax.experimental import pallas as pl
from jax.experimental.pallas import tpu as pltpu  # noqa: F401  (TPU backend assumed)

# ---- model hyper-params (small, consistent with the module) ----------------
D_MODEL = 32
N_HEADS = 4
D_HEAD = D_MODEL // N_HEADS
D_FF = 64
N_LAYERS = 2
VOCAB = 32
EPS = 1e-6          # LayerNorm eps (Annotated Transformer uses 1e-6)
NEG = 1e9           # masked_fill magnitude (used as additive bias)

# ---- static slab indices into the packed parameter arrays ------------------
A_ENC_SELF, A_DEC_SELF, A_DEC_CROSS = 0, 2, 4          # + layer  (attn_w / attn_b)
F_ENC, F_DEC = 0, 2                                    # + layer  (ff_*)
LN_ENC, LN_ENC_FINAL, LN_DEC, LN_DEC_FINAL = 0, 4, 5, 11   # ln_gb rows
N_ATTN, N_FFN, N_NORM = 6, 4, 12


# ========================== in-kernel building blocks ========================

def _layer_norm(x2, ln_ref, idx):
    """Annotated-Transformer LayerNorm: unbiased std (ddof=1), eps added to std."""
    gb = ln_ref[idx]                     # (2, D): row 0 = gamma, row 1 = beta
    g, b = gb[0:1, :], gb[1:2, :]
    d = x2.shape[-1]
    mean = jnp.mean(x2, axis=-1, keepdims=True)
    var = jnp.sum((x2 - mean) ** 2, axis=-1, keepdims=True) * (1.0 / (d - 1))
    inv = pl.reciprocal(jnp.sqrt(var) + EPS, approx=True)     # EUP slot
    return g * (x2 - mean) * inv + b


def _ffn(x2, w1_ref, w2_ref, b_ref, idx):
    b = b_ref[idx]                       # (1, D_FF + D_MODEL) = [b1 | b2]
    h = jnp.dot(x2, w1_ref[idx], preferred_element_type=jnp.float32) + b[:, :D_FF]
    h = jnp.maximum(h, 0.0)              # ReLU
    return (jnp.dot(h, w2_ref[idx], preferred_element_type=jnp.float32)
            + b[:, D_FF:D_FF + D_MODEL])


def _mha(x_q2, x_kv2, bias_hb, w_ref, b_ref, idx, batch, s_q, s_k):
    """Multi-head attention with fused lane-dense projections.

    x_q2 : (B*Sq, D) queries     x_kv2 : (B*Sk, D) keys/values
    bias_hb : (H*B, Sq, Sk) additive mask bias (0 keep / -1e9 drop), head-major
    w_ref[idx] : (D, 4D) = [Wq*scale | Wk | Wv | Wo]
    b_ref[idx] : (1, 4D) = [bq*scale | bk | bv | bo]
    """
    D = D_MODEL
    w = w_ref[idx]                       # (32, 128) — fully lane-dense slab
    b = b_ref[idx]                       # (1, 128)

    if x_q2 is x_kv2:
        # self-attention: single fused QKV projection
        qkv = jnp.dot(x_q2, w[:, :3 * D], preferred_element_type=jnp.float32) + b[:, :3 * D]
        q2, kv2 = qkv[:, :D], qkv[:, D:3 * D]
    else:
        # cross-attention: Q from decoder stream, fused KV from encoder memory
        q2 = jnp.dot(x_q2, w[:, :D], preferred_element_type=jnp.float32) + b[:, :D]
        kv2 = jnp.dot(x_kv2, w[:, D:3 * D], preferred_element_type=jnp.float32) + b[:, D:3 * D]

    # Split heads via static lane slices + leading-dim reshapes (no transposes),
    # then merge (head, batch) so ALL heads share one einsum / softmax pass.
    qs, ks, vs = [], [], []
    for h in range(N_HEADS):
        sl = slice(h * D_HEAD, (h + 1) * D_HEAD)
        qs.append(q2[:, sl].reshape(batch, s_q, D_HEAD))
        ks.append(kv2[:, sl].reshape(batch, s_k, D_HEAD))
        vs.append(kv2[:, D + h * D_HEAD:D + (h + 1) * D_HEAD].reshape(batch, s_k, D_HEAD))
    q_all = jnp.concatenate(qs, axis=0)          # (H*B, Sq, Dh), index = h*B + b
    k_all = jnp.concatenate(ks, axis=0)
    v_all = jnp.concatenate(vs, axis=0)

    s = jnp.einsum("bqd,bkd->bqk", q_all, k_all,
                   preferred_element_type=jnp.float32)        # scale pre-folded into Wq
    s = s + bias_hb                                           # additive mask, hoisted
    s = s - jnp.max(s, axis=-1, keepdims=True)
    p = jnp.exp(s)
    p = p * pl.reciprocal(jnp.sum(p, axis=-1, keepdims=True), approx=True)
    o_all = jnp.einsum("bqk,bkd->bqd", p, v_all, preferred_element_type=jnp.float32)

    # Re-assemble concat(heads) along lanes, then ONE (D,D) output projection.
    heads = [o_all[h * batch:(h + 1) * batch].reshape(batch * s_q, D_HEAD)
             for h in range(N_HEADS)]
    o2 = jnp.concatenate(heads, axis=-1)         # (B*Sq, D)
    return jnp.dot(o2, w[:, 3 * D:], preferred_element_type=jnp.float32) + b[:, 3 * D:]


# ============================ fused forward kernel ===========================

# TODO(synk): dropout inside SublayerConnection / embeddings is identity in
# eval mode; omitted.  The generator head is not used by forward().
def _encdec_kernel(x_ref, src_mask_ref, tgt_mask_ref,
                   attn_w_ref, attn_b_ref, ff_w1_ref, ff_w2_ref, ff_b_ref,
                   ln_ref, o_ref):
    B = src_mask_ref.shape[0]
    S_src = src_mask_ref.shape[2]
    S_tgt = tgt_mask_ref.shape[1]

    # ---- preamble: additive mask biases, broadcast + head-tiled ONCE -------
    src_bias = (src_mask_ref[...] - 1.0) * NEG       # (B, 1, S_src): 0 keep / -1e9 drop
    tgt_bias = (tgt_mask_ref[...] - 1.0) * NEG       # (B, S_tgt, S_tgt)

    def tile_heads(bias, s_q, s_k):
        b3 = jnp.broadcast_to(bias, (B, s_q, s_k))
        return jnp.concatenate([b3] * N_HEADS, axis=0)       # (H*B, s_q, s_k)

    bias_enc = tile_heads(src_bias, S_src, S_src)
    bias_dec_self = tile_heads(tgt_bias, S_tgt, S_tgt)
    bias_dec_cross = tile_heads(src_bias, S_tgt, S_src)

    # ------------------------------- encoder --------------------------------
    x = x_ref[0:B * S_src, :]                        # (B*S_src, D)
    for l in range(N_LAYERS):
        xn = _layer_norm(x, ln_ref, LN_ENC + 2 * l)
        x = x + _mha(xn, xn, bias_enc, attn_w_ref, attn_b_ref,
                     A_ENC_SELF + l, B, S_src, S_src)
        xn = _layer_norm(x, ln_ref, LN_ENC + 2 * l + 1)
        x = x + _ffn(xn, ff_w1_ref, ff_w2_ref, ff_b_ref, F_ENC + l)
    mem = _layer_norm(x, ln_ref, LN_ENC_FINAL)       # encoder output / memory

    # ------------------------------- decoder --------------------------------
    y = x_ref[B * S_src:B * S_src + B * S_tgt, :]    # (B*S_tgt, D)
    for l in range(N_LAYERS):
        yn = _layer_norm(y, ln_ref, LN_DEC + 3 * l)
        y = y + _mha(yn, yn, bias_dec_self, attn_w_ref, attn_b_ref,
                     A_DEC_SELF + l, B, S_tgt, S_tgt)
        yn = _layer_norm(y, ln_ref, LN_DEC + 3 * l + 1)
        y = y + _mha(yn, mem, bias_dec_cross, attn_w_ref, attn_b_ref,
                     A_DEC_CROSS + l, B, S_tgt, S_src)
        yn = _layer_norm(y, ln_ref, LN_DEC + 3 * l + 2)
        y = y + _ffn(yn, ff_w1_ref, ff_w2_ref, ff_b_ref, F_DEC + l)

    o_ref[...] = _layer_norm(y, ln_ref, LN_DEC_FINAL)


# ============================ model composition ==============================

def make_pe(max_len, d_model):
    pos = jnp.arange(max_len, dtype=jnp.float32)[:, None]
    div = jnp.exp(jnp.arange(0, d_model, 2, dtype=jnp.float32)
                  * (-math.log(10000.0) / d_model))
    pe = jnp.zeros((max_len, d_model), jnp.float32)
    pe = pe.at[:, 0::2].set(jnp.sin(pos * div))
    pe = pe.at[:, 1::2].set(jnp.cos(pos * div))
    return pe


def embed(table, tokens, pe):
    x = jnp.take(table, tokens, axis=0) * math.sqrt(D_MODEL)
    return x + pe[None, : tokens.shape[1], :]


def encoder_decoder_forward(params, src, tgt, src_mask, tgt_mask):
    # forward(src, tgt, src_mask, tgt_mask) = decode(encode(src, src_mask), ...)
    B, S_src = src.shape
    S_tgt = tgt.shape[1]
    src_x = embed(params["src_emb"], src, params["pe"]).reshape(B * S_src, D_MODEL)
    tgt_x = embed(params["tgt_emb"], tgt, params["pe"]).reshape(B * S_tgt, D_MODEL)
    x_all = jnp.concatenate([src_x, tgt_x], axis=0)   # one activation DMA

    # Single fused kernel: no grid, every operand fully resident in VMEM.
    out2 = pl.pallas_call(
        _encdec_kernel,
        out_shape=jax.ShapeDtypeStruct((B * S_tgt, D_MODEL), jnp.float32),
    )(x_all,
      src_mask.astype(jnp.float32), tgt_mask.astype(jnp.float32),
      params["attn_w"], params["attn_b"],
      params["ff_w1"], params["ff_w2"], params["ff_b"],
      params["ln_gb"])
    return out2.reshape(B, S_tgt, D_MODEL)


# ============================ parameter init =================================

def _dense(key, fan_in, fan_out):
    kw, kb = jax.random.split(key)
    w = jax.random.normal(kw, (fan_in, fan_out), jnp.float32) * 0.05
    b = jax.random.normal(kb, (fan_out,), jnp.float32) * 0.05
    return w, b


def _pack_attention_block(key):
    """One attention: (D, 4D) slab [Wq*scale | Wk | Wv | Wo], (1, 4D) bias slab."""
    kq, kk, kv, ko = jax.random.split(key, 4)
    scale = 1.0 / math.sqrt(D_HEAD)
    wq, bq = _dense(kq, D_MODEL, D_MODEL)
    wk, bk = _dense(kk, D_MODEL, D_MODEL)
    wv, bv = _dense(kv, D_MODEL, D_MODEL)
    wo, bo = _dense(ko, D_MODEL, D_MODEL)
    w = jnp.concatenate([wq * scale, wk, wv, wo], axis=1)         # (32, 128)
    b = jnp.concatenate([bq * scale, bk, bv, bo])[None, :]        # (1, 128)
    return w, b


def _pack_ffn_block(key):
    k1, k2 = jax.random.split(key)
    w1, b1 = _dense(k1, D_MODEL, D_FF)
    w2, b2 = _dense(k2, D_FF, D_MODEL)
    return w1, w2, jnp.concatenate([b1, b2])[None, :]             # (32,64),(64,32),(1,96)


def init_params(key):
    keys = jax.random.split(key, N_ATTN + N_FFN + 2)
    attn_keys = keys[:N_ATTN]            # [enc self L0,L1 | dec self L0,L1 | dec cross L0,L1]
    ffn_keys = keys[N_ATTN:N_ATTN + N_FFN]   # [enc L0,L1 | dec L0,L1]
    k_se, k_te = keys[-2], keys[-1]

    ws, bs = zip(*[_pack_attention_block(k) for k in attn_keys])
    attn_w = jnp.stack(ws)               # (6, 32, 128)
    attn_b = jnp.stack(bs)               # (6, 1, 128)

    w1s, w2s, fbs = zip(*[_pack_ffn_block(k) for k in ffn_keys])
    ff_w1 = jnp.stack(w1s)               # (4, 32, 64)
    ff_w2 = jnp.stack(w2s)               # (4, 64, 32)
    ff_b = jnp.stack(fbs)                # (4, 1, 96)

    # 12 LayerNorms: enc(L0:ln1,ln2  L1:ln1,ln2  final) + dec(L0:ln1..ln3  L1  final)
    ln_gb = jnp.stack([jnp.ones((N_NORM, D_MODEL), jnp.float32),
                       jnp.zeros((N_NORM, D_MODEL), jnp.float32)], axis=1)  # (12, 2, 32)

    return {"attn_w": attn_w, "attn_b": attn_b,
            "ff_w1": ff_w1, "ff_w2": ff_w2, "ff_b": ff_b,
            "ln_gb": ln_gb,
            "src_emb": jax.random.normal(k_se, (VOCAB, D_MODEL), jnp.float32) * 0.05,
            "tgt_emb": jax.random.normal(k_te, (VOCAB, D_MODEL), jnp.float32) * 0.05,
            "pe": make_pe(64, D_MODEL)}
            # NOTE: generator (final Linear + log_softmax) is not used by forward()


# ================================= main ======================================

if __name__ == "__main__":
    key = jax.random.PRNGKey(0)
    kp, ks, kt = jax.random.split(key, 3)

    params = init_params(kp)

    B, S_SRC, S_TGT = 2, 8, 8
    src = jax.random.randint(ks, (B, S_SRC), 0, VOCAB, dtype=jnp.int32)
    tgt = jax.random.randint(kt, (B, S_TGT), 0, VOCAB, dtype=jnp.int32)

    src_mask = jnp.ones((B, 1, S_SRC), jnp.float32)                  # (B, 1, S_src)
    tgt_mask = jnp.broadcast_to(
        jnp.tril(jnp.ones((S_TGT, S_TGT), jnp.float32))[None],
        (B, S_TGT, S_TGT))                                           # (B, S_tgt, S_tgt)

    fwd = jax.jit(encoder_decoder_forward)
    out = fwd(params, src, tgt, src_mask, tgt_mask)
    out = jax.block_until_ready(out)
    assert out.shape == (B, S_TGT, D_MODEL) and out.dtype == jnp.float32
    assert bool(jnp.all(jnp.isfinite(out)))
    print("KERNEL_OK")
</pallas_src>

<mosaic_0001>
module attributes {stable_mosaic.version = 11 : i64} {
  func.func @_encdec_kernel(%arg0: memref<32x32xf32, #tpu.memory_space<vmem>>, %arg1: memref<2x1x8xf32, #tpu.memory_space<vmem>>, %arg2: memref<2x8x8xf32, #tpu.memory_space<vmem>>, %arg3: memref<6x32x128xf32, #tpu.memory_space<vmem>>, %arg4: memref<6x1x128xf32, #tpu.memory_space<vmem>>, %arg5: memref<4x32x64xf32, #tpu.memory_space<vmem>>, %arg6: memref<4x64x32xf32, #tpu.memory_space<vmem>>, %arg7: memref<4x1x96xf32, #tpu.memory_space<vmem>>, %arg8: memref<12x2x32xf32, #tpu.memory_space<vmem>>, %arg9: memref<16x32xf32, #tpu.memory_space<vmem>>) attributes {dimension_semantics = [], scalar_prefetch = 0 : i64, scratch_operands = 0 : i64, tpu.core_type = #tpu.core_type<tc>} {
    %c0 = arith.constant 0 : index
    %c0_0 = arith.constant 0 : index
    %c0_1 = arith.constant 0 : index
    %0 = vector.load %arg1[%c0, %c0_0, %c0_1] : memref<2x1x8xf32, #tpu.memory_space<vmem>>, vector<2x1x8xf32>
    %cst = arith.constant 1.000000e+00 : f32
    %1 = vector.broadcast %cst : f32 to vector<2x1x8xf32>
    %2 = arith.subf %0, %1 : vector<2x1x8xf32>
    %cst_2 = arith.constant 1.000000e+09 : f32
    %3 = vector.broadcast %cst_2 : f32 to vector<2x1x8xf32>
    %4 = arith.mulf %2, %3 : vector<2x1x8xf32>
    %c0_3 = arith.constant 0 : index
    %c0_4 = arith.constant 0 : index
    %c0_5 = arith.constant 0 : index
    %5 = vector.load %arg2[%c0_3, %c0_4, %c0_5] : memref<2x8x8xf32, #tpu.memory_space<vmem>>, vector<2x8x8xf32>
    %cst_6 = arith.constant 1.000000e+00 : f32
    %6 = vector.broadcast %cst_6 : f32 to vector<2x8x8xf32>
    %7 = arith.subf %5, %6 : vector<2x8x8xf32>
    %cst_7 = arith.constant 1.000000e+09 : f32
    %8 = vector.broadcast %cst_7 : f32 to vector<2x8x8xf32>
    %9 = arith.mulf %7, %8 : vector<2x8x8xf32>
    %10 = vector.shape_cast %4 : vector<2x1x8xf32> to vector<2x1x8xf32>
    %11 = vector.broadcast %10 : vector<2x1x8xf32> to vector<2x8x8xf32>
    %12 = tpu.concatenate %11, %11, %11, %11 in 0 : vector<2x8x8xf32>, vector<2x8x8xf32>, vector<2x8x8xf32>, vector<2x8x8xf32> -> vector<8x8x8xf32>
    %13 = tpu.concatenate %9, %9, %9, %9 in 0 : vector<2x8x8xf32>, vector<2x8x8xf32>, vector<2x8x8xf32>, vector<2x8x8xf32> -> vector<8x8x8xf32>
    %14 = vector.shape_cast %4 : vector<2x1x8xf32> to vector<2x1x8xf32>
    %15 = vector.broadcast %14 : vector<2x1x8xf32> to vector<2x8x8xf32>
    %16 = tpu.concatenate %15, %15, %15, %15 in 0 : vector<2x8x8xf32>, vector<2x8x8xf32>, vector<2x8x8xf32>, vector<2x8x8xf32> -> vector<8x8x8xf32>
    %c0_8 = arith.constant 0 : index
    %c0_9 = arith.constant 0 : index
    %17 = vector.load %arg0[%c0_8, %c0_9] : memref<32x32xf32, #tpu.memory_space<vmem>>, vector<16x32xf32>
    %c0_10 = arith.constant 0 : index
    %c0_11 = arith.constant 0 : index
    %c0_12 = arith.constant 0 : index
    %18 = vector.load %arg8[%c0_10, %c0_11, %c0_12] : memref<12x2x32xf32, #tpu.memory_space<vmem>>, vector<1x2x32xf32>
    %19 = vector.shape_cast %18 : vector<1x2x32xf32> to vector<2x32xf32>
    %20 = vector.extract_strided_slice %19 {offsets = [0, 0], sizes = [1, 32], strides = [1, 1]} : vector<2x32xf32> to vector<1x32xf32>
    %21 = vector.extract_strided_slice %19 {offsets = [1, 0], sizes = [1, 32], strides = [1, 1]} : vector<2x32xf32> to vector<1x32xf32>
    %cst_13 = arith.constant dense<0.000000e+00> : vector<16xf32>
    %22 = vector.multi_reduction <add>, %17, %cst_13 [1] : vector<16x32xf32> to vector<16xf32>
    %23 = vector.shape_cast %22 : vector<16xf32> to vector<16x1xf32>
    %cst_14 = arith.constant 3.200000e+01 : f32
    %24 = vector.broadcast %cst_14 : f32 to vector<16x1xf32>
    %25 = arith.divf %23, %24 : vector<16x1xf32>
    %26 = vector.broadcast %25 : vector<16x1xf32> to vector<16x32xf32>
    %27 = arith.subf %17, %26 : vector<16x32xf32>
    %28 = arith.mulf %27, %27 : vector<16x32xf32>
    %cst_15 = arith.constant dense<0.000000e+00> : vector<16xf32>
    %29 = vector.multi_reduction <add>, %28, %cst_15 [1] : vector<16x32xf32> to vector<16xf32>
    %30 = vector.shape_cast %29 : vector<16xf32> to vector<16x1xf32>
    %cst_16 = arith.constant 0.0322580636 : f32
    %31 = vector.broadcast %cst_16 : f32 to vector<16x1xf32>
    %32 = arith.mulf %30, %31 : vector<16x1xf32>
    %33 = math.sqrt %32 : vector<16x1xf32>
    %cst_17 = arith.constant 9.99999997E-7 : f32
    %34 = vector.broadcast %cst_17 : f32 to vector<16x1xf32>
    %35 = arith.addf %33, %34 : vector<16x1xf32>
    %36 = tpu.reciprocal %35 {approx = true} : vector<16x1xf32> -> vector<16x1xf32>
    %37 = vector.broadcast %25 : vector<16x1xf32> to vector<16x32xf32>
    %38 = arith.subf %17, %37 : vector<16x32xf32>
    %39 = vector.broadcast %20 : vector<1x32xf32> to vector<16x32xf32>
    %40 = arith.mulf %39, %38 : vector<16x32xf32>
    %41 = vector.broadcast %36 : vector<16x1xf32> to vector<16x32xf32>
    %42 = arith.mulf %40, %41 : vector<16x32xf32>
    %43 = vector.broadcast %21 : vector<1x32xf32> to vector<16x32xf32>
    %44 = arith.addf %42, %43 : vector<16x32xf32>
    %c0_18 = arith.constant 0 : index
    %c0_19 = arith.constant 0 : index
    %c0_20 = arith.constant 0 : index
    %45 = vector.load %arg3[%c0_18, %c0_19, %c0_20] : memref<6x32x128xf32, #tpu.memory_space<vmem>>, vector<1x32x128xf32>
    %46 = vector.shape_cast %45 : vector<1x32x128xf32> to vector<32x128xf32>
    %c0_21 = arith.constant 0 : index
    %c0_22 = arith.constant 0 : index
    %c0_23 = arith.constant 0 : index
    %47 = vector.load %arg4[%c0_21, %c0_22, %c0_23] : memref<6x1x128xf32, #tpu.memory_space<vmem>>, vector<1x1x128xf32>
    %48 = vector.shape_cast %47 : vector<1x1x128xf32> to vector<1x128xf32>
    %49 = vector.extract_strided_slice %46 {offsets = [0, 0], sizes = [32, 96], strides = [1, 1]} : vector<32x128xf32> to vector<32x96xf32>
    %cst_24 = arith.constant dense<0.000000e+00> : vector<16x96xf32>
    %50 = tpu.matmul %44, %49, %cst_24 {dimension_numbers = #tpu.dot_dimension_numbers<[1], [0], [0], [1], [0, 0, 1, 1], [], []>} : vector<16x32xf32>, vector<32x96xf32>, vector<16x96xf32> -> vector<16x96xf32>
    %51 = vector.extract_strided_slice %48 {offsets = [0, 0], sizes = [1, 96], strides = [1, 1]} : vector<1x128xf32> to vector<1x96xf32>
    %52 = vector.broadcast %51 : vector<1x96xf32> to vector<16x96xf32>
    %53 = arith.addf %50, %52 : vector<16x96xf32>
    %54 = vector.extract_strided_slice %53 {offsets = [0, 0], sizes = [16, 32], strides = [1, 1]} : vector<16x96xf32> to vector<16x32xf32>
    %55 = vector.extract_strided_slice %53 {offsets = [0, 32], sizes = [16, 64], strides = [1, 1]} : vector<16x96xf32> to vector<16x64xf32>
    %56 = vector.extract_strided_slice %54 {offsets = [0, 0], sizes = [16, 8], strides = [1, 1]} : vector<16x32xf32> to vector<16x8xf32>
    %57 = vector.shape_cast %56 : vector<16x8xf32> to vector<2x8x8xf32>
    %58 = vector.extract_strided_slice %55 {offsets = [0, 0], sizes = [16, 8], strides = [1, 1]} : vector<16x64xf32> to vector<16x8xf32>
    %59 = vector.shape_cast %58 : vector<16x8xf32> to vector<2x8x8xf32>
    %60 = vector.extract_strided_slice %55 {offsets = [0, 32], sizes = [16, 8], strides = [1, 1]} : vector<16x64xf32> to vector<16x8xf32>
    %61 = vector.shape_cast %60 : vector<16x8xf32> to vector<2x8x8xf32>
    %62 = vector.extract_strided_slice %54 {offsets = [0, 8], sizes = [16, 8], strides = [1, 1]} : vector<16x32xf32> to vector<16x8xf32>
    %63 = vector.shape_cast %62 : vector<16x8xf32> to vector<2x8x8xf32>
    %64 = vector.extract_strided_slice %55 {offsets = [0, 8], sizes = [16, 8], strides = [1, 1]} : vector<16x64xf32> to vector<16x8xf32>
    %65 = vector.shape_cast %64 : vector<16x8xf32> to vector<2x8x8xf32>
    %66 = vector.extract_strided_slice %55 {offsets = [0, 40], sizes = [16, 8], strides = [1, 1]} : vector<16x64xf32> to vector<16x8xf32>
    %67 = vector.shape_cast %66 : vector<16x8xf32> to vector<2x8x8xf32>
    %68 = vector.extract_strided_slice %54 {offsets = [0, 16], sizes = [16, 8], strides = [1, 1]} : vector<16x32xf32> to vector<16x8xf32>
    %69 = vector.shape_cast %68 : vector<16x8xf32> to vector<2x8x8xf32>
    %70 = vector.extract_strided_slice %55 {offsets = [0, 16], sizes = [16, 8], strides = [1, 1]} : vector<16x64xf32> to vector<16x8xf32>
    %71 = vector.shape_cast %70 : vector<16x8xf32> to vector<2x8x8xf32>
    %72 = vector.extract_strided_slice %55 {offsets = [0, 48], sizes = [16, 8], strides = [1, 1]} : vector<16x64xf32> to vector<16x8xf32>
    %73 = vector.shape_cast %72 : vector<16x8xf32> to vector<2x8x8xf32>
    %74 = vector.extract_strided_slice %54 {offsets = [0, 24], sizes = [16, 8], strides = [1, 1]} : vector<16x32xf32> to vector<16x8xf32>
    %75 = vector.shape_cast %74 : vector<16x8xf32> to vector<2x8x8xf32>
    %76 = vector.extract_strided_slice %55 {offsets = [0, 24], sizes = [16, 8], strides = [1, 1]} : vector<16x64xf32> to vector<16x8xf32>
    %77 = vector.shape_cast %76 : vector<16x8xf32> to vector<2x8x8xf32>
    %78 = vector.extract_strided_slice %55 {offsets = [0, 56], sizes = [16, 8], strides = [1, 1]} : vector<16x64xf32> to vector<16x8xf32>
    %79 = vector.shape_cast %78 : vector<16x8xf32> to vector<2x8x8xf32>
    %80 = tpu.concatenate %57, %63, %69, %75 in 0 : vector<2x8x8xf32>, vector<2x8x8xf32>, vector<2x8x8xf32>, vector<2x8x8xf32> -> vector<8x8x8xf32>
    %81 = tpu.concatenate %59, %65, %71, %77 in 0 : vector<2x8x8xf32>, vector<2x8x8xf32>, vector<2x8x8xf32>, vector<2x8x8xf32> -> vector<8x8x8xf32>
    %82 = tpu.concatenate %61, %67, %73, %79 in 0 : vector<2x8x8xf32>, vector<2x8x8xf32>, vector<2x8x8xf32>, vector<2x8x8xf32> -> vector<8x8x8xf32>
    "tpu.trace_start"() <{level = 10 : i32, message = "bqd,bkd->bqk"}> : () -> ()
    %cst_25 = arith.constant dense<0.000000e+00> : vector<8x8x8xf32>
    %83 = tpu.matmul %80, %81, %cst_25 {dimension_numbers = #tpu.dot_dimension_numbers<[2], [2], [1], [1], [0, 0, 0, 1, 1, 1], [0], [0]>} : vector<8x8x8xf32>, vector<8x8x8xf32>, vector<8x8x8xf32> -> vector<8x8x8xf32>
    "tpu.trace_stop"() : () -> ()
    %84 = arith.addf %83, %12 : vector<8x8x8xf32>
    %cst_26 = arith.constant dense<0xFF800000> : vector<8x8xf32>
    %85 = vector.multi_reduction <maximumf>, %84, %cst_26 [2] : vector<8x8x8xf32> to vector<8x8xf32>
    %86 = vector.shape_cast %85 : vector<8x8xf32> to vector<8x8x1xf32>
    %87 = vector.broadcast %86 : vector<8x8x1xf32> to vector<8x8x8xf32>
    %88 = arith.subf %84, %87 : vector<8x8x8xf32>
    %89 = math.exp %88 : vector<8x8x8xf32>
    %cst_27 = arith.constant dense<0.000000e+00> : vector<8x8xf32>
    %90 = vector.multi_reduction <add>, %89, %cst_27 [2] : vector<8x8x8xf32> to vector<8x8xf32>
    %91 = vector.shape_cast %90 : vector<8x8xf32> to vector<8x8x1xf32>
    %92 = tpu.reciprocal %91 {approx = true} : vector<8x8x1xf32> -> vector<8x8x1xf32>
    %93 = vector.broadcast %92 : vector<8x8x1xf32> to vector<8x8x8xf32>
    %94 = arith.mulf %89, %93 : vector<8x8x8xf32>
    "tpu.trace_start"() <{level = 10 : i32, message = "bqk,bkd->bqd"}> : () -> ()
    %cst_28 = arith.constant dense<0.000000e+00> : vector<8x8x8xf32>
    %95 = tpu.matmul %94, %82, %cst_28 {dimension_numbers = #tpu.dot_dimension_numbers<[2], [1], [1], [2], [0, 0, 0, 1, 1, 2], [0], [0]>} : vector<8x8x8xf32>, vector<8x8x8xf32>, vector<8x8x8xf32> -> vector<8x8x8xf32>
    "tpu.trace_stop"() : () -> ()
    %96 = vector.extract_strided_slice %95 {offsets = [0, 0, 0], sizes = [2, 8, 8], strides = [1, 1, 1]} : vector<8x8x8xf32> to vector<2x8x8xf32>
    %97 = vector.shape_cast %96 : vector<2x8x8xf32> to vector<16x8xf32>
    %98 = vector.extract_strided_slice %95 {offsets = [2, 0, 0], sizes = [2, 8, 8], strides = [1, 1, 1]} : vector<8x8x8xf32> to vector<2x8x8xf32>
    %99 = vector.shape_cast %98 : vector<2x8x8xf32> to vector<16x8xf32>
    %100 = vector.extract_strided_slice %95 {offsets = [4, 0, 0], sizes = [2, 8, 8], strides = [1, 1, 1]} : vector<8x8x8xf32> to vector<2x8x8xf32>
    %101 = vector.shape_cast %100 : vector<2x8x8xf32> to vector<16x8xf32>
    %102 = vector.extract_strided_slice %95 {offsets = [6, 0, 0], sizes = [2, 8, 8], strides = [1, 1, 1]} : vector<8x8x8xf32> to vector<2x8x8xf32>
    %103 = vector.shape_cast %102 : vector<2x8x8xf32> to vector<16x8xf32>
    %104 = tpu.concatenate %97, %99, %101, %103 in 1 : vector<16x8xf32>, vector<16x8xf32>, vector<16x8xf32>, vector<16x8xf32> -> vector<16x32xf32>
    %105 = vector.extract_strided_slice %46 {offsets = [0, 96], sizes = [32, 32], strides = [1, 1]} : vector<32x128xf32> to vector<32x32xf32>
    %cst_29 = arith.constant dense<0.000000e+00> : vector<16x32xf32>
    %106 = tpu.matmul %104, %105, %cst_29 {dimension_numbers = #tpu.dot_dimension_numbers<[1], [0], [0], [1], [0, 0, 1, 1], [], []>} : vector<16x32xf32>, vector<32x32xf32>, vector<16x32xf32> -> vector<16x32xf32>
    %107 = vector.extract_strided_slice %48 {offsets = [0, 96], sizes = [1, 32], strides = [1, 1]} : vector<1x128xf32> to vector<1x32xf32>
    %108 = vector.broadcast %107 : vector<1x32xf32> to vector<16x32xf32>
    %109 = arith.addf %106, %108 : vector<16x32xf32>
    %110 = arith.addf %17, %109 : vector<16x32xf32>
    %c1 = arith.constant 1 : index
    %c0_30 = arith.constant 0 : index
    %c0_31 = arith.constant 0 : index
    %111 = vector.load %arg8[%c1, %c0_30, %c0_31] : memref<12x2x32xf32, #tpu.memory_space<vmem>>, vector<1x2x32xf32>
    %112 = vector.shape_cast %111 : vector<1x2x32xf32> to vector<2x32xf32>
    %113 = vector.extract_strided_slice %112 {offsets = [0, 0], sizes = [1, 32], strides = [1, 1]} : vector<2x32xf32> to vector<1x32xf32>
    %114 = vector.extract_strided_slice %112 {offsets = [1, 0], sizes = [1, 32], strides = [1, 1]} : vector<2x32xf32> to vector<1x32xf32>
    %cst_32 = arith.constant dense<0.000000e+00> : vector<16xf32>
    %115 = vector.multi_reduction <add>, %110, %cst_32 [1] : vector<16x32xf32> to vector<16xf32>
    %116 = vector.shape_cast %115 : vector<16xf32> to vector<16x1xf32>
    %cst_33 = arith.constant 3.200000e+01 : f32
    %117 = vector.broadcast %cst_33 : f32 to vector<16x1xf32>
    %118 = arith.divf %116, %117 : vector<16x1xf32>
    %119 = vector.broadcast %118 : vector<16x1xf32> to vector<16x32xf32>
    %120 = arith.subf %110, %119 : vector<16x32xf32>
    %121 = arith.mulf %120, %120 : vector<16x32xf32>
    %cst_34 = arith.constant dense<0.000000e+00> : vector<16xf32>
    %122 = vector.multi_reduction <add>, %121, %cst_34 [1] : vector<16x32xf32> to vector<16xf32>
    %123 = vector.shape_cast %122 : vector<16xf32> to vector<16x1xf32>
    %cst_35 = arith.constant 0.0322580636 : f32
    %124 = vector.broadcast %cst_35 : f32 to vector<16x1xf32>
    %125 = arith.mulf %123, %124 : vector<16x1xf32>
    %126 = math.sqrt %125 : vector<16x1xf32>
    %cst_36 = arith.constant 9.99999997E-7 : f32
    %127 = vector.broadcast %cst_36 : f32 to vector<16x1xf32>
    %128 = arith.addf %126, %127 : vector<16x1xf32>
    %129 = tpu.reciprocal %128 {approx = true} : vector<16x1xf32> -> vector<16x1xf32>
    %130 = vector.broadcast %118 : vector<16x1xf32> to vector<16x32xf32>
    %131 = arith.subf %110, %130 : vector<16x32xf32>
    %132 = vector.broadcast %113 : vector<1x32xf32> to vector<16x32xf32>
    %133 = arith.mulf %132, %131 : vector<16x32xf32>
    %134 = vector.broadcast %129 : vector<16x1xf32> to vector<16x32xf32>
    %135 = arith.mulf %133, %134 : vector<16x32xf32>
    %136 = vector.broadcast %114 : vector<1x32xf32> to vector<16x32xf32>
    %137 = arith.addf %135, %136 : vector<16x32xf32>
    %c0_37 = arith.constant 0 : index
    %c0_38 = arith.constant 0 : index
    %c0_39 = arith.constant 0 : index
    %138 = vector.load %arg7[%c0_37, %c0_38, %c0_39] : memref<4x1x96xf32, #tpu.memory_space<vmem>>, vector<1x1x96xf32>
    %139 = vector.shape_cast %138 : vector<1x1x96xf32> to vector<1x96xf32>
    %c0_40 = arith.constant 0 : index
    %c0_41 = arith.constant 0 : index
    %c0_42 = arith.constant 0 : index
    %140 = vector.load %arg5[%c0_40, %c0_41, %c0_42] : memref<4x32x64xf32, #tpu.memory_space<vmem>>, vector<1x32x64xf32>
    %141 = vector.shape_cast %140 : vector<1x32x64xf32> to vector<32x64xf32>
    %cst_43 = arith.constant dense<0.000000e+00> : vector<16x64xf32>
    %142 = tpu.matmul %137, %141, %cst_43 {dimension_numbers = #tpu.dot_dimension_numbers<[1], [0], [0], [1], [0, 0, 1, 1], [], []>} : vector<16x32xf32>, vector<32x64xf32>, vector<16x64xf32> -> vector<16x64xf32>
    %143 = vector.extract_strided_slice %139 {offsets = [0, 0], sizes = [1, 64], strides = [1, 1]} : vector<1x96xf32> to vector<1x64xf32>
    %144 = vector.broadcast %143 : vector<1x64xf32> to vector<16x64xf32>
    %145 = arith.addf %142, %144 : vector<16x64xf32>
    %cst_44 = arith.constant 0.000000e+00 : f32
    %146 = vector.broadcast %cst_44 : f32 to vector<16x64xf32>
    %147 = arith.maximumf %145, %146 : vector<16x64xf32>
    %c0_45 = arith.constant 0 : index
    %c0_46 = arith.constant 0 : index
    %c0_47 = arith.constant 0 : index
    %148 = vector.load %arg6[%c0_45, %c0_46, %c0_47] : memref<4x64x32xf32, #tpu.memory_space<vmem>>, vector<1x64x32xf32>
    %149 = vector.shape_cast %148 : vector<1x64x32xf32> to vector<64x32xf32>
    %cst_48 = arith.constant dense<0.000000e+00> : vector<16x32xf32>
    %150 = tpu.matmul %147, %149, %cst_48 {dimension_numbers = #tpu.dot_dimension_numbers<[1], [0], [0], [1], [0, 0, 1, 1], [], []>} : vector<16x64xf32>, vector<64x32xf32>, vector<16x32xf32> -> vector<16x32xf32>
    %151 = vector.extract_strided_slice %139 {offsets = [0, 64], sizes = [1, 32], strides = [1, 1]} : vector<1x96xf32> to vector<1x32xf32>
    %152 = vector.broadcast %151 : vector<1x32xf32> to vector<16x32xf32>
    %153 = arith.addf %150, %152 : vector<16x32xf32>
    %154 = arith.addf %110, %153 : vector<16x32xf32>
    %c2 = arith.constant 2 : index
    %c0_49 = arith.constant 0 : index
    %c0_50 = arith.constant 0 : index
    %155 = vector.load %arg8[%c2, %c0_49, %c0_50] : memref<12x2x32xf32, #tpu.memory_space<vmem>>, vector<1x2x32xf32>
    %156 = vector.shape_cast %155 : vector<1x2x32xf32> to vector<2x32xf32>
    %157 = vector.extract_strided_slice %156 {offsets = [0, 0], sizes = [1, 32], strides = [1, 1]} : vector<2x32xf32> to vector<1x32xf32>
    %158 = vector.extract_strided_slice %156 {offsets = [1, 0], sizes = [1, 32], strides = [1, 1]} : vector<2x32xf32> to vector<1x32xf32>
    %cst_51 = arith.constant dense<0.000000e+00> : vector<16xf32>
    %159 = vector.multi_reduction <add>, %154, %cst_51 [1] : vector<16x32xf32> to vector<16xf32>
    %160 = vector.shape_cast %159 : vector<16xf32> to vector<16x1xf32>
    %cst_52 = arith.constant 3.200000e+01 : f32
    %161 = vector.broadcast %cst_52 : f32 to vector<16x1xf32>
    %162 = arith.divf %160, %161 : vector<16x1xf32>
    %163 = vector.broadcast %162 : vector<16x1xf32> to vector<16x32xf32>
    %164 = arith.subf %154, %163 : vector<16x32xf32>
    %165 = arith.mulf %164, %164 : vector<16x32xf32>
    %cst_53 = arith.constant dense<0.000000e+00> : vector<16xf32>
    %166 = vector.multi_reduction <add>, %165, %cst_53 [1] : vector<16x32xf32> to vector<16xf32>
    %167 = vector.shape_cast %166 : vector<16xf32> to vector<16x1xf32>
    %cst_54 = arith.constant 0.0322580636 : f32
    %168 = vector.broadcast %cst_54 : f32 to vector<16x1xf32>
    %169 = arith.mulf %167, %168 : vector<16x1xf32>
    %170 = math.sqrt %169 : vector<16x1xf32>
    %cst_55 = arith.constant 9.99999997E-7 : f32
    %171 = vector.broadcast %cst_55 : f32 to vector<16x1xf32>
    %172 = arith.addf %170, %171 : vector<16x1xf32>
    %173 = tpu.reciprocal %172 {approx = true} : vector<16x1xf32> -> vector<16x1xf32>
    %174 = vector.broadcast %162 : vector<16x1xf32> to vector<16x32xf32>
    %175 = arith.subf %154, %174 : vector<16x32xf32>
    %176 = vector.broadcast %157 : vector<1x32xf32> to vector<16x32xf32>
    %177 = arith.mulf %176, %175 : vector<16x32xf32>
    %178 = vector.broadcast %173 : vector<16x1xf32> to vector<16x32xf32>
    %179 = arith.mulf %177, %178 : vector<16x32xf32>
    %180 = vector.broadcast %158 : vector<1x32xf32> to vector<16x32xf32>
    %181 = arith.addf %179, %180 : vector<16x32xf32>
    %c1_56 = arith.constant 1 : index
    %c0_57 = arith.constant 0 : index
    %c0_58 = arith.constant 0 : index
    %182 = vector.load %arg3[%c1_56, %c0_57, %c0_58] : memref<6x32x128xf32, #tpu.memory_space<vmem>>, vector<1x32x128xf32>
    %183 = vector.shape_cast %182 : vector<1x32x128xf32> to vector<32x128xf32>
    %c1_59 = arith.constant 1 : index
    %c0_60 = arith.constant 0 : index
    %c0_61 = arith.constant 0 : index
    %184 = vector.load %arg4[%c1_59, %c0_60, %c0_61] : memref<6x1x128xf32, #tpu.memory_space<vmem>>, vector<1x1x128xf32>
    %185 = vector.shape_cast %184 : vector<1x1x128xf32> to vector<1x128xf32>
    %186 = vector.extract_strided_slice %183 {offsets = [0, 0], sizes = [32, 96], strides = [1, 1]} : vector<32x128xf32> to vector<32x96xf32>
    %cst_62 = arith.constant dense<0.000000e+00> : vector<16x96xf32>
    %187 = tpu.matmul %181, %186, %cst_62 {dimension_numbers = #tpu.dot_dimension_numbers<[1], [0], [0], [1], [0, 0, 1, 1], [], []>} : vector<16x32xf32>, vector<32x96xf32>, vector<16x96xf32> -> vector<16x96xf32>
    %188 = vector.extract_strided_slice %185 {offsets = [0, 0], sizes = [1, 96], strides = [1, 1]} : vector<1x128xf32> to vector<1x96xf32>
    %189 = vector.broadcast %188 : vector<1x96xf32> to vector<16x96xf32>
    %190 = arith.addf %187, %189 : vector<16x96xf32>
    %191 = vector.extract_strided_slice %190 {offsets = [0, 0], sizes = [16, 32], strides = [1, 1]} : vector<16x96xf32> to vector<16x32xf32>
    %192 = vector.extract_strided_slice %190 {offsets = [0, 32], sizes = [16, 64], strides = [1, 1]} : vector<16x96xf32> to vector<16x64xf32>
    %193 = vector.extract_strided_slice %191 {offsets = [0, 0], sizes = [16, 8], strides = [1, 1]} : vector<16x32xf32> to vector<16x8xf32>
    %194 = vector.shape_cast %193 : vector<16x8xf32> to vector<2x8x8xf32>
    %195 = vector.extract_strided_slice %192 {offsets = [0, 0], sizes = [16, 8], strides = [1, 1]} : vector<16x64xf32> to vector<16x8xf32>
    %196 = vector.shape_cast %195 : vector<16x8xf32> to vector<2x8x8xf32>
    %197 = vector.extract_strided_slice %192 {offsets = [0, 32], sizes = [16, 8], strides = [1, 1]} : vector<16x64xf32> to vector<16x8xf32>
    %198 = vector.shape_cast %197 : vector<16x8xf32> to vector<2x8x8xf32>
    %199 = vector.extract_strided_slice %191 {offsets = [0, 8], sizes = [16, 8], strides = [1, 1]} : vector<16x32xf32> to vector<16x8xf32>
    %200 = vector.shape_cast %199 : vector<16x8xf32> to vector<2x8x8xf32>
    %201 = vector.extract_strided_slice %192 {offsets = [0, 8], sizes = [16, 8], strides = [1, 1]} : vector<16x64xf32> to vector<16x8xf32>
    %202 = vector.shape_cast %201 : vector<16x8xf32> to vector<2x8x8xf32>
    %203 = vector.extract_strided_slice %192 {offsets = [0, 40], sizes = [16, 8], strides = [1, 1]} : vector<16x64xf32> to vector<16x8xf32>
    %204 = vector.shape_cast %203 : vector<16x8xf32> to vector<2x8x8xf32>
    %205 = vector.extract_strided_slice %191 {offsets = [0, 16], sizes = [16, 8], strides = [1, 1]} : vector<16x32xf32> to vector<16x8xf32>
    %206 = vector.shape_cast %205 : vector<16x8xf32> to vector<2x8x8xf32>
    %207 = vector.extract_strided_slice %192 {offsets = [0, 16], sizes = [16, 8], strides = [1, 1]} : vector<16x64xf32> to vector<16x8xf32>
    %208 = vector.shape_cast %207 : vector<16x8xf32> to vector<2x8x8xf32>
    %209 = vector.extract_strided_slice %192 {offsets = [0, 48], sizes = [16, 8], strides = [1, 1]} : vector<16x64xf32> to vector<16x8xf32>
    %210 = vector.shape_cast %209 : vector<16x8xf32> to vector<2x8x8xf32>
    %211 = vector.extract_strided_slice %191 {offsets = [0, 24], sizes = [16, 8], strides = [1, 1]} : vector<16x32xf32> to vector<16x8xf32>
    %212 = vector.shape_cast %211 : vector<16x8xf32> to vector<2x8x8xf32>
    %213 = vector.extract_strided_slice %192 {offsets = [0, 24], sizes = [16, 8], strides = [1, 1]} : vector<16x64xf32> to vector<16x8xf32>
    %214 = vector.shape_cast %213 : vector<16x8xf32> to vector<2x8x8xf32>
    %215 = vector.extract_strided_slice %192 {offsets = [0, 56], sizes = [16, 8], strides = [1, 1]} : vector<16x64xf32> to vector<16x8xf32>
    %216 = vector.shape_cast %215 : vector<16x8xf32> to vector<2x8x8xf32>
    %217 = tpu.concatenate %194, %200, %206, %212 in 0 : vector<2x8x8xf32>, vector<2x8x8xf32>, vector<2x8x8xf32>, vector<2x8x8xf32> -> vector<8x8x8xf32>
    %218 = tpu.concatenate %196, %202, %208, %214 in 0 : vector<2x8x8xf32>, vector<2x8x8xf32>, vector<2x8x8xf32>, vector<2x8x8xf32> -> vector<8x8x8xf32>
    %219 = tpu.concatenate %198, %204, %210, %216 in 0 : vector<2x8x8xf32>, vector<2x8x8xf32>, vector<2x8x8xf32>, vector<2x8x8xf32> -> vector<8x8x8xf32>
    "tpu.trace_start"() <{level = 10 : i32, message = "bqd,bkd->bqk"}> : () -> ()
    %cst_63 = arith.constant dense<0.000000e+00> : vector<8x8x8xf32>
    %220 = tpu.matmul %217, %218, %cst_63 {dimension_numbers = #tpu.dot_dimension_numbers<[2], [2], [1], [1], [0, 0, 0, 1, 1, 1], [0], [0]>} : vector<8x8x8xf32>, vector<8x8x8xf32>, vector<8x8x8xf32> -> vector<8x8x8xf32>
    "tpu.trace_stop"() : () -> ()
    %221 = arith.addf %220, %12 : vector<8x8x8xf32>
    %cst_64 = arith.constant dense<0xFF800000> : vector<8x8xf32>
    %222 = vector.multi_reduction <maximumf>, %221, %cst_64 [2] : vector<8x8x8xf32> to vector<8x8xf32>
    %223 = vector.shape_cast %222 : vector<8x8xf32> to vector<8x8x1xf32>
    %224 = vector.broadcast %223 : vector<8x8x1xf32> to vector<8x8x8xf32>
    %225 = arith.subf %221, %224 : vector<8x8x8xf32>
    %226 = math.exp %225 : vector<8x8x8xf32>
    %cst_65 = arith.constant dense<0.000000e+00> : vector<8x8xf32>
    %227 = vector.multi_reduction <add>, %226, %cst_65 [2] : vector<8x8x8xf32> to vector<8x8xf32>
    %228 = vector.shape_cast %227 : vector<8x8xf32> to vector<8x8x1xf32>
    %229 = tpu.reciprocal %228 {approx = true} : vector<8x8x1xf32> -> vector<8x8x1xf32>
    %230 = vector.broadcast %229 : vector<8x8x1xf32> to vector<8x8x8xf32>
    %231 = arith.mulf %226, %230 : vector<8x8x8xf32>
    "tpu.trace_start"() <{level = 10 : i32, message = "bqk,bkd->bqd"}> : () -> ()
    %cst_66 = arith.constant dense<0.000000e+00> : vector<8x8x8xf32>
    %232 = tpu.matmul %231, %219, %cst_66 {dimension_numbers = #tpu.dot_dimension_numbers<[2], [1], [1], [2], [0, 0, 0, 1, 1, 2], [0], [0]>} : vector<8x8x8xf32>, vector<8x8x8xf32>, vector<8x8x8xf32> -> vector<8x8x8xf32>
    "tpu.trace_stop"() : () -> ()
    %233 = vector.extract_strided_slice %232 {offsets = [0, 0, 0], sizes = [2, 8, 8], strides = [1, 1, 1]} : vector<8x8x8xf32> to vector<2x8x8xf32>
    %234 = vector.shape_cast %233 : vector<2x8x8xf32> to vector<16x8xf32>
    %235 = vector.extract_strided_slice %232 {offsets = [2, 0, 0], sizes = [2, 8, 8], strides = [1, 1, 1]} : vector<8x8x8xf32> to vector<2x8x8xf32>
    %236 = vector.shape_cast %235 : vector<2x8x8xf32> to vector<16x8xf32>
    %237 = vector.extract_strided_slice %232 {offsets = [4, 0, 0], sizes = [2, 8, 8], strides = [1, 1, 1]} : vector<8x8x8xf32> to vector<2x8x8xf32>
    %238 = vector.shape_cast %237 : vector<2x8x8xf32> to vector<16x8xf32>
    %239 = vector.extract_strided_slice %232 {offsets = [6, 0, 0], sizes = [2, 8, 8], strides = [1, 1, 1]} : vector<8x8x8xf32> to vector<2x8x8xf32>
    %240 = vector.shape_cast %239 : vector<2x8x8xf32> to vector<16x8xf32>
    %241 = tpu.concatenate %234, %236, %238, %240 in 1 : vector<16x8xf32>, vector<16x8xf32>, vector<16x8xf32>, vector<16x8xf32> -> vector<16x32xf32>
    %242 = vector.extract_strided_slice %183 {offsets = [0, 96], sizes = [32, 32], strides = [1, 1]} : vector<32x128xf32> to vector<32x32xf32>
    %cst_67 = arith.constant dense<0.000000e+00> : vector<16x32xf32>
    %243 = tpu.matmul %241, %242, %cst_67 {dimension_numbers = #tpu.dot_dimension_numbers<[1], [0], [0], [1], [0, 0, 1, 1], [], []>} : vector<16x32xf32>, vector<32x32xf32>, vector<16x32xf32> -> vector<16x32xf32>
    %244 = vector.extract_strided_slice %185 {offsets = [0, 96], sizes = [1, 32], strides = [1, 1]} : vector<1x128xf32> to vector<1x32xf32>
    %245 = vector.broadcast %244 : vector<1x32xf32> to vector<16x32xf32>
    %246 = arith.addf %243, %245 : vector<16x32xf32>
    %247 = arith.addf %154, %246 : vector<16x32xf32>
    %c3 = arith.constant 3 : index
    %c0_68 = arith.constant 0 : index
    %c0_69 = arith.constant 0 : index
    %248 = vector.load %arg8[%c3, %c0_68, %c0_69] : memref<12x2x32xf32, #tpu.memory_space<vmem>>, vector<1x2x32xf32>
    %249 = vector.shape_cast %248 : vector<1x2x32xf32> to vector<2x32xf32>
    %250 = vector.extract_strided_slice %249 {offsets = [0, 0], sizes = [1, 32], strides = [1, 1]} : vector<2x32xf32> to vector<1x32xf32>
    %251 = vector.extract_strided_slice %249 {offsets = [1, 0], sizes = [1, 32], strides = [1, 1]} : vector<2x32xf32> to vector<1x32xf32>
    %cst_70 = arith.constant dense<0.000000e+00> : vector<16xf32>
    %252 = vector.multi_reduction <add>, %247, %cst_70 [1] : vector<16x32xf32> to vector<16xf32>
    %253 = vector.shape_cast %252 : vector<16xf32> to vector<16x1xf32>
    %cst_71 = arith.constant 3.200000e+01 : f32
    %254 = vector.broadcast %cst_71 : f32 to vector<16x1xf32>
    %255 = arith.divf %253, %254 : vector<16x1xf32>
    %256 = vector.broadcast %255 : vector<16x1xf32> to vector<16x32xf32>
    %257 = arith.subf %247, %256 : vector<16x32xf32>
    %258 = arith.mulf %257, %257 : vector<16x32xf32>
    %cst_72 = arith.constant dense<0.000000e+00> : vector<16xf32>
    %259 = vector.multi_reduction <add>, %258, %cst_72 [1] : vector<16x32xf32> to vector<16xf32>
    %260 = vector.shape_cast %259 : vector<16xf32> to vector<16x1xf32>
    %cst_73 = arith.constant 0.0322580636 : f32
    %261 = vector.broadcast %cst_73 : f32 to vector<16x1xf32>
    %262 = arith.mulf %260, %261 : vector<16x1xf32>
    %263 = math.sqrt %262 : vector<16x1xf32>
    %cst_74 = arith.constant 9.99999997E-7 : f32
    %264 = vector.broadcast %cst_74 : f32 to vector<16x1xf32>
    %265 = arith.addf %263, %264 : vector<16x1xf32>
    %266 = tpu.reciprocal %265 {approx = true} : vector<16x1xf32> -> vector<16x1xf32>
    %267 = vector.broadcast %255 : vector<16x1xf32> to vector<16x32xf32>
    %268 = arith.subf %247, %267 : vector<16x32xf32>
    %269 = vector.broadcast %250 : vector<1x32xf32> to vector<16x32xf32>
    %270 = arith.mulf %269, %268 : vector<16x32xf32>
    %271 = vector.broadcast %266 : vector<16x1xf32> to vector<16x32xf32>
    %272 = arith.mulf %270, %271 : vector<16x32xf32>
    %273 = vector.broadcast %251 : vector<1x32xf32> to vector<16x32xf32>
    %274 = arith.addf %272, %273 : vector<16x32xf32>
    %c1_75 = arith.constant 1 : index
    %c0_76 = arith.constant 0 : index
    %c0_77 = arith.constant 0 : index
    %275 = vector.load %arg7[%c1_75, %c0_76, %c0_77] : memref<4x1x96xf32, #tpu.memory_space<vmem>>, vector<1x1x96xf32>
    %276 = vector.shape_cast %275 : vector<1x1x96xf32> to vector<1x96xf32>
    %c1_78 = arith.constant 1 : index
    %c0_79 = arith.constant 0 : index
    %c0_80 = arith.constant 0 : index
    %277 = vector.load %arg5[%c1_78, %c0_79, %c0_80] : memref<4x32x64xf32, #tpu.memory_space<vmem>>, vector<1x32x64xf32>
    %278 = vector.shape_cast %277 : vector<1x32x64xf32> to vector<32x64xf32>
    %cst_81 = arith.constant dense<0.000000e+00> : vector<16x64xf32>
    %279 = tpu.matmul %274, %278, %cst_81 {dimension_numbers = #tpu.dot_dimension_numbers<[1], [0], [0], [1], [0, 0, 1, 1], [], []>} : vector<16x32xf32>, vector<32x64xf32>, vector<16x64xf32> -> vector<16x64xf32>
    %280 = vector.extract_strided_slice %276 {offsets = [0, 0], sizes = [1, 64], strides = [1, 1]} : vector<1x96xf32> to vector<1x64xf32>
    %281 = vector.broadcast %280 : vector<1x64xf32> to vector<16x64xf32>
    %282 = arith.addf %279, %281 : vector<16x64xf32>
    %cst_82 = arith.constant 0.000000e+00 : f32
    %283 = vector.broadcast %cst_82 : f32 to vector<16x64xf32>
    %284 = arith.maximumf %282, %283 : vector<16x64xf32>
    %c1_83 = arith.constant 1 : index
    %c0_84 = arith.constant 0 : index
    %c0_85 = arith.constant 0 : index
    %285 = vector.load %arg6[%c1_83, %c0_84, %c0_85] : memref<4x64x32xf32, #tpu.memory_space<vmem>>, vector<1x64x32xf32>
    %286 = vector.shape_cast %285 : vector<1x64x32xf32> to vector<64x32xf32>
    %cst_86 = arith.constant dense<0.000000e+00> : vector<16x32xf32>
    %287 = tpu.matmul %284, %286, %cst_86 {dimension_numbers = #tpu.dot_dimension_numbers<[1], [0], [0], [1], [0, 0, 1, 1], [], []>} : vector<16x64xf32>, vector<64x32xf32>, vector<16x32xf32> -> vector<16x32xf32>
    %288 = vector.extract_strided_slice %276 {offsets = [0, 64], sizes = [1, 32], strides = [1, 1]} : vector<1x96xf32> to vector<1x32xf32>
    %289 = vector.broadcast %288 : vector<1x32xf32> to vector<16x32xf32>
    %290 = arith.addf %287, %289 : vector<16x32xf32>
    %291 = arith.addf %247, %290 : vector<16x32xf32>
    %c4 = arith.constant 4 : index
    %c0_87 = arith.constant 0 : index
    %c0_88 = arith.constant 0 : index
    %292 = vector.load %arg8[%c4, %c0_87, %c0_88] : memref<12x2x32xf32, #tpu.memory_space<vmem>>, vector<1x2x32xf32>
    %293 = vector.shape_cast %292 : vector<1x2x32xf32> to vector<2x32xf32>
    %294 = vector.extract_strided_slice %293 {offsets = [0, 0], sizes = [1, 32], strides = [1, 1]} : vector<2x32xf32> to vector<1x32xf32>
    %295 = vector.extract_strided_slice %293 {offsets = [1, 0], sizes = [1, 32], strides = [1, 1]} : vector<2x32xf32> to vector<1x32xf32>
    %cst_89 = arith.constant dense<0.000000e+00> : vector<16xf32>
    %296 = vector.multi_reduction <add>, %291, %cst_89 [1] : vector<16x32xf32> to vector<16xf32>
    %297 = vector.shape_cast %296 : vector<16xf32> to vector<16x1xf32>
    %cst_90 = arith.constant 3.200000e+01 : f32
    %298 = vector.broadcast %cst_90 : f32 to vector<16x1xf32>
    %299 = arith.divf %297, %298 : vector<16x1xf32>
    %300 = vector.broadcast %299 : vector<16x1xf32> to vector<16x32xf32>
    %301 = arith.subf %291, %300 : vector<16x32xf32>
    %302 = arith.mulf %301, %301 : vector<16x32xf32>
    %cst_91 = arith.constant dense<0.000000e+00> : vector<16xf32>
    %303 = vector.multi_reduction <add>, %302, %cst_91 [1] : vector<16x32xf32> to vector<16xf32>
    %304 = vector.shape_cast %303 : vector<16xf32> to vector<16x1xf32>
    %cst_92 = arith.constant 0.0322580636 : f32
    %305 = vector.broadcast %cst_92 : f32 to vector<16x1xf32>
    %306 = arith.mulf %304, %305 : vector<16x1xf32>
    %307 = math.sqrt %306 : vector<16x1xf32>
    %cst_93 = arith.constant 9.99999997E-7 : f32
    %308 = vector.broadcast %cst_93 : f32 to vector<16x1xf32>
    %309 = arith.addf %307, %308 : vector<16x1xf32>
    %310 = tpu.reciprocal %309 {approx = true} : vector<16x1xf32> -> vector<16x1xf32>
    %311 = vector.broadcast %299 : vector<16x1xf32> to vector<16x32xf32>
    %312 = arith.subf %291, %311 : vector<16x32xf32>
    %313 = vector.broadcast %294 : vector<1x32xf32> to vector<16x32xf32>
    %314 = arith.mulf %313, %312 : vector<16x32xf32>
    %315 = vector.broadcast %310 : vector<16x1xf32> to vector<16x32xf32>
    %316 = arith.mulf %314, %315 : vector<16x32xf32>
    %317 = vector.broadcast %295 : vector<1x32xf32> to vector<16x32xf32>
    %318 = arith.addf %316, %317 : vector<16x32xf32>
    %c16 = arith.constant 16 : index
    %c0_94 = arith.constant 0 : index
    %319 = vector.load %arg0[%c16, %c0_94] : memref<32x32xf32, #tpu.memory_space<vmem>>, vector<16x32xf32>
    %c5 = arith.constant 5 : index
    %c0_95 = arith.constant 0 : index
    %c0_96 = arith.constant 0 : index
    %320 = vector.load %arg8[%c5, %c0_95, %c0_96] : memref<12x2x32xf32, #tpu.memory_space<vmem>>, vector<1x2x32xf32>
    %321 = vector.shape_cast %320 : vector<1x2x32xf32> to vector<2x32xf32>
    %322 = vector.extract_strided_slice %321 {offsets = [0, 0], sizes = [1, 32], strides = [1, 1]} : vector<2x32xf32> to vector<1x32xf32>
    %323 = vector.extract_strided_slice %321 {offsets = [1, 0], sizes = [1, 32], strides = [1, 1]} : vector<2x32xf32> to vector<1x32xf32>
    %cst_97 = arith.constant dense<0.000000e+00> : vector<16xf32>
    %324 = vector.multi_reduction <add>, %319, %cst_97 [1] : vector<16x32xf32> to vector<16xf32>
    %325 = vector.shape_cast %324 : vector<16xf32> to vector<16x1xf32>
    %cst_98 = arith.constant 3.200000e+01 : f32
    %326 = vector.broadcast %cst_98 : f32 to vector<16x1xf32>
    %327 = arith.divf %325, %326 : vector<16x1xf32>
    %328 = vector.broadcast %327 : vector<16x1xf32> to vector<16x32xf32>
    %329 = arith.subf %319, %328 : vector<16x32xf32>
    %330 = arith.mulf %329, %329 : vector<16x32xf32>
    %cst_99 = arith.constant dense<0.000000e+00> : vector<16xf32>
    %331 = vector.multi_reduction <add>, %330, %cst_99 [1] : vector<16x32xf32> to vector<16xf32>
    %332 = vector.shape_cast %331 : vector<16xf32> to vector<16x1xf32>
    %cst_100 = arith.constant 0.0322580636 : f32
    %333 = vector.broadcast %cst_100 : f32 to vector<16x1xf32>
    %334 = arith.mulf %332, %333 : vector<16x1xf32>
    %335 = math.sqrt %334 : vector<16x1xf32>
    %cst_101 = arith.constant 9.99999997E-7 : f32
    %336 = vector.broadcast %cst_101 : f32 to vector<16x1xf32>
    %337 = arith.addf %335, %336 : vector<16x1xf32>
    %338 = tpu.reciprocal %337 {approx = true} : vector<16x1xf32> -> vector<16x1xf32>
    %339 = vector.broadcast %327 : vector<16x1xf32> to vector<16x32xf32>
    %340 = arith.subf %319, %339 : vector<16x32xf32>
    %341 = vector.broadcast %322 : vector<1x32xf32> to vector<16x32xf32>
    %342 = arith.mulf %341, %340 : vector<16x32xf32>
    %343 = vector.broadcast %338 : vector<16x1xf32> to vector<16x32xf32>
    %344 = arith.mulf %342, %343 : vector<16x32xf32>
    %345 = vector.broadcast %323 : vector<1x32xf32> to vector<16x32xf32>
    %346 = arith.addf %344, %345 : vector<16x32xf32>
    %c2_102 = arith.constant 2 : index
    %c0_103 = arith.constant 0 : index
    %c0_104 = arith.constant 0 : index
    %347 = vector.load %arg3[%c2_102, %c0_103, %c0_104] : memref<6x32x128xf32, #tpu.memory_space<vmem>>, vector<1x32x128xf32>
    %348 = vector.shape_cast %347 : vector<1x32x128xf32> to vector<32x128xf32>
    %c2_105 = arith.constant 2 : index
    %c0_106 = arith.constant 0 : index
    %c0_107 = arith.constant 0 : index
    %349 = vector.load %arg4[%c2_105, %c0_106, %c0_107] : memref<6x1x128xf32, #tpu.memory_space<vmem>>, vector<1x1x128xf32>
    %350 = vector.shape_cast %349 : vector<1x1x128xf32> to vector<1x128xf32>
    %351 = vector.extract_strided_slice %348 {offsets = [0, 0], sizes = [32, 96], strides = [1, 1]} : vector<32x128xf32> to vector<32x96xf32>
    %cst_108 = arith.constant dense<0.000000e+00> : vector<16x96xf32>
    %352 = tpu.matmul %346, %351, %cst_108 {dimension_numbers = #tpu.dot_dimension_numbers<[1], [0], [0], [1], [0, 0, 1, 1], [], []>} : vector<16x32xf32>, vector<32x96xf32>, vector<16x96xf32> -> vector<16x96xf32>
    %353 = vector.extract_strided_slice %350 {offsets = [0, 0], sizes = [1, 96], strides = [1, 1]} : vector<1x128xf32> to vector<1x96xf32>
    %354 = vector.broadcast %353 : vector<1x96xf32> to vector<16x96xf32>
    %355 = arith.addf %352, %354 : vector<16x96xf32>
    %356 = vector.extract_strided_slice %355 {offsets = [0, 0], sizes = [16, 32], strides = [1, 1]} : vector<16x96xf32> to vector<16x32xf32>
    %357 = vector.extract_strided_slice %355 {offsets = [0, 32], sizes = [16, 64], strides = [1, 1]} : vector<16x96xf32> to vector<16x64xf32>
    %358 = vector.extract_strided_slice %356 {offsets = [0, 0], sizes = [16, 8], strides = [1, 1]} : vector<16x32xf32> to vector<16x8xf32>
    %359 = vector.shape_cast %358 : vector<16x8xf32> to vector<2x8x8xf32>
    %360 = vector.extract_strided_slice %357 {offsets = [0, 0], sizes = [16, 8], strides = [1, 1]} : vector<16x64xf32> to vector<16x8xf32>
    %361 = vector.shape_cast %360 : vector<16x8xf32> to vector<2x8x8xf32>
    %362 = vector.extract_strided_slice %357 {offsets = [0, 32], sizes = [16, 8], strides = [1, 1]} : vector<16x64xf32> to vector<16x8xf32>
    %363 = vector.shape_cast %362 : vector<16x8xf32> to vector<2x8x8xf32>
    %364 = vector.extract_strided_slice %356 {offsets = [0, 8], sizes = [16, 8], strides = [1, 1]} : vector<16x32xf32> to vector<16x8xf32>
    %365 = vector.shape_cast %364 : vector<16x8xf32> to vector<2x8x8xf32>
    %366 = vector.extract_strided_slice %357 {offsets = [0, 8], sizes = [16, 8], strides = [1, 1]} : vector<16x64xf32> to vector<16x8xf32>
    %367 = vector.shape_cast %366 : vector<16x8xf32> to vector<2x8x8xf32>
    %368 = vector.extract_strided_slice %357 {offsets = [0, 40], sizes = [16, 8], strides = [1, 1]} : vector<16x64xf32> to vector<16x8xf32>
    %369 = vector.shape_cast %368 : vector<16x8xf32> to vector<2x8x8xf32>
    %370 = vector.extract_strided_slice %356 {offsets = [0, 16], sizes = [16, 8], strides = [1, 1]} : vector<16x32xf32> to vector<16x8xf32>
    %371 = vector.shape_cast %370 : vector<16x8xf32> to vector<2x8x8xf32>
    %372 = vector.extract_strided_slice %357 {offsets = [0, 16], sizes = [16, 8], strides = [1, 1]} : vector<16x64xf32> to vector<16x8xf32>
    %373 = vector.shape_cast %372 : vector<16x8xf32> to vector<2x8x8xf32>
    %374 = vector.extract_strided_slice %357 {offsets = [0, 48], sizes = [16, 8], strides = [1, 1]} : vector<16x64xf32> to vector<16x8xf32>
    %375 = vector.shape_cast %374 : vector<16x8xf32> to vector<2x8x8xf32>
    %376 = vector.extract_strided_slice %356 {offsets = [0, 24], sizes = [16, 8], strides = [1, 1]} : vector<16x32xf32> to vector<16x8xf32>
    %377 = vector.shape_cast %376 : vector<16x8xf32> to vector<2x8x8xf32>
    %378 = vector.extract_strided_slice %357 {offsets = [0, 24], sizes = [16, 8], strides = [1, 1]} : vector<16x64xf32> to vector<16x8xf32>
    %379 = vector.shape_cast %378 : vector<16x8xf32> to vector<2x8x8xf32>
    %380 = vector.extract_strided_slice %357 {offsets = [0, 56], sizes = [16, 8], strides = [1, 1]} : vector<16x64xf32> to vector<16x8xf32>
    %381 = vector.shape_cast %380 : vector<16x8xf32> to vector<2x8x8xf32>
    %382 = tpu.concatenate %359, %365, %371, %377 in 0 : vector<2x8x8xf32>, vector<2x8x8xf32>, vector<2x8x8xf32>, vector<2x8x8xf32> -> vector<8x8x8xf32>
    %383 = tpu.concatenate %361, %367, %373, %379 in 0 : vector<2x8x8xf32>, vector<2x8x8xf32>, vector<2x8x8xf32>, vector<2x8x8xf32> -> vector<8x8x8xf32>
    %384 = tpu.concatenate %363, %369, %375, %381 in 0 : vector<2x8x8xf32>, vector<2x8x8xf32>, vector<2x8x8xf32>, vector<2x8x8xf32> -> vector<8x8x8xf32>
    "tpu.trace_start"() <{level = 10 : i32, message = "bqd,bkd->bqk"}> : () -> ()
    %cst_109 = arith.constant dense<0.000000e+00> : vector<8x8x8xf32>
    %385 = tpu.matmul %382, %383, %cst_109 {dimension_numbers = #tpu.dot_dimension_numbers<[2], [2], [1], [1], [0, 0, 0, 1, 1, 1], [0], [0]>} : vector<8x8x8xf32>, vector<8x8x8xf32>, vector<8x8x8xf32> -> vector<8x8x8xf32>
    "tpu.trace_stop"() : () -> ()
    %386 = arith.addf %385, %13 : vector<8x8x8xf32>
    %cst_110 = arith.constant dense<0xFF800000> : vector<8x8xf32>
    %387 = vector.multi_reduction <maximumf>, %386, %cst_110 [2] : vector<8x8x8xf32> to vector<8x8xf32>
    %388 = vector.shape_cast %387 : vector<8x8xf32> to vector<8x8x1xf32>
    %389 = vector.broadcast %388 : vector<8x8x1xf32> to vector<8x8x8xf32>
    %390 = arith.subf %386, %389 : vector<8x8x8xf32>
    %391 = math.exp %390 : vector<8x8x8xf32>
    %cst_111 = arith.constant dense<0.000000e+00> : vector<8x8xf32>
    %392 = vector.multi_reduction <add>, %391, %cst_111 [2] : vector<8x8x8xf32> to vector<8x8xf32>
    %393 = vector.shape_cast %392 : vector<8x8xf32> to vector<8x8x1xf32>
    %394 = tpu.reciprocal %393 {approx = true} : vector<8x8x1xf32> -> vector<8x8x1xf32>
    %395 = vector.broadcast %394 : vector<8x8x1xf32> to vector<8x8x8xf32>
    %396 = arith.mulf %391, %395 : vector<8x8x8xf32>
    "tpu.trace_start"() <{level = 10 : i32, message = "bqk,bkd->bqd"}> : () -> ()
    %cst_112 = arith.constant dense<0.000000e+00> : vector<8x8x8xf32>
    %397 = tpu.matmul %396, %384, %cst_112 {dimension_numbers = #tpu.dot_dimension_numbers<[2], [1], [1], [2], [0, 0, 0, 1, 1, 2], [0], [0]>} : vector<8x8x8xf32>, vector<8x8x8xf32>, vector<8x8x8xf32> -> vector<8x8x8xf32>
    "tpu.trace_stop"() : () -> ()
    %398 = vector.extract_strided_slice %397 {offsets = [0, 0, 0], sizes = [2, 8, 8], strides = [1, 1, 1]} : vector<8x8x8xf32> to vector<2x8x8xf32>
    %399 = vector.shape_cast %398 : vector<2x8x8xf32> to vector<16x8xf32>
    %400 = vector.extract_strided_slice %397 {offsets = [2, 0, 0], sizes = [2, 8, 8], strides = [1, 1, 1]} : vector<8x8x8xf32> to vector<2x8x8xf32>
    %401 = vector.shape_cast %400 : vector<2x8x8xf32> to vector<16x8xf32>
    %402 = vector.extract_strided_slice %397 {offsets = [4, 0, 0], sizes = [2, 8, 8], strides = [1, 1, 1]} : vector<8x8x8xf32> to vector<2x8x8xf32>
    %403 = vector.shape_cast %402 : vector<2x8x8xf32> to vector<16x8xf32>
    %404 = vector.extract_strided_slice %397 {offsets = [6, 0, 0], sizes = [2, 8, 8], strides = [1, 1, 1]} : vector<8x8x8xf32> to vector<2x8x8xf32>
    %405 = vector.shape_cast %404 : vector<2x8x8xf32> to vector<16x8xf32>
    %406 = tpu.concatenate %399, %401, %403, %405 in 1 : vector<16x8xf32>, vector<16x8xf32>, vector<16x8xf32>, vector<16x8xf32> -> vector<16x32xf32>
    %407 = vector.extract_strided_slice %348 {offsets = [0, 96], sizes = [32, 32], strides = [1, 1]} : vector<32x128xf32> to vector<32x32xf32>
    %cst_113 = arith.constant dense<0.000000e+00> : vector<16x32xf32>
    %408 = tpu.matmul %406, %407, %cst_113 {dimension_numbers = #tpu.dot_dimension_numbers<[1], [0], [0], [1], [0, 0, 1, 1], [], []>} : vector<16x32xf32>, vector<32x32xf32>, vector<16x32xf32> -> vector<16x32xf32>
    %409 = vector.extract_strided_slice %350 {offsets = [0, 96], sizes = [1, 32], strides = [1, 1]} : vector<1x128xf32> to vector<1x32xf32>
    %410 = vector.broadcast %409 : vector<1x32xf32> to vector<16x32xf32>
    %411 = arith.addf %408, %410 : vector<16x32xf32>
    %412 = arith.addf %319, %411 : vector<16x32xf32>
    %c6 = arith.constant 6 : index
    %c0_114 = arith.constant 0 : index
    %c0_115 = arith.constant 0 : index
    %413 = vector.load %arg8[%c6, %c0_114, %c0_115] : memref<12x2x32xf32, #tpu.memory_space<vmem>>, vector<1x2x32xf32>
    %414 = vector.shape_cast %413 : vector<1x2x32xf32> to vector<2x32xf32>
    %415 = vector.extract_strided_slice %414 {offsets = [0, 0], sizes = [1, 32], strides = [1, 1]} : vector<2x32xf32> to vector<1x32xf32>
    %416 = vector.extract_strided_slice %414 {offsets = [1, 0], sizes = [1, 32], strides = [1, 1]} : vector<2x32xf32> to vector<1x32xf32>
    %cst_116 = arith.constant dense<0.000000e+00> : vector<16xf32>
    %417 = vector.multi_reduction <add>, %412, %cst_116 [1] : vector<16x32xf32> to vector<16xf32>
    %418 = vector.shape_cast %417 : vector<16xf32> to vector<16x1xf32>
    %cst_117 = arith.constant 3.200000e+01 : f32
    %419 = vector.broadcast %cst_117 : f32 to vector<16x1xf32>
    %420 = arith.divf %418, %419 : vector<16x1xf32>
    %421 = vector.broadcast %420 : vector<16x1xf32> to vector<16x32xf32>
    %422 = arith.subf %412, %421 : vector<16x32xf32>
    %423 = arith.mulf %422, %422 : vector<16x32xf32>
    %cst_118 = arith.constant dense<0.000000e+00> : vector<16xf32>
    %424 = vector.multi_reduction <add>, %423, %cst_118 [1] : vector<16x32xf32> to vector<16xf32>
    %425 = vector.shape_cast %424 : vector<16xf32> to vector<16x1xf32>
    %cst_119 = arith.constant 0.0322580636 : f32
    %426 = vector.broadcast %cst_119 : f32 to vector<16x1xf32>
    %427 = arith.mulf %425, %426 : vector<16x1xf32>
    %428 = math.sqrt %427 : vector<16x1xf32>
    %cst_120 = arith.constant 9.99999997E-7 : f32
    %429 = vector.broadcast %cst_120 : f32 to vector<16x1xf32>
    %430 = arith.addf %428, %429 : vector<16x1xf32>
    %431 = tpu.reciprocal %430 {approx = true} : vector<16x1xf32> -> vector<16x1xf32>
    %432 = vector.broadcast %420 : vector<16x1xf32> to vector<16x32xf32>
    %433 = arith.subf %412, %432 : vector<16x32xf32>
    %434 = vector.broadcast %415 : vector<1x32xf32> to vector<16x32xf32>
    %435 = arith.mulf %434, %433 : vector<16x32xf32>
    %436 = vector.broadcast %431 : vector<16x1xf32> to vector<16x32xf32>
    %437 = arith.mulf %435, %436 : vector<16x32xf32>
    %438 = vector.broadcast %416 : vector<1x32xf32> to vector<16x32xf32>
    %439 = arith.addf %437, %438 : vector<16x32xf32>
    %c4_121 = arith.constant 4 : index
    %c0_122 = arith.constant 0 : index
    %c0_123 = arith.constant 0 : index
    %440 = vector.load %arg3[%c4_121, %c0_122, %c0_123] : memref<6x32x128xf32, #tpu.memory_space<vmem>>, vector<1x32x128xf32>
    %441 = vector.shape_cast %440 : vector<1x32x128xf32> to vector<32x128xf32>
    %c4_124 = arith.constant 4 : index
    %c0_125 = arith.constant 0 : index
    %c0_126 = arith.constant 0 : index
    %442 = vector.load %arg4[%c4_124, %c0_125, %c0_126] : memref<6x1x128xf32, #tpu.memory_space<vmem>>, vector<1x1x128xf32>
    %443 = vector.shape_cast %442 : vector<1x1x128xf32> to vector<1x128xf32>
    %444 = vector.extract_strided_slice %441 {offsets = [0, 0], sizes = [32, 32], strides = [1, 1]} : vector<32x128xf32> to vector<32x32xf32>
    %cst_127 = arith.constant dense<0.000000e+00> : vector<16x32xf32>
    %445 = tpu.matmul %439, %444, %cst_127 {dimension_numbers = #tpu.dot_dimension_numbers<[1], [0], [0], [1], [0, 0, 1, 1], [], []>} : vector<16x32xf32>, vector<32x32xf32>, vector<16x32xf32> -> vector<16x32xf32>
    %446 = vector.extract_strided_slice %443 {offsets = [0, 0], sizes = [1, 32], strides = [1, 1]} : vector<1x128xf32> to vector<1x32xf32>
    %447 = vector.broadcast %446 : vector<1x32xf32> to vector<16x32xf32>
    %448 = arith.addf %445, %447 : vector<16x32xf32>
    %449 = vector.extract_strided_slice %441 {offsets = [0, 32], sizes = [32, 64], strides = [1, 1]} : vector<32x128xf32> to vector<32x64xf32>
    %cst_128 = arith.constant dense<0.000000e+00> : vector<16x64xf32>
    %450 = tpu.matmul %318, %449, %cst_128 {dimension_numbers = #tpu.dot_dimension_numbers<[1], [0], [0], [1], [0, 0, 1, 1], [], []>} : vector<16x32xf32>, vector<32x64xf32>, vector<16x64xf32> -> vector<16x64xf32>
    %451 = vector.extract_strided_slice %443 {offsets = [0, 32], sizes = [1, 64], strides = [1, 1]} : vector<1x128xf32> to vector<1x64xf32>
    %452 = vector.broadcast %451 : vector<1x64xf32> to vector<16x64xf32>
    %453 = arith.addf %450, %452 : vector<16x64xf32>
    %454 = vector.extract_strided_slice %448 {offsets = [0, 0], sizes = [16, 8], strides = [1, 1]} : vector<16x32xf32> to vector<16x8xf32>
    %455 = vector.shape_cast %454 : vector<16x8xf32> to vector<2x8x8xf32>
    %456 = vector.extract_strided_slice %453 {offsets = [0, 0], sizes = [16, 8], strides = [1, 1]} : vector<16x64xf32> to vector<16x8xf32>
    %457 = vector.shape_cast %456 : vector<16x8xf32> to vector<2x8x8xf32>
    %458 = vector.extract_strided_slice %453 {offsets = [0, 32], sizes = [16, 8], strides = [1, 1]} : vector<16x64xf32> to vector<16x8xf32>
    %459 = vector.shape_cast %458 : vector<16x8xf32> to vector<2x8x8xf32>
    %460 = vector.extract_strided_slice %448 {offsets = [0, 8], sizes = [16, 8], strides = [1, 1]} : vector<16x32xf32> to vector<16x8xf32>
    %461 = vector.shape_cast %460 : vector<16x8xf32> to vector<2x8x8xf32>
    %462 = vector.extract_strided_slice %453 {offsets = [0, 8], sizes = [16, 8], strides = [1, 1]} : vector<16x64xf32> to vector<16x8xf32>
    %463 = vector.shape_cast %462 : vector<16x8xf32> to vector<2x8x8xf32>
    %464 = vector.extract_strided_slice %453 {offsets = [0, 40], sizes = [16, 8], strides = [1, 1]} : vector<16x64xf32> to vector<16x8xf32>
    %465 = vector.shape_cast %464 : vector<16x8xf32> to vector<2x8x8xf32>
    %466 = vector.extract_strided_slice %448 {offsets = [0, 16], sizes = [16, 8], strides = [1, 1]} : vector<16x32xf32> to vector<16x8xf32>
    %467 = vector.shape_cast %466 : vector<16x8xf32> to vector<2x8x8xf32>
    %468 = vector.extract_strided_slice %453 {offsets = [0, 16], sizes = [16, 8], strides = [1, 1]} : vector<16x64xf32> to vector<16x8xf32>
    %469 = vector.shape_cast %468 : vector<16x8xf32> to vector<2x8x8xf32>
    %470 = vector.extract_strided_slice %453 {offsets = [0, 48], sizes = [16, 8], strides = [1, 1]} : vector<16x64xf32> to vector<16x8xf32>
    %471 = vector.shape_cast %470 : vector<16x8xf32> to vector<2x8x8xf32>
    %472 = vector.extract_strided_slice %448 {offsets = [0, 24], sizes = [16, 8], strides = [1, 1]} : vector<16x32xf32> to vector<16x8xf32>
    %473 = vector.shape_cast %472 : vector<16x8xf32> to vector<2x8x8xf32>
    %474 = vector.extract_strided_slice %453 {offsets = [0, 24], sizes = [16, 8], strides = [1, 1]} : vector<16x64xf32> to vector<16x8xf32>
    %475 = vector.shape_cast %474 : vector<16x8xf32> to vector<2x8x8xf32>
    %476 = vector.extract_strided_slice %453 {offsets = [0, 56], sizes = [16, 8], strides = [1, 1]} : vector<16x64xf32> to vector<16x8xf32>
    %477 = vector.shape_cast %476 : vector<16x8xf32> to vector<2x8x8xf32>
    %478 = tpu.concatenate %455, %461, %467, %473 in 0 : vector<2x8x8xf32>, vector<2x8x8xf32>, vector<2x8x8xf32>, vector<2x8x8xf32> -> vector<8x8x8xf32>
    %479 = tpu.concatenate %457, %463, %469, %475 in 0 : vector<2x8x8xf32>, vector<2x8x8xf32>, vector<2x8x8xf32>, vector<2x8x8xf32> -> vector<8x8x8xf32>
    %480 = tpu.concatenate %459, %465, %471, %477 in 0 : vector<2x8x8xf32>, vector<2x8x8xf32>, vector<2x8x8xf32>, vector<2x8x8xf32> -> vector<8x8x8xf32>
    "tpu.trace_start"() <{level = 10 : i32, message = "bqd,bkd->bqk"}> : () -> ()
    %cst_129 = arith.constant dense<0.000000e+00> : vector<8x8x8xf32>
    %481 = tpu.matmul %478, %479, %cst_129 {dimension_numbers = #tpu.dot_dimension_numbers<[2], [2], [1], [1], [0, 0, 0, 1, 1, 1], [0], [0]>} : vector<8x8x8xf32>, vector<8x8x8xf32>, vector<8x8x8xf32> -> vector<8x8x8xf32>
    "tpu.trace_stop"() : () -> ()
    %482 = arith.addf %481, %16 : vector<8x8x8xf32>
    %cst_130 = arith.constant dense<0xFF800000> : vector<8x8xf32>
    %483 = vector.multi_reduction <maximumf>, %482, %cst_130 [2] : vector<8x8x8xf32> to vector<8x8xf32>
    %484 = vector.shape_cast %483 : vector<8x8xf32> to vector<8x8x1xf32>
    %485 = vector.broadcast %484 : vector<8x8x1xf32> to vector<8x8x8xf32>
    %486 = arith.subf %482, %485 : vector<8x8x8xf32>
    %487 = math.exp %486 : vector<8x8x8xf32>
    %cst_131 = arith.constant dense<0.000000e+00> : vector<8x8xf32>
    %488 = vector.multi_reduction <add>, %487, %cst_131 [2] : vector<8x8x8xf32> to vector<8x8xf32>
    %489 = vector.shape_cast %488 : vector<8x8xf32> to vector<8x8x1xf32>
    %490 = tpu.reciprocal %489 {approx = true} : vector<8x8x1xf32> -> vector<8x8x1xf32>
    %491 = vector.broadcast %490 : vector<8x8x1xf32> to vector<8x8x8xf32>
    %492 = arith.mulf %487, %491 : vector<8x8x8xf32>
    "tpu.trace_start"() <{level = 10 : i32, message = "bqk,bkd->bqd"}> : () -> ()
    %cst_132 = arith.constant dense<0.000000e+00> : vector<8x8x8xf32>
    %493 = tpu.matmul %492, %480, %cst_132 {dimension_numbers = #tpu.dot_dimension_numbers<[2], [1], [1], [2], [0, 0, 0, 1, 1, 2], [0], [0]>} : vector<8x8x8xf32>, vector<8x8x8xf32>, vector<8x8x8xf32> -> vector<8x8x8xf32>
    "tpu.trace_stop"() : () -> ()
    %494 = vector.extract_strided_slice %493 {offsets = [0, 0, 0], sizes = [2, 8, 8], strides = [1, 1, 1]} : vector<8x8x8xf32> to vector<2x8x8xf32>
    %495 = vector.shape_cast %494 : vector<2x8x8xf32> to vector<16x8xf32>
    %496 = vector.extract_strided_slice %493 {offsets = [2, 0, 0], sizes = [2, 8, 8], strides = [1, 1, 1]} : vector<8x8x8xf32> to vector<2x8x8xf32>
    %497 = vector.shape_cast %496 : vector<2x8x8xf32> to vector<16x8xf32>
    %498 = vector.extract_strided_slice %493 {offsets = [4, 0, 0], sizes = [2, 8, 8], strides = [1, 1, 1]} : vector<8x8x8xf32> to vector<2x8x8xf32>
    %499 = vector.shape_cast %498 : vector<2x8x8xf32> to vector<16x8xf32>
    %500 = vector.extract_strided_slice %493 {offsets = [6, 0, 0], sizes = [2, 8, 8], strides = [1, 1, 1]} : vector<8x8x8xf32> to vector<2x8x8xf32>
    %501 = vector.shape_cast %500 : vector<2x8x8xf32> to vector<16x8xf32>
    %502 = tpu.concatenate %495, %497, %499, %501 in 1 : vector<16x8xf32>, vector<16x8xf32>, vector<16x8xf32>, vector<16x8xf32> -> vector<16x32xf32>
    %503 = vector.extract_strided_slice %441 {offsets = [0, 96], sizes = [32, 32], strides = [1, 1]} : vector<32x128xf32> to vector<32x32xf32>
    %cst_133 = arith.constant dense<0.000000e+00> : vector<16x32xf32>
    %504 = tpu.matmul %502, %503, %cst_133 {dimension_numbers = #tpu.dot_dimension_numbers<[1], [0], [0], [1], [0, 0, 1, 1], [], []>} : vector<16x32xf32>, vector<32x32xf32>, vector<16x32xf32> -> vector<16x32xf32>
    %505 = vector.extract_strided_slice %443 {offsets = [0, 96], sizes = [1, 32], strides = [1, 1]} : vector<1x128xf32> to vector<1x32xf32>
    %506 = vector.broadcast %505 : vector<1x32xf32> to vector<16x32xf32>
    %507 = arith.addf %504, %506 : vector<16x32xf32>
    %508 = arith.addf %412, %507 : vector<16x32xf32>
    %c7 = arith.constant 7 : index
    %c0_134 = arith.constant 0 : index
    %c0_135 = arith.constant 0 : index
    %509 = vector.load %arg8[%c7, %c0_134, %c0_135] : memref<12x2x32xf32, #tpu.memory_space<vmem>>, vector<1x2x32xf32>
    %510 = vector.shape_cast %509 : vector<1x2x32xf32> to vector<2x32xf32>
    %511 = vector.extract_strided_slice %510 {offsets = [0, 0], sizes = [1, 32], strides = [1, 1]} : vector<2x32xf32> to vector<1x32xf32>
    %512 = vector.extract_strided_slice %510 {offsets = [1, 0], sizes = [1, 32], strides = [1, 1]} : vector<2x32xf32> to vector<1x32xf32>
    %cst_136 = arith.constant dense<0.000000e+00> : vector<16xf32>
    %513 = vector.multi_reduction <add>, %508, %cst_136 [1] : vector<16x32xf32> to vector<16xf32>
    %514 = vector.shape_cast %513 : vector<16xf32> to vector<16x1xf32>
    %cst_137 = arith.constant 3.200000e+01 : f32
    %515 = vector.broadcast %cst_137 : f32 to vector<16x1xf32>
    %516 = arith.divf %514, %515 : vector<16x1xf32>
    %517 = vector.broadcast %516 : vector<16x1xf32> to vector<16x32xf32>
    %518 = arith.subf %508, %517 : vector<16x32xf32>
    %519 = arith.mulf %518, %518 : vector<16x32xf32>
    %cst_138 = arith.constant dense<0.000000e+00> : vector<16xf32>
    %520 = vector.multi_reduction <add>, %519, %cst_138 [1] : vector<16x32xf32> to vector<16xf32>
    %521 = vector.shape_cast %520 : vector<16xf32> to vector<16x1xf32>
    %cst_139 = arith.constant 0.0322580636 : f32
    %522 = vector.broadcast %cst_139 : f32 to vector<16x1xf32>
    %523 = arith.mulf %521, %522 : vector<16x1xf32>
    %524 = math.sqrt %523 : vector<16x1xf32>
    %cst_140 = arith.constant 9.99999997E-7 : f32
    %525 = vector.broadcast %cst_140 : f32 to vector<16x1xf32>
    %526 = arith.addf %524, %525 : vector<16x1xf32>
    %527 = tpu.reciprocal %526 {approx = true} : vector<16x1xf32> -> vector<16x1xf32>
    %528 = vector.broadcast %516 : vector<16x1xf32> to vector<16x32xf32>
    %529 = arith.subf %508, %528 : vector<16x32xf32>
    %530 = vector.broadcast %511 : vector<1x32xf32> to vector<16x32xf32>
    %531 = arith.mulf %530, %529 : vector<16x32xf32>
    %532 = vector.broadcast %527 : vector<16x1xf32> to vector<16x32xf32>
    %533 = arith.mulf %531, %532 : vector<16x32xf32>
    %534 = vector.broadcast %512 : vector<1x32xf32> to vector<16x32xf32>
    %535 = arith.addf %533, %534 : vector<16x32xf32>
    %c2_141 = arith.constant 2 : index
    %c0_142 = arith.constant 0 : index
    %c0_143 = arith.constant 0 : index
    %536 = vector.load %arg7[%c2_141, %c0_142, %c0_143] : memref<4x1x96xf32, #tpu.memory_space<vmem>>, vector<1x1x96xf32>
    %537 = vector.shape_cast %536 : vector<1x1x96xf32> to vector<1x96xf32>
    %c2_144 = arith.constant 2 : index
    %c0_145 = arith.constant 0 : index
    %c0_146 = arith.constant 0 : index
    %538 = vector.load %arg5[%c2_144, %c0_145, %c0_146] : memref<4x32x64xf32, #tpu.memory_space<vmem>>, vector<1x32x64xf32>
    %539 = vector.shape_cast %538 : vector<1x32x64xf32> to vector<32x64xf32>
    %cst_147 = arith.constant dense<0.000000e+00> : vector<16x64xf32>
    %540 = tpu.matmul %535, %539, %cst_147 {dimension_numbers = #tpu.dot_dimension_numbers<[1], [0], [0], [1], [0, 0, 1, 1], [], []>} : vector<16x32xf32>, vector<32x64xf32>, vector<16x64xf32> -> vector<16x64xf32>
    %541 = vector.extract_strided_slice %537 {offsets = [0, 0], sizes = [1, 64], strides = [1, 1]} : vector<1x96xf32> to vector<1x64xf32>
    %542 = vector.broadcast %541 : vector<1x64xf32> to vector<16x64xf32>
    %543 = arith.addf %540, %542 : vector<16x64xf32>
    %cst_148 = arith.constant 0.000000e+00 : f32
    %544 = vector.broadcast %cst_148 : f32 to vector<16x64xf32>
    %545 = arith.maximumf %543, %544 : vector<16x64xf32>
    %c2_149 = arith.constant 2 : index
    %c0_150 = arith.constant 0 : index
    %c0_151 = arith.constant 0 : index
    %546 = vector.load %arg6[%c2_149, %c0_150, %c0_151] : memref<4x64x32xf32, #tpu.memory_space<vmem>>, vector<1x64x32xf32>
    %547 = vector.shape_cast %546 : vector<1x64x32xf32> to vector<64x32xf32>
    %cst_152 = arith.constant dense<0.000000e+00> : vector<16x32xf32>
    %548 = tpu.matmul %545, %547, %cst_152 {dimension_numbers = #tpu.dot_dimension_numbers<[1], [0], [0], [1], [0, 0, 1, 1], [], []>} : vector<16x64xf32>, vector<64x32xf32>, vector<16x32xf32> -> vector<16x32xf32>
    %549 = vector.extract_strided_slice %537 {offsets = [0, 64], sizes = [1, 32], strides = [1, 1]} : vector<1x96xf32> to vector<1x32xf32>
    %550 = vector.broadcast %549 : vector<1x32xf32> to vector<16x32xf32>
    %551 = arith.addf %548, %550 : vector<16x32xf32>
    %552 = arith.addf %508, %551 : vector<16x32xf32>
    %c8 = arith.constant 8 : index
    %c0_153 = arith.constant 0 : index
    %c0_154 = arith.constant 0 : index
    %553 = vector.load %arg8[%c8, %c0_153, %c0_154] : memref<12x2x32xf32, #tpu.memory_space<vmem>>, vector<1x2x32xf32>
    %554 = vector.shape_cast %553 : vector<1x2x32xf32> to vector<2x32xf32>
    %555 = vector.extract_strided_slice %554 {offsets = [0, 0], sizes = [1, 32], strides = [1, 1]} : vector<2x32xf32> to vector<1x32xf32>
    %556 = vector.extract_strided_slice %554 {offsets = [1, 0], sizes = [1, 32], strides = [1, 1]} : vector<2x32xf32> to vector<1x32xf32>
    %cst_155 = arith.constant dense<0.000000e+00> : vector<16xf32>
    %557 = vector.multi_reduction <add>, %552, %cst_155 [1] : vector<16x32xf32> to vector<16xf32>
    %558 = vector.shape_cast %557 : vector<16xf32> to vector<16x1xf32>
    %cst_156 = arith.constant 3.200000e+01 : f32
    %559 = vector.broadcast %cst_156 : f32 to vector<16x1xf32>
    %560 = arith.divf %558, %559 : vector<16x1xf32>
    %561 = vector.broadcast %560 : vector<16x1xf32> to vector<16x32xf32>
    %562 = arith.subf %552, %561 : vector<16x32xf32>
    %563 = arith.mulf %562, %562 : vector<16x32xf32>
    %cst_157 = arith.constant dense<0.000000e+00> : vector<16xf32>
    %564 = vector.multi_reduction <add>, %563, %cst_157 [1] : vector<16x32xf32> to vector<16xf32>
    %565 = vector.shape_cast %564 : vector<16xf32> to vector<16x1xf32>
    %cst_158 = arith.constant 0.0322580636 : f32
    %566 = vector.broadcast %cst_158 : f32 to vector<16x1xf32>
    %567 = arith.mulf %565, %566 : vector<16x1xf32>
    %568 = math.sqrt %567 : vector<16x1xf32>
    %cst_159 = arith.constant 9.99999997E-7 : f32
    %569 = vector.broadcast %cst_159 : f32 to vector<16x1xf32>
    %570 = arith.addf %568, %569 : vector<16x1xf32>
    %571 = tpu.reciprocal %570 {approx = true} : vector<16x1xf32> -> vector<16x1xf32>
    %572 = vector.broadcast %560 : vector<16x1xf32> to vector<16x32xf32>
    %573 = arith.subf %552, %572 : vector<16x32xf32>
    %574 = vector.broadcast %555 : vector<1x32xf32> to vector<16x32xf32>
    %575 = arith.mulf %574, %573 : vector<16x32xf32>
    %576 = vector.broadcast %571 : vector<16x1xf32> to vector<16x32xf32>
    %577 = arith.mulf %575, %576 : vector<16x32xf32>
    %578 = vector.broadcast %556 : vector<1x32xf32> to vector<16x32xf32>
    %579 = arith.addf %577, %578 : vector<16x32xf32>
    %c3_160 = arith.constant 3 : index
    %c0_161 = arith.constant 0 : index
    %c0_162 = arith.constant 0 : index
    %580 = vector.load %arg3[%c3_160, %c0_161, %c0_162] : memref<6x32x128xf32, #tpu.memory_space<vmem>>, vector<1x32x128xf32>
    %581 = vector.shape_cast %580 : vector<1x32x128xf32> to vector<32x128xf32>
    %c3_163 = arith.constant 3 : index
    %c0_164 = arith.constant 0 : index
    %c0_165 = arith.constant 0 : index
    %582 = vector.load %arg4[%c3_163, %c0_164, %c0_165] : memref<6x1x128xf32, #tpu.memory_space<vmem>>, vector<1x1x128xf32>
    %583 = vector.shape_cast %582 : vector<1x1x128xf32> to vector<1x128xf32>
    %584 = vector.extract_strided_slice %581 {offsets = [0, 0], sizes = [32, 96], strides = [1, 1]} : vector<32x128xf32> to vector<32x96xf32>
    %cst_166 = arith.constant dense<0.000000e+00> : vector<16x96xf32>
    %585 = tpu.matmul %579, %584, %cst_166 {dimension_numbers = #tpu.dot_dimension_numbers<[1], [0], [0], [1], [0, 0, 1, 1], [], []>} : vector<16x32xf32>, vector<32x96xf32>, vector<16x96xf32> -> vector<16x96xf32>
    %586 = vector.extract_strided_slice %583 {offsets = [0, 0], sizes = [1, 96], strides = [1, 1]} : vector<1x128xf32> to vector<1x96xf32>
    %587 = vector.broadcast %586 : vector<1x96xf32> to vector<16x96xf32>
    %588 = arith.addf %585, %587 : vector<16x96xf32>
    %589 = vector.extract_strided_slice %588 {offsets = [0, 0], sizes = [16, 32], strides = [1, 1]} : vector<16x96xf32> to vector<16x32xf32>
    %590 = vector.extract_strided_slice %588 {offsets = [0, 32], sizes = [16, 64], strides = [1, 1]} : vector<16x96xf32> to vector<16x64xf32>
    %591 = vector.extract_strided_slice %589 {offsets = [0, 0], sizes = [16, 8], strides = [1, 1]} : vector<16x32xf32> to vector<16x8xf32>
    %592 = vector.shape_cast %591 : vector<16x8xf32> to vector<2x8x8xf32>
    %593 = vector.extract_strided_slice %590 {offsets = [0, 0], sizes = [16, 8], strides = [1, 1]} : vector<16x64xf32> to vector<16x8xf32>
    %594 = vector.shape_cast %593 : vector<16x8xf32> to vector<2x8x8xf32>
    %595 = vector.extract_strided_slice %590 {offsets = [0, 32], sizes = [16, 8], strides = [1, 1]} : vector<16x64xf32> to vector<16x8xf32>
    %596 = vector.shape_cast %595 : vector<16x8xf32> to vector<2x8x8xf32>
    %597 = vector.extract_strided_slice %589 {offsets = [0, 8], sizes = [16, 8], strides = [1, 1]} : vector<16x32xf32> to vector<16x8xf32>
    %598 = vector.shape_cast %597 : vector<16x8xf32> to vector<2x8x8xf32>
    %599 = vector.extract_strided_slice %590 {offsets = [0, 8], sizes = [16, 8], strides = [1, 1]} : vector<16x64xf32> to vector<16x8xf32>
    %600 = vector.shape_cast %599 : vector<16x8xf32> to vector<2x8x8xf32>
    %601 = vector.extract_strided_slice %590 {offsets = [0, 40], sizes = [16, 8], strides = [1, 1]} : vector<16x64xf32> to vector<16x8xf32>
    %602 = vector.shape_cast %601 : vector<16x8xf32> to vector<2x8x8xf32>
    %603 = vector.extract_strided_slice %589 {offsets = [0, 16], sizes = [16, 8], strides = [1, 1]} : vector<16x32xf32> to vector<16x8xf32>
    %604 = vector.shape_cast %603 : vector<16x8xf32> to vector<2x8x8xf32>
    %605 = vector.extract_strided_slice %590 {offsets = [0, 16], sizes = [16, 8], strides = [1, 1]} : vector<16x64xf32> to vector<16x8xf32>
    %606 = vector.shape_cast %605 : vector<16x8xf32> to vector<2x8x8xf32>
    %607 = vector.extract_strided_slice %590 {offsets = [0, 48], sizes = [16, 8], strides = [1, 1]} : vector<16x64xf32> to vector<16x8xf32>
    %608 = vector.shape_cast %607 : vector<16x8xf32> to vector<2x8x8xf32>
    %609 = vector.extract_strided_slice %589 {offsets = [0, 24], sizes = [16, 8], strides = [1, 1]} : vector<16x32xf32> to vector<16x8xf32>
    %610 = vector.shape_cast %609 : vector<16x8xf32> to vector<2x8x8xf32>
    %611 = vector.extract_strided_slice %590 {offsets = [0, 24], sizes = [16, 8], strides = [1, 1]} : vector<16x64xf32> to vector<16x8xf32>
    %612 = vector.shape_cast %611 : vector<16x8xf32> to vector<2x8x8xf32>
    %613 = vector.extract_strided_slice %590 {offsets = [0, 56], sizes = [16, 8], strides = [1, 1]} : vector<16x64xf32> to vector<16x8xf32>
    %614 = vector.shape_cast %613 : vector<16x8xf32> to vector<2x8x8xf32>
    %615 = tpu.concatenate %592, %598, %604, %610 in 0 : vector<2x8x8xf32>, vector<2x8x8xf32>, vector<2x8x8xf32>, vector<2x8x8xf32> -> vector<8x8x8xf32>
    %616 = tpu.concatenate %594, %600, %606, %612 in 0 : vector<2x8x8xf32>, vector<2x8x8xf32>, vector<2x8x8xf32>, vector<2x8x8xf32> -> vector<8x8x8xf32>
    %617 = tpu.concatenate %596, %602, %608, %614 in 0 : vector<2x8x8xf32>, vector<2x8x8xf32>, vector<2x8x8xf32>, vector<2x8x8xf32> -> vector<8x8x8xf32>
    "tpu.trace_start"() <{level = 10 : i32, message = "bqd,bkd->bqk"}> : () -> ()
    %cst_167 = arith.constant dense<0.000000e+00> : vector<8x8x8xf32>
    %618 = tpu.matmul %615, %616, %cst_167 {dimension_numbers = #tpu.dot_dimension_numbers<[2], [2], [1], [1], [0, 0, 0, 1, 1, 1], [0], [0]>} : vector<8x8x8xf32>, vector<8x8x8xf32>, vector<8x8x8xf32> -> vector<8x8x8xf32>
    "tpu.trace_stop"() : () -> ()
    %619 = arith.addf %618, %13 : vector<8x8x8xf32>
    %cst_168 = arith.constant dense<0xFF800000> : vector<8x8xf32>
    %620 = vector.multi_reduction <maximumf>, %619, %cst_168 [2] : vector<8x8x8xf32> to vector<8x8xf32>
    %621 = vector.shape_cast %620 : vector<8x8xf32> to vector<8x8x1xf32>
    %622 = vector.broadcast %621 : vector<8x8x1xf32> to vector<8x8x8xf32>
    %623 = arith.subf %619, %622 : vector<8x8x8xf32>
    %624 = math.exp %623 : vector<8x8x8xf32>
    %cst_169 = arith.constant dense<0.000000e+00> : vector<8x8xf32>
    %625 = vector.multi_reduction <add>, %624, %cst_169 [2] : vector<8x8x8xf32> to vector<8x8xf32>
    %626 = vector.shape_cast %625 : vector<8x8xf32> to vector<8x8x1xf32>
    %627 = tpu.reciprocal %626 {approx = true} : vector<8x8x1xf32> -> vector<8x8x1xf32>
    %628 = vector.broadcast %627 : vector<8x8x1xf32> to vector<8x8x8xf32>
    %629 = arith.mulf %624, %628 : vector<8x8x8xf32>
    "tpu.trace_start"() <{level = 10 : i32, message = "bqk,bkd->bqd"}> : () -> ()
    %cst_170 = arith.constant dense<0.000000e+00> : vector<8x8x8xf32>
    %630 = tpu.matmul %629, %617, %cst_170 {dimension_numbers = #tpu.dot_dimension_numbers<[2], [1], [1], [2], [0, 0, 0, 1, 1, 2], [0], [0]>} : vector<8x8x8xf32>, vector<8x8x8xf32>, vector<8x8x8xf32> -> vector<8x8x8xf32>
    "tpu.trace_stop"() : () -> ()
    %631 = vector.extract_strided_slice %630 {offsets = [0, 0, 0], sizes = [2, 8, 8], strides = [1, 1, 1]} : vector<8x8x8xf32> to vector<2x8x8xf32>
    %632 = vector.shape_cast %631 : vector<2x8x8xf32> to vector<16x8xf32>
    %633 = vector.extract_strided_slice %630 {offsets = [2, 0, 0], sizes = [2, 8, 8], strides = [1, 1, 1]} : vector<8x8x8xf32> to vector<2x8x8xf32>
    %634 = vector.shape_cast %633 : vector<2x8x8xf32> to vector<16x8xf32>
    %635 = vector.extract_strided_slice %630 {offsets = [4, 0, 0], sizes = [2, 8, 8], strides = [1, 1, 1]} : vector<8x8x8xf32> to vector<2x8x8xf32>
    %636 = vector.shape_cast %635 : vector<2x8x8xf32> to vector<16x8xf32>
    %637 = vector.extract_strided_slice %630 {offsets = [6, 0, 0], sizes = [2, 8, 8], strides = [1, 1, 1]} : vector<8x8x8xf32> to vector<2x8x8xf32>
    %638 = vector.shape_cast %637 : vector<2x8x8xf32> to vector<16x8xf32>
    %639 = tpu.concatenate %632, %634, %636, %638 in 1 : vector<16x8xf32>, vector<16x8xf32>, vector<16x8xf32>, vector<16x8xf32> -> vector<16x32xf32>
    %640 = vector.extract_strided_slice %581 {offsets = [0, 96], sizes = [32, 32], strides = [1, 1]} : vector<32x128xf32> to vector<32x32xf32>
    %cst_171 = arith.constant dense<0.000000e+00> : vector<16x32xf32>
    %641 = tpu.matmul %639, %640, %cst_171 {dimension_numbers = #tpu.dot_dimension_numbers<[1], [0], [0], [1], [0, 0, 1, 1], [], []>} : vector<16x32xf32>, vector<32x32xf32>, vector<16x32xf32> -> vector<16x32xf32>
    %642 = vector.extract_strided_slice %583 {offsets = [0, 96], sizes = [1, 32], strides = [1, 1]} : vector<1x128xf32> to vector<1x32xf32>
    %643 = vector.broadcast %642 : vector<1x32xf32> to vector<16x32xf32>
    %644 = arith.addf %641, %643 : vector<16x32xf32>
    %645 = arith.addf %552, %644 : vector<16x32xf32>
    %c9 = arith.constant 9 : index
    %c0_172 = arith.constant 0 : index
    %c0_173 = arith.constant 0 : index
    %646 = vector.load %arg8[%c9, %c0_172, %c0_173] : memref<12x2x32xf32, #tpu.memory_space<vmem>>, vector<1x2x32xf32>
    %647 = vector.shape_cast %646 : vector<1x2x32xf32> to vector<2x32xf32>
    %648 = vector.extract_strided_slice %647 {offsets = [0, 0], sizes = [1, 32], strides = [1, 1]} : vector<2x32xf32> to vector<1x32xf32>
    %649 = vector.extract_strided_slice %647 {offsets = [1, 0], sizes = [1, 32], strides = [1, 1]} : vector<2x32xf32> to vector<1x32xf32>
    %cst_174 = arith.constant dense<0.000000e+00> : vector<16xf32>
    %650 = vector.multi_reduction <add>, %645, %cst_174 [1] : vector<16x32xf32> to vector<16xf32>
    %651 = vector.shape_cast %650 : vector<16xf32> to vector<16x1xf32>
    %cst_175 = arith.constant 3.200000e+01 : f32
    %652 = vector.broadcast %cst_175 : f32 to vector<16x1xf32>
    %653 = arith.divf %651, %652 : vector<16x1xf32>
    %654 = vector.broadcast %653 : vector<16x1xf32> to vector<16x32xf32>
    %655 = arith.subf %645, %654 : vector<16x32xf32>
    %656 = arith.mulf %655, %655 : vector<16x32xf32>
    %cst_176 = arith.constant dense<0.000000e+00> : vector<16xf32>
    %657 = vector.multi_reduction <add>, %656, %cst_176 [1] : vector<16x32xf32> to vector<16xf32>
    %658 = vector.shape_cast %657 : vector<16xf32> to vector<16x1xf32>
    %cst_177 = arith.constant 0.0322580636 : f32
    %659 = vector.broadcast %cst_177 : f32 to vector<16x1xf32>
    %660 = arith.mulf %658, %659 : vector<16x1xf32>
    %661 = math.sqrt %660 : vector<16x1xf32>
    %cst_178 = arith.constant 9.99999997E-7 : f32
    %662 = vector.broadcast %cst_178 : f32 to vector<16x1xf32>
    %663 = arith.addf %661, %662 : vector<16x1xf32>
    %664 = tpu.reciprocal %663 {approx = true} : vector<16x1xf32> -> vector<16x1xf32>
    %665 = vector.broadcast %653 : vector<16x1xf32> to vector<16x32xf32>
    %666 = arith.subf %645, %665 : vector<16x32xf32>
    %667 = vector.broadcast %648 : vector<1x32xf32> to vector<16x32xf32>
    %668 = arith.mulf %667, %666 : vector<16x32xf32>
    %669 = vector.broadcast %664 : vector<16x1xf32> to vector<16x32xf32>
    %670 = arith.mulf %668, %669 : vector<16x32xf32>
    %671 = vector.broadcast %649 : vector<1x32xf32> to vector<16x32xf32>
    %672 = arith.addf %670, %671 : vector<16x32xf32>
    %c5_179 = arith.constant 5 : index
    %c0_180 = arith.constant 0 : index
    %c0_181 = arith.constant 0 : index
    %673 = vector.load %arg3[%c5_179, %c0_180, %c0_181] : memref<6x32x128xf32, #tpu.memory_space<vmem>>, vector<1x32x128xf32>
    %674 = vector.shape_cast %673 : vector<1x32x128xf32> to vector<32x128xf32>
    %c5_182 = arith.constant 5 : index
    %c0_183 = arith.constant 0 : index
    %c0_184 = arith.constant 0 : index
    %675 = vector.load %arg4[%c5_182, %c0_183, %c0_184] : memref<6x1x128xf32, #tpu.memory_space<vmem>>, vector<1x1x128xf32>
    %676 = vector.shape_cast %675 : vector<1x1x128xf32> to vector<1x128xf32>
    %677 = vector.extract_strided_slice %674 {offsets = [0, 0], sizes = [32, 32], strides = [1, 1]} : vector<32x128xf32> to vector<32x32xf32>
    %cst_185 = arith.constant dense<0.000000e+00> : vector<16x32xf32>
    %678 = tpu.matmul %672, %677, %cst_185 {dimension_numbers = #tpu.dot_dimension_numbers<[1], [0], [0], [1], [0, 0, 1, 1], [], []>} : vector<16x32xf32>, vector<32x32xf32>, vector<16x32xf32> -> vector<16x32xf32>
    %679 = vector.extract_strided_slice %676 {offsets = [0, 0], sizes = [1, 32], strides = [1, 1]} : vector<1x128xf32> to vector<1x32xf32>
    %680 = vector.broadcast %679 : vector<1x32xf32> to vector<16x32xf32>
    %681 = arith.addf %678, %680 : vector<16x32xf32>
    %682 = vector.extract_strided_slice %674 {offsets = [0, 32], sizes = [32, 64], strides = [1, 1]} : vector<32x128xf32> to vector<32x64xf32>
    %cst_186 = arith.constant dense<0.000000e+00> : vector<16x64xf32>
    %683 = tpu.matmul %318, %682, %cst_186 {dimension_numbers = #tpu.dot_dimension_numbers<[1], [0], [0], [1], [0, 0, 1, 1], [], []>} : vector<16x32xf32>, vector<32x64xf32>, vector<16x64xf32> -> vector<16x64xf32>
    %684 = vector.extract_strided_slice %676 {offsets = [0, 32], sizes = [1, 64], strides = [1, 1]} : vector<1x128xf32> to vector<1x64xf32>
    %685 = vector.broadcast %684 : vector<1x64xf32> to vector<16x64xf32>
    %686 = arith.addf %683, %685 : vector<16x64xf32>
    %687 = vector.extract_strided_slice %681 {offsets = [0, 0], sizes = [16, 8], strides = [1, 1]} : vector<16x32xf32> to vector<16x8xf32>
    %688 = vector.shape_cast %687 : vector<16x8xf32> to vector<2x8x8xf32>
    %689 = vector.extract_strided_slice %686 {offsets = [0, 0], sizes = [16, 8], strides = [1, 1]} : vector<16x64xf32> to vector<16x8xf32>
    %690 = vector.shape_cast %689 : vector<16x8xf32> to vector<2x8x8xf32>
    %691 = vector.extract_strided_slice %686 {offsets = [0, 32], sizes = [16, 8], strides = [1, 1]} : vector<16x64xf32> to vector<16x8xf32>
    %692 = vector.shape_cast %691 : vector<16x8xf32> to vector<2x8x8xf32>
    %693 = vector.extract_strided_slice %681 {offsets = [0, 8], sizes = [16, 8], strides = [1, 1]} : vector<16x32xf32> to vector<16x8xf32>
    %694 = vector.shape_cast %693 : vector<16x8xf32> to vector<2x8x8xf32>
    %695 = vector.extract_strided_slice %686 {offsets = [0, 8], sizes = [16, 8], strides = [1, 1]} : vector<16x64xf32> to vector<16x8xf32>
    %696 = vector.shape_cast %695 : vector<16x8xf32> to vector<2x8x8xf32>
    %697 = vector.extract_strided_slice %686 {offsets = [0, 40], sizes = [16, 8], strides = [1, 1]} : vector<16x64xf32> to vector<16x8xf32>
    %698 = vector.shape_cast %697 : vector<16x8xf32> to vector<2x8x8xf32>
    %699 = vector.extract_strided_slice %681 {offsets = [0, 16], sizes = [16, 8], strides = [1, 1]} : vector<16x32xf32> to vector<16x8xf32>
    %700 = vector.shape_cast %699 : vector<16x8xf32> to vector<2x8x8xf32>
    %701 = vector.extract_strided_slice %686 {offsets = [0, 16], sizes = [16, 8], strides = [1, 1]} : vector<16x64xf32> to vector<16x8xf32>
    %702 = vector.shape_cast %701 : vector<16x8xf32> to vector<2x8x8xf32>
    %703 = vector.extract_strided_slice %686 {offsets = [0, 48], sizes = [16, 8], strides = [1, 1]} : vector<16x64xf32> to vector<16x8xf32>
    %704 = vector.shape_cast %703 : vector<16x8xf32> to vector<2x8x8xf32>
    %705 = vector.extract_strided_slice %681 {offsets = [0, 24], sizes = [16, 8], strides = [1, 1]} : vector<16x32xf32> to vector<16x8xf32>
    %706 = vector.shape_cast %705 : vector<16x8xf32> to vector<2x8x8xf32>
    %707 = vector.extract_strided_slice %686 {offsets = [0, 24], sizes = [16, 8], strides = [1, 1]} : vector<16x64xf32> to vector<16x8xf32>
    %708 = vector.shape_cast %707 : vector<16x8xf32> to vector<2x8x8xf32>
    %709 = vector.extract_strided_slice %686 {offsets = [0, 56], sizes = [16, 8], strides = [1, 1]} : vector<16x64xf32> to vector<16x8xf32>
    %710 = vector.shape_cast %709 : vector<16x8xf32> to vector<2x8x8xf32>
    %711 = tpu.concatenate %688, %694, %700, %706 in 0 : vector<2x8x8xf32>, vector<2x8x8xf32>, vector<2x8x8xf32>, vector<2x8x8xf32> -> vector<8x8x8xf32>
    %712 = tpu.concatenate %690, %696, %702, %708 in 0 : vector<2x8x8xf32>, vector<2x8x8xf32>, vector<2x8x8xf32>, vector<2x8x8xf32> -> vector<8x8x8xf32>
    %713 = tpu.concatenate %692, %698, %704, %710 in 0 : vector<2x8x8xf32>, vector<2x8x8xf32>, vector<2x8x8xf32>, vector<2x8x8xf32> -> vector<8x8x8xf32>
    "tpu.trace_start"() <{level = 10 : i32, message = "bqd,bkd->bqk"}> : () -> ()
    %cst_187 = arith.constant dense<0.000000e+00> : vector<8x8x8xf32>
    %714 = tpu.matmul %711, %712, %cst_187 {dimension_numbers = #tpu.dot_dimension_numbers<[2], [2], [1], [1], [0, 0, 0, 1, 1, 1], [0], [0]>} : vector<8x8x8xf32>, vector<8x8x8xf32>, vector<8x8x8xf32> -> vector<8x8x8xf32>
    "tpu.trace_stop"() : () -> ()
    %715 = arith.addf %714, %16 : vector<8x8x8xf32>
    %cst_188 = arith.constant dense<0xFF800000> : vector<8x8xf32>
    %716 = vector.multi_reduction <maximumf>, %715, %cst_188 [2] : vector<8x8x8xf32> to vector<8x8xf32>
    %717 = vector.shape_cast %716 : vector<8x8xf32> to vector<8x8x1xf32>
    %718 = vector.broadcast %717 : vector<8x8x1xf32> to vector<8x8x8xf32>
    %719 = arith.subf %715, %718 : vector<8x8x8xf32>
    %720 = math.exp %719 : vector<8x8x8xf32>
    %cst_189 = arith.constant dense<0.000000e+00> : vector<8x8xf32>
    %721 = vector.multi_reduction <add>, %720, %cst_189 [2] : vector<8x8x8xf32> to vector<8x8xf32>
    %722 = vector.shape_cast %721 : vector<8x8xf32> to vector<8x8x1xf32>
    %723 = tpu.reciprocal %722 {approx = true} : vector<8x8x1xf32> -> vector<8x8x1xf32>
    %724 = vector.broadcast %723 : vector<8x8x1xf32> to vector<8x8x8xf32>
    %725 = arith.mulf %720, %724 : vector<8x8x8xf32>
    "tpu.trace_start"() <{level = 10 : i32, message = "bqk,bkd->bqd"}> : () -> ()
    %cst_190 = arith.constant dense<0.000000e+00> : vector<8x8x8xf32>
    %726 = tpu.matmul %725, %713, %cst_190 {dimension_numbers = #tpu.dot_dimension_numbers<[2], [1], [1], [2], [0, 0, 0, 1, 1, 2], [0], [0]>} : vector<8x8x8xf32>, vector<8x8x8xf32>, vector<8x8x8xf32> -> vector<8x8x8xf32>
    "tpu.trace_stop"() : () -> ()
    %727 = vector.extract_strided_slice %726 {offsets = [0, 0, 0], sizes = [2, 8, 8], strides = [1, 1, 1]} : vector<8x8x8xf32> to vector<2x8x8xf32>
    %728 = vector.shape_cast %727 : vector<2x8x8xf32> to vector<16x8xf32>
    %729 = vector.extract_strided_slice %726 {offsets = [2, 0, 0], sizes = [2, 8, 8], strides = [1, 1, 1]} : vector<8x8x8xf32> to vector<2x8x8xf32>
    %730 = vector.shape_cast %729 : vector<2x8x8xf32> to vector<16x8xf32>
    %731 = vector.extract_strided_slice %726 {offsets = [4, 0, 0], sizes = [2, 8, 8], strides = [1, 1, 1]} : vector<8x8x8xf32> to vector<2x8x8xf32>
    %732 = vector.shape_cast %731 : vector<2x8x8xf32> to vector<16x8xf32>
    %733 = vector.extract_strided_slice %726 {offsets = [6, 0, 0], sizes = [2, 8, 8], strides = [1, 1, 1]} : vector<8x8x8xf32> to vector<2x8x8xf32>
    %734 = vector.shape_cast %733 : vector<2x8x8xf32> to vector<16x8xf32>
    %735 = tpu.concatenate %728, %730, %732, %734 in 1 : vector<16x8xf32>, vector<16x8xf32>, vector<16x8xf32>, vector<16x8xf32> -> vector<16x32xf32>
    %736 = vector.extract_strided_slice %674 {offsets = [0, 96], sizes = [32, 32], strides = [1, 1]} : vector<32x128xf32> to vector<32x32xf32>
    %cst_191 = arith.constant dense<0.000000e+00> : vector<16x32xf32>
    %737 = tpu.matmul %735, %736, %cst_191 {dimension_numbers = #tpu.dot_dimension_numbers<[1], [0], [0], [1], [0, 0, 1, 1], [], []>} : vector<16x32xf32>, vector<32x32xf32>, vector<16x32xf32> -> vector<16x32xf32>
    %738 = vector.extract_strided_slice %676 {offsets = [0, 96], sizes = [1, 32], strides = [1, 1]} : vector<1x128xf32> to vector<1x32xf32>
    %739 = vector.broadcast %738 : vector<1x32xf32> to vector<16x32xf32>
    %740 = arith.addf %737, %739 : vector<16x32xf32>
    %741 = arith.addf %645, %740 : vector<16x32xf32>
    %c10 = arith.constant 10 : index
    %c0_192 = arith.constant 0 : index
    %c0_193 = arith.constant 0 : index
    %742 = vector.load %arg8[%c10, %c0_192, %c0_193] : memref<12x2x32xf32, #tpu.memory_space<vmem>>, vector<1x2x32xf32>
    %743 = vector.shape_cast %742 : vector<1x2x32xf32> to vector<2x32xf32>
    %744 = vector.extract_strided_slice %743 {offsets = [0, 0], sizes = [1, 32], strides = [1, 1]} : vector<2x32xf32> to vector<1x32xf32>
    %745 = vector.extract_strided_slice %743 {offsets = [1, 0], sizes = [1, 32], strides = [1, 1]} : vector<2x32xf32> to vector<1x32xf32>
    %cst_194 = arith.constant dense<0.000000e+00> : vector<16xf32>
    %746 = vector.multi_reduction <add>, %741, %cst_194 [1] : vector<16x32xf32> to vector<16xf32>
    %747 = vector.shape_cast %746 : vector<16xf32> to vector<16x1xf32>
    %cst_195 = arith.constant 3.200000e+01 : f32
    %748 = vector.broadcast %cst_195 : f32 to vector<16x1xf32>
    %749 = arith.divf %747, %748 : vector<16x1xf32>
    %750 = vector.broadcast %749 : vector<16x1xf32> to vector<16x32xf32>
    %751 = arith.subf %741, %750 : vector<16x32xf32>
    %752 = arith.mulf %751, %751 : vector<16x32xf32>
    %cst_196 = arith.constant dense<0.000000e+00> : vector<16xf32>
    %753 = vector.multi_reduction <add>, %752, %cst_196 [1] : vector<16x32xf32> to vector<16xf32>
    %754 = vector.shape_cast %753 : vector<16xf32> to vector<16x1xf32>
    %cst_197 = arith.constant 0.0322580636 : f32
    %755 = vector.broadcast %cst_197 : f32 to vector<16x1xf32>
    %756 = arith.mulf %754, %755 : vector<16x1xf32>
    %757 = math.sqrt %756 : vector<16x1xf32>
    %cst_198 = arith.constant 9.99999997E-7 : f32
    %758 = vector.broadcast %cst_198 : f32 to vector<16x1xf32>
    %759 = arith.addf %757, %758 : vector<16x1xf32>
    %760 = tpu.reciprocal %759 {approx = true} : vector<16x1xf32> -> vector<16x1xf32>
    %761 = vector.broadcast %749 : vector<16x1xf32> to vector<16x32xf32>
    %762 = arith.subf %741, %761 : vector<16x32xf32>
    %763 = vector.broadcast %744 : vector<1x32xf32> to vector<16x32xf32>
    %764 = arith.mulf %763, %762 : vector<16x32xf32>
    %765 = vector.broadcast %760 : vector<16x1xf32> to vector<16x32xf32>
    %766 = arith.mulf %764, %765 : vector<16x32xf32>
    %767 = vector.broadcast %745 : vector<1x32xf32> to vector<16x32xf32>
    %768 = arith.addf %766, %767 : vector<16x32xf32>
    %c3_199 = arith.constant 3 : index
    %c0_200 = arith.constant 0 : index
    %c0_201 = arith.constant 0 : index
    %769 = vector.load %arg7[%c3_199, %c0_200, %c0_201] : memref<4x1x96xf32, #tpu.memory_space<vmem>>, vector<1x1x96xf32>
    %770 = vector.shape_cast %769 : vector<1x1x96xf32> to vector<1x96xf32>
    %c3_202 = arith.constant 3 : index
    %c0_203 = arith.constant 0 : index
    %c0_204 = arith.constant 0 : index
    %771 = vector.load %arg5[%c3_202, %c0_203, %c0_204] : memref<4x32x64xf32, #tpu.memory_space<vmem>>, vector<1x32x64xf32>
    %772 = vector.shape_cast %771 : vector<1x32x64xf32> to vector<32x64xf32>
    %cst_205 = arith.constant dense<0.000000e+00> : vector<16x64xf32>
    %773 = tpu.matmul %768, %772, %cst_205 {dimension_numbers = #tpu.dot_dimension_numbers<[1], [0], [0], [1], [0, 0, 1, 1], [], []>} : vector<16x32xf32>, vector<32x64xf32>, vector<16x64xf32> -> vector<16x64xf32>
    %774 = vector.extract_strided_slice %770 {offsets = [0, 0], sizes = [1, 64], strides = [1, 1]} : vector<1x96xf32> to vector<1x64xf32>
    %775 = vector.broadcast %774 : vector<1x64xf32> to vector<16x64xf32>
    %776 = arith.addf %773, %775 : vector<16x64xf32>
    %cst_206 = arith.constant 0.000000e+00 : f32
    %777 = vector.broadcast %cst_206 : f32 to vector<16x64xf32>
    %778 = arith.maximumf %776, %777 : vector<16x64xf32>
    %c3_207 = arith.constant 3 : index
    %c0_208 = arith.constant 0 : index
    %c0_209 = arith.constant 0 : index
    %779 = vector.load %arg6[%c3_207, %c0_208, %c0_209] : memref<4x64x32xf32, #tpu.memory_space<vmem>>, vector<1x64x32xf32>
    %780 = vector.shape_cast %779 : vector<1x64x32xf32> to vector<64x32xf32>
    %cst_210 = arith.constant dense<0.000000e+00> : vector<16x32xf32>
    %781 = tpu.matmul %778, %780, %cst_210 {dimension_numbers = #tpu.dot_dimension_numbers<[1], [0], [0], [1], [0, 0, 1, 1], [], []>} : vector<16x64xf32>, vector<64x32xf32>, vector<16x32xf32> -> vector<16x32xf32>
    %782 = vector.extract_strided_slice %770 {offsets = [0, 64], sizes = [1, 32], strides = [1, 1]} : vector<1x96xf32> to vector<1x32xf32>
    %783 = vector.broadcast %782 : vector<1x32xf32> to vector<16x32xf32>
    %784 = arith.addf %781, %783 : vector<16x32xf32>
    %785 = arith.addf %741, %784 : vector<16x32xf32>
    %c11 = arith.constant 11 : index
    %c0_211 = arith.constant 0 : index
    %c0_212 = arith.constant 0 : index
    %786 = vector.load %arg8[%c11, %c0_211, %c0_212] : memref<12x2x32xf32, #tpu.memory_space<vmem>>, vector<1x2x32xf32>
    %787 = vector.shape_cast %786 : vector<1x2x32xf32> to vector<2x32xf32>
    %788 = vector.extract_strided_slice %787 {offsets = [0, 0], sizes = [1, 32], strides = [1, 1]} : vector<2x32xf32> to vector<1x32xf32>
    %789 = vector.extract_strided_slice %787 {offsets = [1, 0], sizes = [1, 32], strides = [1, 1]} : vector<2x32xf32> to vector<1x32xf32>
    %cst_213 = arith.constant dense<0.000000e+00> : vector<16xf32>
    %790 = vector.multi_reduction <add>, %785, %cst_213 [1] : vector<16x32xf32> to vector<16xf32>
    %791 = vector.shape_cast %790 : vector<16xf32> to vector<16x1xf32>
    %cst_214 = arith.constant 3.200000e+01 : f32
    %792 = vector.broadcast %cst_214 : f32 to vector<16x1xf32>
    %793 = arith.divf %791, %792 : vector<16x1xf32>
    %794 = vector.broadcast %793 : vector<16x1xf32> to vector<16x32xf32>
    %795 = arith.subf %785, %794 : vector<16x32xf32>
    %796 = arith.mulf %795, %795 : vector<16x32xf32>
    %cst_215 = arith.constant dense<0.000000e+00> : vector<16xf32>
    %797 = vector.multi_reduction <add>, %796, %cst_215 [1] : vector<16x32xf32> to vector<16xf32>
    %798 = vector.shape_cast %797 : vector<16xf32> to vector<16x1xf32>
    %cst_216 = arith.constant 0.0322580636 : f32
    %799 = vector.broadcast %cst_216 : f32 to vector<16x1xf32>
    %800 = arith.mulf %798, %799 : vector<16x1xf32>
    %801 = math.sqrt %800 : vector<16x1xf32>
    %cst_217 = arith.constant 9.99999997E-7 : f32
    %802 = vector.broadcast %cst_217 : f32 to vector<16x1xf32>
    %803 = arith.addf %801, %802 : vector<16x1xf32>
    %804 = tpu.reciprocal %803 {approx = true} : vector<16x1xf32> -> vector<16x1xf32>
    %805 = vector.broadcast %793 : vector<16x1xf32> to vector<16x32xf32>
    %806 = arith.subf %785, %805 : vector<16x32xf32>
    %807 = vector.broadcast %788 : vector<1x32xf32> to vector<16x32xf32>
    %808 = arith.mulf %807, %806 : vector<16x32xf32>
    %809 = vector.broadcast %804 : vector<16x1xf32> to vector<16x32xf32>
    %810 = arith.mulf %808, %809 : vector<16x32xf32>
    %811 = vector.broadcast %789 : vector<1x32xf32> to vector<16x32xf32>
    %812 = arith.addf %810, %811 : vector<16x32xf32>
    %c0_218 = arith.constant 0 : index
    %c0_219 = arith.constant 0 : index
    %813 = vector.load %arg9[%c0_218, %c0_219] : memref<16x32xf32, #tpu.memory_space<vmem>>, vector<16x32xf32>
    tpu.vector_store %arg9[%c0_218, %c0_219], %812 {strides = array<i32>} : memref<16x32xf32, #tpu.memory_space<vmem>>, vector<16x32xf32>,
    return
  }
}

</mosaic_0001>

<bundles_post_ra>
// kernel: encoder_decoder_forward.1
= control target key start
LH: loop header
LB: loop body
LE: loop exit
PB: predicated region body
PF: predicated region fallthrough
CT: control target
= control target key end

     0   :  { %vm60_vm0 = vcmask 261120   ;;  %s14929_s0 = inlined_call_operand.vmem [shape: f32[32,32], index: 0, kind: input, shape index: {}]   ;;  %s14930_s1 = inlined_call_operand.vmem [shape: f32[2,1,8], index: 1, kind: input, shape index: {}]   ;;  %s14931_s2 = inlined_call_operand.vmem [shape: f32[2,8,8], index: 2, kind: input, shape index: {}]   ;;  %s14932_s3 = inlined_call_operand.vmem [shape: f32[6,32,128], index: 3, kind: input, shape index: {}]   ;;  %s14933_s4 = inlined_call_operand.vmem [shape: f32[6,1,128], index: 4, kind: input, shape index: {}]   ;;  %s14934_s5 = inlined_call_operand.vmem [shape: f32[4,32,64], index: 5, kind: input, shape index: {}]   ;;  %s14935_s6 = inlined_call_operand.vmem [shape: f32[4,64,32], index: 6, kind: input, shape index: {}]   ;;  %s14936_s7 = inlined_call_operand.vmem [shape: f32[4,1,96], index: 7, kind: input, shape index: {}]   ;;  %s14937_s8 = inlined_call_operand.vmem [shape: f32[12,2,32], index: 8, kind: input, shape index: {}]   ;;  %s14938_s9 = inlined_call_operand.hbm [shape: f32[16,32], index: 9, kind: output, shape index: {}]  }
   0x1   :  { %v12987_v0 = vld [vmem:[%s14929_s0] sm:$0xff]  ;;  %v12992_v1 = vld [vmem:[%s14929_s0 + $0x8] sm:$0xff] }
   0x2   :  { %14 = vsyncpa [#allocation3], 0  ;;  %v61_v2 = vsel %vm60_vm0, %v12987_v0, 0.0  ;;  %v64_v3 = vsel %vm60_vm0, %v12992_v1, 0.0  ;;  %v13005_v14 = vld [vmem:[%s14932_s3] sm:$0xff]  ;;  %v13010_v15 = vld [vmem:[%s14932_s3 + $0x8] sm:$0xff]  ;;  %v47_v26 = vlaneseq }
   0x3   :  { %62 = vadd.xlane.f32.xlu0 %v61_v2  ;;  %v13015_v16 = vld [vmem:[%s14932_s3 + $0x10] sm:$0xff]  ;;  %v12529_v17 = vpack.i.bf16 %v13010_v15, %v13005_v14  ;;  %v12308_v18 = vpack.c.bf16 %v13010_v15, %v13005_v14  ;;  %v13024_v19 = vld [vmem:[%s14932_s3 + $0x18] sm:$0xff]  ;;  %v59_v39 = vld [vmem:[%s14937_s8] sm:$0x3]  ;;  %v12921_v53 = vmov 0.0   ;;  %vm12922_vm5 = vmmov 0  }
   0x4   :  { %v12312_v20 = vpack.c.bf16 %v13024_v19, %v13015_v16  ;;  %v48_v31 = vshrl.u32 %v47_v26, 7  ;;  %v13042_v52 = vld [vmem:[%s14933_s4] ss:$0 sm:$0xff]  ;;  %11575 = vmatprep.subr.mxu0 %v12921_v53  ;;  %11577 = vmatprep.mubr.msk.f32.mxu0 %vm12922_vm5, %v12921_v53  ;;  %s12923_s25 = smov 120   ;;  %s12924_s26 = smov 112   ;;  %vm222_vm6 = vcmask 64512  }
   0x5   :  { %12309 = vmatprep.subr.bf16.mxu1 %v12308_v18  ;;  %s12925_s27 = smov 104   ;;  %s12926_s28 = smov 96   ;;  %vm1551_vm7 = vcmask 130048   ;;  %vm1554_vm8 = vcmask 195584   ;;  %vm1818_vm13 = vcmask 523264  }
   0x6   :  { %12311 = vmatpush3.bf16.msra.mxu1 %v12308_v18  ;;  %v13028_v37 = vsub.s32 0, %v48_v31  ;;  %v13034_v42 = vsub.s32 1, %v48_v31  ;;  %s12928_s12 = smov 32   ;;  %s12929_s13 = smov 8  }
   0x7   :  { %65 = vadd.xlane.f32.xlu0 %v64_v3  ;;  %12313 = vmatprep.subr.bf16.mxu1 %v12312_v20  ;;  %s12930_s14 = smov 16   ;;  %s12931_s15 = smov 24  }
   0x8   :  { %v103_v41 = vrot.slane %v59_v39, %v13028_v37  ;;  %v111_v44 = vrot.slane %v59_v39, %v13034_v42 }
   0xa   :  { %12315 = vmatpush3.bf16.msra.mxu1 %v12312_v20 }
   0xb   :  { %11565 = vmatprep.subr.mxu1 %v12921_v53 }
  0x90   :  { %v63_v4 = vpop.xlane.xlu0 %62 }
  0x91   :  { %v68_v5 = vmul.f32 0.03125, %v63_v4 }
  0x93   :  { %v70_v6 = vsub.f32 %v12987_v0, %v68_v5 }
  0x94   :  { %v66_v7 = vpop.xlane.xlu0 %65 }
  0x95   :  { %v69_v8 = vmul.f32 0.03125, %v66_v7  ;;  %v72_v9 = vmul.f32 %v70_v6, %v70_v6  ;;  %v104_v43 = vmul.f32 %v103_v41, %v70_v6 }
  0x97   :  { %v71_v10 = vsub.f32 %v12992_v1, %v69_v8  ;;  %v74_v11 = vsel %vm60_vm0, %v72_v9, 0.0 }
  0x98   :  { %75 = vadd.xlane.f32.xlu1 %v74_v11 }
  0x99   :  { %v73_v12 = vmul.f32 %v71_v10, %v71_v10  ;;  %v105_v47 = vmul.f32 %v103_v41, %v71_v10  ;;  %v33_v10 = vld [vmem:[%s14930_s1] sm:$0x1] }
  0x9a   :  { %v10937_v11 = vadd.f32 -1.0, %v33_v10 }
  0x9b   :  { %v77_v13 = vsel %vm60_vm0, %v73_v12, 0.0 }
  0x9c   :  { %78 = vadd.xlane.f32.xlu1 %v77_v13  ;;  %v37_v12 = vmul.f32 1e+09, %v10937_v11  ;;  %v34_v13 = vld [vmem:[%s14930_s1 + $0x1] sm:$0x1]  ;;  %s12927_s1 = smov 64  }
  0x9d   :  { %v10938_v18 = vadd.f32 -1.0, %v34_v13 }
  0x9e   :  { %v13151_v20 = vrot.slane %v37_v12, %v13028_v37 }
 0x125   :  { %v76_v21 = vpop.xlane.xlu1 %75 }
 0x126   :  { %v80_v22 = vmul.f32 0.032258064, %v76_v21 }
 0x128   :  { %12609 = vrsqrt.f32 %v80_v22  ;;  %vm84_vm1 = vcmp.eq.f32.partialorder %v80_v22, inf  ;;  %v87_v28 = vand.u32 2147483648, %v80_v22  ;;  %vm86_vm2 = vcmp.eq.f32.partialorder %v80_v22, 0.0 }
 0x129   :  { %v79_v23 = vpop.xlane.xlu1 %78 }
 0x12a   :  { %v81_v24 = vmul.f32 0.032258064, %v79_v23 }
 0x12c   :  { %12611 = vrsqrt.f32 %v81_v24  ;;  %vm91_vm3 = vcmp.eq.f32.partialorder %v81_v24, inf  ;;  %v94_v35 = vand.u32 2147483648, %v81_v24  ;;  %vm93_vm4 = vcmp.eq.f32.partialorder %v81_v24, 0.0 }
 0x132   :  { %v12610_v25 = vpop.eup %12609 }
 0x133   :  { %v83_v27 = vmul.f32 %v12610_v25, %v80_v22 }
 0x135   :  { %v85_v29 = vsel %vm84_vm1, %v80_v22, %v83_v27  ;;  %v38_v22 = vmul.f32 1e+09, %v10938_v18 }
 0x136   :  { %v12612_v30 = vpop.eup %12611  ;;  %v88_v32 = vsel %vm86_vm2, %v87_v28, %v85_v29 }
 0x137   :  { %v90_v33 = vmul.f32 %v12612_v30, %v81_v24  ;;  %v96_v34 = vadd.f32 1e-06, %v88_v32  ;;  %v13156_v26 = vrot.slane %v38_v22, %v13028_v37 }
 0x139   :  { %v92_v36 = vsel %vm91_vm3, %v81_v24, %v90_v33  ;;  %12613 = vrcp.f32 %v96_v34 }
 0x13a   :  { %v95_v38 = vsel %vm93_vm4, %v94_v35, %v92_v36 }
 0x13b   :  { %v97_v40 = vadd.f32 1e-06, %v95_v38 }
 0x13d   :  { %12615 = vrcp.f32 %v97_v40 }
 0x143   :  { %v12614_v45 = vpop.eup %12613 }
 0x144   :  { %v106_v46 = vmul.f32 %v12614_v45, %v104_v43 }
 0x146   :  { %v112_v48 = vadd.f32 %v111_v44, %v106_v46 }
 0x147   :  { %v12616_v49 = vpop.eup %12615 }
 0x148   :  { %v107_v50 = vmul.f32 %v12616_v49, %v105_v47  ;;  %11562 = vmatprep.mubr.msk.f32.mxu1 %vm60_vm0, %v112_v48 }
 0x14a   :  { %v113_v51 = vadd.f32 %v111_v44, %v107_v50 }
 0x14c   :  { %11563 = vmatmul.mubr.msk.f32.vlgmr.msra.gmra.mrb[0].mxu1 %vm60_vm0, %v113_v51 }
 0x14d   :  { %11567 = vmatprep.mubr.msk.f32.mxu1 %vm12922_vm5, %v12921_v53 }
 0x21f   :  { %v11564_v54 = vpop.f32.mrb[0].mxu1 }
 0x220   :  { %v13051_v55 = vadd.f32 %v11564_v54, %v13042_v52  ;;  %v197_v56 = vpop.f32.mrb[1].mxu1 }
 0x221   :  { %v13054_v57 = vadd.f32 %v13042_v52, %v197_v56 }
 0x222   :  { %210 = vrot.lane.b32.xlu1 %v13051_v55, %s12923_s25 }
 0x223   :  { %208 = vrot.lane.b32.xlu0 %v13054_v57, %s12923_s25 }
 0x226   :  { %212 = vrot.lane.b32.xlu1 %v13054_v57, %s12924_s26 }
 0x227   :  { %216 = vrot.lane.b32.xlu0 %v13054_v57, %s12925_s27 }
 0x22a   :  { %214 = vrot.lane.b32.xlu1 %v13051_v55, %s12924_s26 }
 0x22b   :  { %220 = vrot.lane.b32.xlu0 %v13054_v57, %s12926_s28 }
 0x22e   :  { %218 = vrot.lane.b32.xlu1 %v13051_v55, %s12925_s27 }
 0x232   :  { %297 = vrot.lane.b32.xlu1 %v13051_v55, %s12926_s28 }
 0x294   :  { %v13072_v58 = vpop.permute.xlu1 %210 }
 0x295   :  { %449 = vrot.lane.b32.xlu1 %v13072_v58, %s12926_s28  ;;  %v13076_v59 = vpop.permute.xlu0 %208 }
 0x296   :  { %373 = vrot.lane.b32.xlu0 %v13076_v59, %s12926_s28 }
 0x298   :  { %v13080_v60 = vpop.permute.xlu1 %212 }
 0x299   :  { %v13082_v61 = vpop.permute.xlu0 %216 }
 0x29a   :  { %525 = vrot.lane.b32.xlu0 %v13080_v60, %s12926_s28 }
 0x29c   :  { %v13086_v62 = vpop.permute.xlu1 %214 }
 0x29d   :  { %601 = vrot.lane.b32.xlu1 %v13086_v62, %s12926_s28  ;;  %v221_v63 = vpop.permute.xlu0 %220 }
 0x29e   :  { %677 = vrot.lane.b32.xlu0 %v13082_v61, %s12926_s28  ;;  %11566 = vmatpush3.xpose.msk.msra.mxu1 %vm222_vm6, %v221_v63 }
 0x29f   :  { %11570 = vmatprep.subr.mxu1 %v12921_v53 }
 0x2a0   :  { %v13094_v2 = vpop.permute.xlu1 %218 }
 0x2a1   :  { %753 = vrot.lane.b32.xlu1 %v13094_v2, %s12926_s28  ;;  %11568 = vmatmul.mubr.msk.f32.vlgmr.msra.gmra.mrb[2].mxu1 %vm222_vm6, %v13054_v57 }
 0x2a2   :  { %11572 = vmatprep.mubr.msk.f32.mxu1 %vm12922_vm5, %v12921_v53 }
 0x2a4   :  { %v298_v3 = vpop.permute.xlu1 %297 }
 0x2a5   :  { %11571 = vmatpush3.xpose.msk.msra.mxu1 %vm222_vm6, %v298_v3 }
 0x2a6   :  { %11580 = vmatprep.subr.mxu1 %v12921_v53 }
 0x2a8   :  { %11573 = vmatmul.mubr.msk.f32.vlgmr.msra.gmra.mrb[4].mxu1 %vm222_vm6, %v13051_v55 }
 0x2a9   :  { %11582 = vmatprep.mubr.msk.f32.mxu1 %vm12922_vm5, %v12921_v53 }
 0x307   :  { %v450_v4 = vpop.permute.xlu1 %449 }
 0x308   :  { %11581 = vmatpush3.xpose.msk.msra.mxu1 %vm222_vm6, %v450_v4  ;;  %v374_v5 = vpop.permute.xlu0 %373 }
 0x309   :  { %11576 = vmatpush3.xpose.msk.msra.mxu0 %vm222_vm6, %v374_v5  ;;  %11590 = vmatprep.subr.mxu1 %v12921_v53 }
 0x30a   :  { %11585 = vmatprep.subr.mxu0 %v12921_v53 }
 0x30b   :  { %11583 = vmatmul.mubr.msk.f32.vlgmr.msra.gmra.mrb[6].mxu1 %vm222_vm6, %v13072_v58 }
 0x30c   :  { %11578 = vmatmul.mubr.msk.f32.vlgmr.msra.gmra.mrb[0].mxu0 %vm222_vm6, %v13076_v59  ;;  %v526_v6 = vpop.permute.xlu0 %525  ;;  %11592 = vmatprep.mubr.msk.f32.mxu1 %vm12922_vm5, %v12921_v53 }
 0x30d   :  { %11586 = vmatpush3.xpose.msk.msra.mxu0 %vm222_vm6, %v526_v6  ;;  %11587 = vmatprep.mubr.msk.f32.mxu0 %vm12922_vm5, %v12921_v53 }
 0x30e   :  { %11595 = vmatprep.subr.mxu0 %v12921_v53 }
 0x30f   :  { %v602_v7 = vpop.permute.xlu1 %601 }
 0x310   :  { %11588 = vmatmul.mubr.msk.f32.vlgmr.msra.gmra.mrb[2].mxu0 %vm222_vm6, %v13080_v60  ;;  %11591 = vmatpush3.xpose.msk.msra.mxu1 %vm222_vm6, %v602_v7  ;;  %v678_v8 = vpop.permute.xlu0 %677 }
 0x311   :  { %11596 = vmatpush3.xpose.msk.msra.mxu0 %vm222_vm6, %v678_v8  ;;  %11597 = vmatprep.mubr.msk.f32.mxu0 %vm12922_vm5, %v12921_v53 }
 0x312   :  { %11600 = vmatprep.subr.mxu1 %v12921_v53  ;;  %11605 = vmatprep.subr.mxu0 %v12921_v53 }
 0x313   :  { %v754_v9 = vpop.permute.xlu1 %753  ;;  %11593 = vmatmul.mubr.msk.f32.vlgmr.msra.gmra.mrb[8].mxu1 %vm222_vm6, %v13086_v62 }
 0x314   :  { %11598 = vmatmul.mubr.msk.f32.vlgmr.msra.gmra.mrb[4].mxu0 %vm222_vm6, %v13082_v61  ;;  %11601 = vmatpush3.xpose.msk.msra.mxu1 %vm222_vm6, %v754_v9 }
 0x315   :  { %11602 = vmatprep.mubr.msk.f32.mxu1 %vm12922_vm5, %v12921_v53  ;;  %11610 = vmatprep.subr.mxu1 %v12921_v53 }
 0x316   :  { %11607 = vmatprep.mubr.msk.f32.mxu0 %vm12922_vm5, %v12921_v53 }
 0x317   :  { %11603 = vmatmul.mubr.msk.f32.vlgmr.msra.gmra.mrb[10].mxu1 %vm222_vm6, %v13094_v2 }
 0x318   :  { %11612 = vmatprep.mubr.msk.f32.mxu1 %vm12922_vm5, %v12921_v53 }
 0x374   :  { %v293_v21 = vpop.f32.mrb[2].mxu1 }
 0x375   :  { %v294_v23 = vadd.f32 %v293_v21, %v13151_v20  ;;  %v11569_v24 = vpop.f32.mrb[3].mxu1 }
 0x377   :  { %v829_v25 = vsel %vm222_vm6, %v294_v23, -inf }
 0x378   :  { %830 = vmax.xlane.f32.xlu0 %v829_v25 }
 0x37b   :  { %v369_v27 = vpop.f32.mrb[4].mxu1 }
 0x37c   :  { %v370_v28 = vadd.f32 %v369_v27, %v13156_v26  ;;  %v11574_v29 = vpop.f32.mrb[5].mxu1 }
 0x37e   :  { %v832_v30 = vsel %vm222_vm6, %v370_v28, -inf }
 0x37f   :  { %833 = vmax.xlane.f32.xlu1 %v832_v30 }
 0x3de   :  { %v521_v31 = vpop.f32.mrb[6].mxu1 }
 0x3df   :  { %v522_v32 = vadd.f32 %v521_v31, %v13156_v26  ;;  %v445_v33 = vpop.f32.mrb[0].mxu0  ;;  %v11584_v34 = vpop.f32.mrb[7].mxu1 }
 0x3e0   :  { %v11579_v35 = vpop.f32.mrb[1].mxu0  ;;  %v446_v36 = vadd.f32 %v445_v33, %v13151_v20 }
 0x3e1   :  { %v838_v38 = vsel %vm222_vm6, %v522_v32, -inf }
 0x3e2   :  { %839 = vmax.xlane.f32.xlu0 %v838_v38  ;;  %v835_v43 = vsel %vm222_vm6, %v446_v36, -inf }
 0x3e3   :  { %v597_v39 = vpop.f32.mrb[2].mxu0 }
 0x3e4   :  { %v11589_v40 = vpop.f32.mrb[3].mxu0  ;;  %v598_v41 = vadd.f32 %v597_v39, %v13151_v20 }
 0x3e6   :  { %v673_v44 = vpop.f32.mrb[8].mxu1  ;;  %836 = vmax.xlane.f32.xlu0 %v835_v43  ;;  %v841_v51 = vsel %vm222_vm6, %v598_v41, -inf }
 0x3e7   :  { %v674_v45 = vadd.f32 %v673_v44, %v13156_v26  ;;  %v11594_v46 = vpop.f32.mrb[9].mxu1  ;;  %v749_v47 = vpop.f32.mrb[4].mxu0 }
 0x3e8   :  { %v11599_v48 = vpop.f32.mrb[5].mxu0  ;;  %v750_v49 = vadd.f32 %v749_v47, %v13151_v20 }
 0x3e9   :  { %v844_v50 = vsel %vm222_vm6, %v674_v45, -inf }
 0x3ea   :  { %v825_v54 = vpop.f32.mrb[10].mxu1  ;;  %845 = vmax.xlane.f32.xlu1 %v844_v50  ;;  %842 = vmax.xlane.f32.xlu0 %v841_v51  ;;  %v847_v4 = vsel %vm222_vm6, %v750_v49, -inf }
 0x3eb   :  { %v826_v56 = vadd.f32 %v825_v54, %v13156_v26  ;;  %v11604_v63 = vpop.f32.mrb[11].mxu1 }
 0x3ed   :  { %v850_v3 = vsel %vm222_vm6, %v826_v56, -inf }
 0x3ee   :  { %851 = vmax.xlane.f32.xlu1 %v850_v3  ;;  %848 = vmax.xlane.f32.xlu0 %v847_v4 }
 0x3ff   :  { %993 = vrot.lane.b32.xlu1 %v13051_v55, %s12927_s1 }
 0x403   :  { %1069 = vrot.lane.b32.xlu1 %v13076_v59, %s12927_s1 }
 0x404   :  { %917 = vrot.lane.b32.xlu0 %v13054_v57, %s12927_s1 }
 0x405   :  { %v831_v5 = vpop.xlane.xlu0 %830 }
 0x406   :  { %v853_v6 = vsub.f32 %v294_v23, %v831_v5 }
 0x407   :  { %1145 = vrot.lane.b32.xlu1 %v13072_v58, %s12927_s1 }
 0x408   :  { %1221 = vrot.lane.b32.xlu0 %v13080_v60, %s12927_s1  ;;  %v861_v7 = vmul.f32 1.442695, %v853_v6 }
 0x40a   :  { %12617 = vpow2.f32 %v861_v7 }
 0x40b   :  { %1297 = vrot.lane.b32.xlu1 %v13086_v62, %s12927_s1 }
 0x40c   :  { %v834_v8 = vpop.xlane.xlu1 %833 }
 0x40d   :  { %v854_v55 = vsub.f32 %v370_v28, %v834_v8 }
 0x40f   :  { %v863_v9 = vmul.f32 1.442695, %v854_v55 }
 0x411   :  { %12619 = vpow2.f32 %v863_v9 }
 0x414   :  { %v13184_v59 = vpop.eup %12617 }
 0x415   :  { %v877_v57 = vsel %vm222_vm6, %v13184_v59, 0.0 }
 0x41b   :  { %v13188_v58 = vpop.eup %12619 }
 0x41c   :  { %v880_v60 = vsel %vm222_vm6, %v13188_v58, 0.0 }
 0x427   :  { %878 = vadd.xlane.f32.xlu0 %v877_v57 }
 0x42f   :  { %881 = vadd.xlane.f32.xlu1 %v880_v60 }
 0x46f   :  { %v840_v62 = vpop.xlane.xlu0 %839 }
 0x470   :  { %v856_v10 = vsub.f32 %v522_v32, %v840_v62 }
 0x472   :  { %v867_v11 = vmul.f32 1.442695, %v856_v10  ;;  %v12534_v10 = vpack.i.bf16 %v13024_v19, %v13015_v16 }
 0x473   :  { %v837_v12 = vpop.xlane.xlu0 %836 }
 0x474   :  { %12621 = vpow2.f32 %v867_v11  ;;  %v855_v13 = vsub.f32 %v446_v36, %v837_v12 }
 0x476   :  { %v865_v18 = vmul.f32 1.442695, %v855_v13 }
 0x477   :  { %v846_v21 = vpop.xlane.xlu1 %845  ;;  %v843_v22 = vpop.xlane.xlu0 %842 }
 0x478   :  { %12623 = vpow2.f32 %v865_v18  ;;  %v858_v23 = vsub.f32 %v674_v45, %v846_v21  ;;  %v857_v24 = vsub.f32 %v598_v41, %v843_v22 }
 0x47a   :  { %v871_v25 = vmul.f32 1.442695, %v858_v23  ;;  %v869_v27 = vmul.f32 1.442695, %v857_v24 }
 0x47b   :  { %v852_v28 = vpop.xlane.xlu1 %851  ;;  %v849_v29 = vpop.xlane.xlu0 %848 }
 0x47c   :  { %12625 = vpow2.f32 %v871_v25  ;;  %v860_v30 = vsub.f32 %v826_v56, %v852_v28  ;;  %v859_v31 = vsub.f32 %v750_v49, %v849_v29 }
 0x47d   :  { %12627 = vpow2.f32 %v869_v27 }
 0x47e   :  { %v12622_v33 = vpop.eup %12621  ;;  %v875_v32 = vmul.f32 1.442695, %v860_v30  ;;  %v873_v34 = vmul.f32 1.442695, %v859_v31 }
 0x47f   :  { %v994_v35 = vpop.permute.xlu1 %993  ;;  %v918_v38 = vpop.permute.xlu0 %917  ;;  %v886_v36 = vsel %vm222_vm6, %v12622_v33, 0.0 }
 0x480   :  { %12629 = vpow2.f32 %v875_v32  ;;  %11611 = vmatpush3.msra.mxu1 %v994_v35  ;;  %887 = vadd.xlane.f32.xlu1 %v886_v36 }
 0x481   :  { %12631 = vpow2.f32 %v873_v34  ;;  %11606 = vmatpush3.msra.mxu0 %v918_v38  ;;  %11620 = vmatprep.subr.mxu1 %v12921_v53 }
 0x482   :  { %v12624_v39 = vpop.eup %12623  ;;  %11615 = vmatprep.subr.mxu0 %v12921_v53 }
 0x483   :  { %v883_v40 = vsel %vm222_vm6, %v12624_v39, 0.0  ;;  %v1070_v50 = vpop.permute.xlu1 %1069  ;;  %v1222_v51 = vpop.permute.xlu0 %1221 }
 0x484   :  { %884 = vadd.xlane.f32.xlu0 %v883_v40 }
 0x486   :  { %v13196_v41 = vpop.eup %12625 }
 0x487   :  { %v13198_v43 = vpop.eup %12627  ;;  %v892_v44 = vsel %vm222_vm6, %v13196_v41, 0.0  ;;  %v1146_v54 = vpop.permute.xlu1 %1145 }
 0x488   :  { %893 = vadd.xlane.f32.xlu1 %v892_v44  ;;  %v889_v45 = vsel %vm222_vm6, %v13198_v43, 0.0 }
 0x489   :  { %890 = vadd.xlane.f32.xlu0 %v889_v45 }
 0x48a   :  { %v13204_v46 = vpop.eup %12629 }
 0x48b   :  { %v13206_v47 = vpop.eup %12631  ;;  %v898_v48 = vsel %vm222_vm6, %v13204_v46, 0.0  ;;  %v1298_v63 = vpop.permute.xlu1 %1297 }
 0x48c   :  { %899 = vadd.xlane.f32.xlu1 %v898_v48  ;;  %v895_v49 = vsel %vm222_vm6, %v13206_v47, 0.0 }
 0x48d   :  { %896 = vadd.xlane.f32.xlu0 %v895_v49 }
 0x49d   :  { %1449 = vrot.lane.b32.xlu1 %v13094_v2, %s12927_s1 }
 0x4a1   :  { %12535 = vrot.lane.b32.xlu1 %v12534_v10, %s12928_s12 }
 0x4a3   :  { %1373 = vrot.lane.b32.xlu0 %v13082_v61, %s12927_s1 }
 0x4a7   :  { %12530 = vrot.lane.b32.xlu0 %v12529_v17, %s12928_s12 }
 0x4b4   :  { %v879_v56 = vpop.xlane.xlu0 %878 }
 0x4b5   :  { %12633 = vrcp.f32 %v879_v56 }
 0x4bc   :  { %v882_v3 = vpop.xlane.xlu1 %881 }
 0x4bd   :  { %12635 = vrcp.f32 %v882_v3 }
 0x4bf   :  { %v12634_v4 = vpop.eup %12633 }
 0x4c0   :  { %v909_v5 = vmul.f32 %v12634_v4, %v13184_v59 }
 0x4c2   :  { %11608 = vmatmul.mubr.msk.f32.vlgmr.msra.gmra.mrb[6].mxu0 %vm222_vm6, %v909_v5 }
 0x4c3   :  { %11616 = vmatpush3.msra.mxu0 %v1070_v50  ;;  %11617 = vmatprep.mubr.msk.f32.mxu0 %vm12922_vm5, %v12921_v53 }
 0x4c4   :  { %11625 = vmatprep.subr.mxu0 %v12921_v53 }
 0x4c7   :  { %v12636_v61 = vpop.eup %12635 }
 0x4c8   :  { %v910_v2 = vmul.f32 %v12636_v61, %v13188_v58 }
 0x4ca   :  { %11613 = vmatmul.mubr.msk.f32.vlgmr.msra.gmra.mrb[12].mxu1 %vm222_vm6, %v910_v2 }
 0x4cb   :  { %11621 = vmatpush3.msra.mxu1 %v1146_v54  ;;  %11622 = vmatprep.mubr.msk.f32.mxu1 %vm12922_vm5, %v12921_v53 }
 0x4cc   :  { %11630 = vmatprep.subr.mxu1 %v12921_v53 }
 0x50d   :  { %v888_v6 = vpop.xlane.xlu1 %887 }
 0x50e   :  { %12637 = vrcp.f32 %v888_v6 }
 0x511   :  { %v885_v7 = vpop.xlane.xlu0 %884 }
 0x512   :  { %12639 = vrcp.f32 %v885_v7 }
 0x515   :  { %v894_v8 = vpop.xlane.xlu1 %893 }
 0x516   :  { %12641 = vrcp.f32 %v894_v8  ;;  %v891_v55 = vpop.xlane.xlu0 %890 }
 0x517   :  { %12643 = vrcp.f32 %v891_v55 }
 0x518   :  { %v12638_v9 = vpop.eup %12637 }
 0x519   :  { %v900_v59 = vpop.xlane.xlu1 %899  ;;  %v912_v57 = vmul.f32 %v12638_v9, %v12622_v33 }
 0x51a   :  { %12645 = vrcp.f32 %v900_v59  ;;  %v897_v58 = vpop.xlane.xlu0 %896 }
 0x51b   :  { %12647 = vrcp.f32 %v897_v58  ;;  %11623 = vmatmul.mubr.msk.f32.vlgmr.msra.gmra.mrb[14].mxu1 %vm222_vm6, %v912_v57 }
 0x51c   :  { %v12640_v60 = vpop.eup %12639  ;;  %11631 = vmatpush3.msra.mxu1 %v1298_v63  ;;  %11632 = vmatprep.mubr.msk.f32.mxu1 %vm12922_vm5, %v12921_v53 }
 0x51d   :  { %v911_v62 = vmul.f32 %v12640_v60, %v12624_v39  ;;  %11640 = vmatprep.subr.mxu1 %v12921_v53  ;;  %v1450_v19 = vpop.permute.xlu1 %1449 }
 0x51e   :  { %v1374_v14 = vpop.permute.xlu0 %1373 }
 0x51f   :  { %11618 = vmatmul.mubr.msk.f32.vlgmr.msra.gmra.mrb[8].mxu0 %vm222_vm6, %v911_v62 }
 0x520   :  { %v12642_v11 = vpop.eup %12641  ;;  %11626 = vmatpush3.msra.mxu0 %v1222_v51  ;;  %11627 = vmatprep.mubr.msk.f32.mxu0 %vm12922_vm5, %v12921_v53 }
 0x521   :  { %v12644_v12 = vpop.eup %12643  ;;  %11635 = vmatprep.subr.mxu0 %v12921_v53  ;;  %v914_v13 = vmul.f32 %v12642_v11, %v13196_v41  ;;  %v12536_v30 = vpop.permute.xlu1 %12535 }
 0x522   :  { %v913_v16 = vmul.f32 %v12644_v12, %v13198_v43  ;;  %v12531_v27 = vpop.permute.xlu0 %12530  ;;  %v12538_v31 = vunpack.i.h.bf16 %v12536_v30  ;;  %v12537_v33 = vunpack.i.l.bf16 %v12536_v30 }
 0x523   :  { %11633 = vmatmul.mubr.msk.f32.vlgmr.msra.gmra.mrb[16].mxu1 %vm222_vm6, %v914_v13  ;;  %v12533_v28 = vunpack.i.h.bf16 %v12531_v27  ;;  %v12532_v29 = vunpack.i.l.bf16 %v12531_v27  ;;  %v1809_v27 = vld [vmem:[%s14935_s6 + $0x10] sm:$0xff] }
 0x524   :  { %v12646_v18 = vpop.eup %12645  ;;  %11628 = vmatmul.mubr.msk.f32.vlgmr.msra.gmra.mrb[10].mxu0 %vm222_vm6, %v913_v16  ;;  %11641 = vmatpush3.msra.mxu1 %v1450_v19  ;;  %v12320_v34 = vpack.c.bf16 %v12538_v31, %v12537_v33  ;;  %v1811_v31 = vld [vmem:[%s14935_s6 + $0x20] sm:$0xff]  ;;  %v1812_v33 = vld [vmem:[%s14935_s6 + $0x28] sm:$0xff] }
 0x525   :  { %v12648_v15 = vpop.eup %12647  ;;  %11636 = vmatpush3.msra.mxu0 %v1374_v14  ;;  %11637 = vmatprep.mubr.msk.f32.mxu0 %vm12922_vm5, %v12921_v53  ;;  %v916_v17 = vmul.f32 %v12646_v18, %v13204_v46  ;;  %v12316_v32 = vpack.c.bf16 %v12533_v28, %v12532_v29  ;;  %v1714_v14 = vld [vmem:[%s14934_s5] sm:$0xff]  ;;  %v1810_v29 = vld [vmem:[%s14935_s6 + $0x18] sm:$0xff] }
 0x526   :  { %11642 = vmatprep.mubr.msk.f32.mxu1 %vm12922_vm5, %v12921_v53  ;;  %v915_v21 = vmul.f32 %v12648_v15, %v13206_v47  ;;  %v1715_v15 = vld [vmem:[%s14934_s5 + $0x8] sm:$0xff]  ;;  %v12336_v30 = vpack.c.bf16 %v1810_v29, %v1809_v27 }
 0x527   :  { %11643 = vmatmul.mubr.msk.f32.vlgmr.msra.gmra.mrb[18].mxu1 %vm222_vm6, %v916_v17  ;;  %12317 = vmatprep.subr.bf16.mxu0 %v12316_v32  ;;  %v1716_v17 = vld [vmem:[%s14934_s5 + $0x10] sm:$0xff] }
 0x528   :  { %11638 = vmatmul.mubr.msk.f32.vlgmr.msra.gmra.mrb[12].mxu0 %vm222_vm6, %v915_v21  ;;  %v12324_v21 = vpack.c.bf16 %v1715_v15, %v1714_v14 }
 0x529   :  { %12319 = vmatpush3.bf16.msra.mxu0 %v12316_v32  ;;  %v12340_v32 = vpack.c.bf16 %v1812_v33, %v1811_v31  ;;  %v13357_v31 = vld [vmem:[%s14932_s3 + $0x20] sm:$0xff]  ;;  %v13362_v33 = vld [vmem:[%s14932_s3 + $0x28] sm:$0xff] }
 0x52a   :  { %12321 = vmatprep.subr.bf16.mxu0 %v12320_v34  ;;  %12325 = vmatprep.subr.bf16.mxu1 %v12324_v21 }
 0x52b   :  { %12327 = vmatpush3.bf16.msra.mxu1 %v12324_v21 }
 0x52d   :  { %12323 = vmatpush3.bf16.msra.mxu0 %v12320_v34 }
 0x595   :  { %v989_v22 = vpop.f32.mrb[6].mxu0 }
 0x596   :  { %v11609_v23 = vpop.f32.mrb[7].mxu0 }
 0x59d   :  { %v1065_v24 = vpop.f32.mrb[12].mxu1 }
 0x59e   :  { %v11614_v25 = vpop.f32.mrb[13].mxu1 }
 0x59f   :  { %v1808_v25 = vld [vmem:[%s14935_s6 + $0x8] sm:$0xff] }
 0x5ee   :  { %v1217_v35 = vpop.f32.mrb[14].mxu1 }
 0x5ef   :  { %1529 = vrot.lane.b32.xlu1 %v1217_v35, %s12929_s13  ;;  %v11624_v38 = vpop.f32.mrb[15].mxu1 }
 0x5f2   :  { %v1141_v36 = vpop.f32.mrb[8].mxu0 }
 0x5f3   :  { %1527 = vrot.lane.b32.xlu0 %v1141_v36, %s12929_s13  ;;  %v11619_v39 = vpop.f32.mrb[9].mxu0 }
 0x5f6   :  { %v1369_v40 = vpop.f32.mrb[16].mxu1 }
 0x5f7   :  { %v1293_v41 = vpop.f32.mrb[10].mxu0  ;;  %1537 = vrot.lane.b32.xlu1 %v1369_v40, %s12930_s14  ;;  %v11634_v43 = vpop.f32.mrb[17].mxu1 }
 0x5f8   :  { %1535 = vrot.lane.b32.xlu0 %v1293_v41, %s12930_s14  ;;  %v11629_v44 = vpop.f32.mrb[11].mxu0 }
 0x5fa   :  { %v1521_v45 = vpop.f32.mrb[18].mxu1 }
 0x5fb   :  { %v1445_v46 = vpop.f32.mrb[12].mxu0  ;;  %1545 = vrot.lane.b32.xlu1 %v1521_v45, %s12931_s15  ;;  %v11644_v47 = vpop.f32.mrb[19].mxu1 }
 0x5fc   :  { %1543 = vrot.lane.b32.xlu0 %v1445_v46, %s12931_s15  ;;  %v11639_v48 = vpop.f32.mrb[13].mxu0 }
 0x600   :  { %1573 = vrot.lane.b32.xlu0 %v13042_v52, %s12928_s12 }
 0x661   :  { %v1530_v49 = vpop.permute.xlu1 %1529 }
 0x662   :  { %v1550_v56 = vsel %vm222_vm6, %v1065_v24, %v1530_v49  ;;  %v1807_v24 = vld [vmem:[%s14935_s6] sm:$0xff] }
 0x663   :  { %v12332_v28 = vpack.c.bf16 %v1808_v25, %v1807_v24 }
 0x665   :  { %v1528_v50 = vpop.permute.xlu0 %1527  ;;  %12333 = vmatprep.subr.bf16.mxu0 %v12332_v28 }
 0x666   :  { %v1549_v63 = vsel %vm222_vm6, %v989_v22, %v1528_v50  ;;  %v1717_v22 = vld [vmem:[%s14934_s5 + $0x18] sm:$0xff] }
 0x667   :  { %v12328_v23 = vpack.c.bf16 %v1717_v22, %v1716_v17 }
 0x669   :  { %v1538_v51 = vpop.permute.xlu1 %1537  ;;  %12329 = vmatprep.subr.bf16.mxu1 %v12328_v23 }
 0x66a   :  { %v1536_v54 = vpop.permute.xlu0 %1535  ;;  %v1553_v3 = vsel %vm1551_vm7, %v1550_v56, %v1538_v51  ;;  %12331 = vmatpush3.bf16.msra.mxu1 %v12328_v23  ;;  %v10970_v51 = vld [vmem:[%s14937_s8 + $0x2] sm:$0x3] }
 0x66b   :  { %v1552_v5 = vsel %vm1551_vm7, %v1549_v63, %v1536_v54  ;;  %v1702_v56 = vrot.slane %v10970_v51, %v13028_v37 }
 0x66d   :  { %v1546_v4 = vpop.permute.xlu1 %1545 }
 0x66e   :  { %v1556_v61 = vsel %vm1554_vm8, %v1553_v3, %v1546_v4  ;;  %v1544_v2 = vpop.permute.xlu0 %1543  ;;  %v1710_v3 = vrot.slane %v10970_v51, %v13034_v42 }
 0x66f   :  { %v1555_v52 = vsel %vm1554_vm8, %v1552_v5, %v1544_v2 }
 0x670   :  { %11653 = vmatprep.mubr.msk.f32.mxu0 %vm60_vm0, %v1555_v52 }
 0x671   :  { %11654 = vmatmul.mubr.msk.f32.vlgmr.msra.gmra.mrb[14].mxu0 %vm60_vm0, %v1556_v61 }
 0x672   :  { %v1574_v6 = vpop.permute.xlu0 %1573  ;;  %12335 = vmatpush3.bf16.msra.mxu0 %v12332_v28 }
 0x673   :  { %12337 = vmatprep.subr.bf16.mxu0 %v12336_v30 }
 0x676   :  { %12339 = vmatpush3.bf16.msra.mxu0 %v12336_v30 }
 0x677   :  { %12341 = vmatprep.subr.bf16.mxu0 %v12340_v32 }
 0x67a   :  { %12343 = vmatpush3.bf16.msra.mxu0 %v12340_v32  ;;  %v13367_v32 = vld [vmem:[%s14932_s3 + $0x30] sm:$0xff] }
 0x744   :  { %v11655_v7 = vpop.f32.mrb[14].mxu0 }
 0x745   :  { %v1654_v8 = vadd.f32 %v11655_v7, %v1574_v6  ;;  %v1648_v55 = vpop.f32.mrb[15].mxu0 }
 0x746   :  { %v1649_v9 = vadd.f32 %v1648_v55, %v1574_v6  ;;  %v1813_v55 = vld [vmem:[%s14935_s6 + $0x30] sm:$0xff] }
 0x747   :  { %v13270_v59 = vadd.f32 %v1654_v8, %v12992_v1  ;;  %v10971_v8 = vld [vmem:[%s14936_s7] ss:$0 sm:$0xff] }
 0x748   :  { %v13273_v57 = vadd.f32 %v1649_v9, %v12987_v0  ;;  %v1814_v9 = vld [vmem:[%s14935_s6 + $0x38] sm:$0xff] }
 0x749   :  { %v1664_v58 = vsel %vm60_vm0, %v13270_v59, 0.0 }
 0x74a   :  { %1665 = vadd.xlane.f32.xlu0 %v1664_v58  ;;  %v1661_v60 = vsel %vm60_vm0, %v13273_v57, 0.0  ;;  %v12344_v58 = vpack.c.bf16 %v1814_v9, %v1813_v55 }
 0x74b   :  { %1662 = vadd.xlane.f32.xlu1 %v1661_v60 }
 0x74c   :  { %12345 = vmatprep.subr.bf16.mxu0 %v12344_v58 }
 0x74d   :  { %12347 = vmatpush3.bf16.msra.mxu0 %v12344_v58 }
 0x74e   :  { %11707 = vmatprep.subr.mxu0 %v12921_v53 }
 0x75c   :  { %1815 = vrot.lane.b32.xlu1 %v10971_v8, %s12927_s1 }
 0x7d7   :  { %v1666_v62 = vpop.xlane.xlu0 %1665 }
 0x7d8   :  { %v1668_v10 = vmul.f32 0.03125, %v1666_v62  ;;  %v1663_v11 = vpop.xlane.xlu1 %1662 }
 0x7d9   :  { %v1667_v12 = vmul.f32 0.03125, %v1663_v11 }
 0x7da   :  { %v13280_v13 = vsub.f32 %v13270_v59, %v1668_v10 }
 0x7db   :  { %v1669_v1 = vsub.f32 %v13273_v57, %v1667_v12 }
 0x7dc   :  { %v1672_v19 = vmul.f32 %v13280_v13, %v13280_v13  ;;  %v1704_v61 = vmul.f32 %v1702_v56, %v13280_v13 }
 0x7dd   :  { %v1671_v16 = vmul.f32 %v1669_v1, %v1669_v1  ;;  %v1703_v63 = vmul.f32 %v1702_v56, %v1669_v1  ;;  %v1816_v1 = vpop.permute.xlu1 %1815 }
 0x7de   :  { %v1676_v18 = vsel %vm60_vm0, %v1672_v19, 0.0 }
 0x7df   :  { %v1673_v0 = vsel %vm60_vm0, %v1671_v16, 0.0 }
 0x7e0   :  { %1674 = vadd.xlane.f32.xlu0 %v1673_v0 }
 0x7e4   :  { %1677 = vadd.xlane.f32.xlu0 %v1676_v18 }
 0x86d   :  { %v1675_v34 = vpop.xlane.xlu0 %1674 }
 0x86e   :  { %v1679_v35 = vmul.f32 0.032258064, %v1675_v34  ;;  %v12348_v34 = vpack.c.bf16 %v13362_v33, %v13357_v31 }
 0x870   :  { %12649 = vrsqrt.f32 %v1679_v35  ;;  %vm1683_vm9 = vcmp.eq.f32.partialorder %v1679_v35, inf  ;;  %v1686_v41 = vand.u32 2147483648, %v1679_v35  ;;  %vm1685_vm10 = vcmp.eq.f32.partialorder %v1679_v35, 0.0  ;;  %12349 = vmatprep.subr.bf16.mxu1 %v12348_v34 }
 0x871   :  { %v1678_v38 = vpop.xlane.xlu0 %1677 }
 0x872   :  { %v1680_v36 = vmul.f32 0.032258064, %v1678_v38 }
 0x874   :  { %12651 = vrsqrt.f32 %v1680_v36  ;;  %vm1690_vm11 = vcmp.eq.f32.partialorder %v1680_v36, inf  ;;  %v1693_v48 = vand.u32 2147483648, %v1680_v36  ;;  %vm1692_vm12 = vcmp.eq.f32.partialorder %v1680_v36, 0.0 }
 0x87a   :  { %v12650_v39 = vpop.eup %12649 }
 0x87b   :  { %v1682_v40 = vmul.f32 %v12650_v39, %v1679_v35 }
 0x87d   :  { %v1684_v43 = vsel %vm1683_vm9, %v1679_v35, %v1682_v40  ;;  %v13374_v35 = vld [vmem:[%s14932_s3 + $0x38] sm:$0xff] }
 0x87e   :  { %v12652_v44 = vpop.eup %12651  ;;  %v1687_v45 = vsel %vm1685_vm10, %v1686_v41, %v1684_v43  ;;  %v12544_v38 = vpack.i.bf16 %v13374_v35, %v13367_v32 }
 0x87f   :  { %v1689_v46 = vmul.f32 %v12652_v44, %v1680_v36  ;;  %v1695_v47 = vadd.f32 1e-06, %v1687_v45 }
 0x881   :  { %v1691_v49 = vsel %vm1690_vm11, %v1680_v36, %v1689_v46  ;;  %12653 = vrcp.f32 %v1695_v47  ;;  %v12352_v36 = vpack.c.bf16 %v13374_v35, %v13367_v32 }
 0x882   :  { %v1694_v50 = vsel %vm1692_vm12, %v1693_v48, %v1691_v49 }
 0x883   :  { %v1696_v54 = vadd.f32 1e-06, %v1694_v50 }
 0x885   :  { %12655 = vrcp.f32 %v1696_v54 }
 0x88b   :  { %v12654_v4 = vpop.eup %12653 }
 0x88c   :  { %v1705_v5 = vmul.f32 %v12654_v4, %v1703_v63 }
 0x88e   :  { %v1711_v2 = vadd.f32 %v1710_v3, %v1705_v5 }
 0x88f   :  { %v12656_v52 = vpop.eup %12655 }
 0x890   :  { %v1706_v6 = vmul.f32 %v12656_v52, %v1704_v61  ;;  %11664 = vmatprep.mubr.msk.f32.mxu1 %vm60_vm0, %v1711_v2 }
 0x892   :  { %v1712_v7 = vadd.f32 %v1710_v3, %v1706_v6  ;;  %v10976_v3 = vld [vmem:[%s14937_s8 + $0x4] sm:$0x3] }
 0x893   :  { %v1945_v5 = vrot.slane %v10976_v3, %v13028_v37  ;;  %v1953_v2 = vrot.slane %v10976_v3, %v13034_v42 }
 0x894   :  { %11665 = vmatmul.mubr.msk.f32.vlgmr.msra.gmra.mrb[20].mxu1 %vm60_vm0, %v1712_v7 }
 0x895   :  { %12351 = vmatpush3.bf16.msra.mxu1 %v12348_v34 }
 0x896   :  { %12353 = vmatprep.subr.bf16.mxu1 %v12352_v36 }
 0x899   :  { %12355 = vmatpush3.bf16.msra.mxu1 %v12352_v36 }
 0x89a   :  { %11697 = vmatprep.subr.mxu1 %v12921_v53 }
 0x967   :  { %v11666_v60 = vpop.f32.mrb[20].mxu1 }
 0x968   :  { %v1802_v62 = vadd.f32 %v11666_v60, %v10971_v8  ;;  %v1796_v10 = vpop.f32.mrb[21].mxu1  ;;  %v13393_v60 = vld [vmem:[%s14933_s4 + $0x1] ss:$0 sm:$0xff] }
 0x969   :  { %v1797_v11 = vadd.f32 %v10971_v8, %v1796_v10 }
 0x96a   :  { %v1806_v13 = vmax.f32 %v1802_v62, 0.0 }
 0x96b   :  { %v1805_v12 = vmax.f32 %v1797_v11, 0.0 }
 0x96d   :  { %11683 = vmatprep.mubr.msk.f32.mxu0 %vm1818_vm13, %v1805_v12 }
 0x96e   :  { %11684 = vmatmul.mubr.msk.f32.vlgmr.msra.gmra.mrb[16].mxu0 %vm1818_vm13, %v1806_v13 }
 0x96f   :  { %11709 = vmatprep.mubr.msk.f32.mxu0 %vm12922_vm5, %v12921_v53 }
 0xa41   :  { %v11685_v16 = vpop.f32.mrb[16].mxu0 }
 0xa42   :  { %v1891_v0 = vpop.f32.mrb[17].mxu0  ;;  %v1897_v19 = vadd.f32 %v11685_v16, %v1816_v1 }
 0xa43   :  { %v1892_v18 = vadd.f32 %v1891_v0, %v1816_v1 }
 0xa44   :  { %v13346_v17 = vadd.f32 %v1897_v19, %v13270_v59 }
 0xa45   :  { %v13341_v14 = vadd.f32 %v1892_v18, %v13273_v57 }
 0xa46   :  { %v1907_v21 = vsel %vm60_vm0, %v13346_v17, 0.0 }
 0xa47   :  { %v1904_v15 = vsel %vm60_vm0, %v13341_v14, 0.0 }
 0xa48   :  { %1905 = vadd.xlane.f32.xlu0 %v1904_v15 }
 0xa4c   :  { %1908 = vadd.xlane.f32.xlu0 %v1907_v21 }
 0xad5   :  { %v1906_v22 = vpop.xlane.xlu0 %1905 }
 0xad6   :  { %v1910_v23 = vmul.f32 0.03125, %v1906_v22 }
 0xad8   :  { %v1912_v24 = vsub.f32 %v13341_v14, %v1910_v23 }
 0xad9   :  { %v1909_v25 = vpop.xlane.xlu0 %1908 }
 0xada   :  { %v1911_v27 = vmul.f32 0.03125, %v1909_v25  ;;  %v1914_v28 = vmul.f32 %v1912_v24, %v1912_v24  ;;  %v1946_v61 = vmul.f32 %v1945_v5, %v1912_v24 }
 0xadc   :  { %v1913_v57 = vsub.f32 %v13346_v17, %v1911_v27  ;;  %v1916_v29 = vsel %vm60_vm0, %v1914_v28, 0.0 }
 0xadd   :  { %1917 = vadd.xlane.f32.xlu0 %v1916_v29 }
 0xade   :  { %v1915_v30 = vmul.f32 %v1913_v57, %v1913_v57  ;;  %v1947_v7 = vmul.f32 %v1945_v5, %v1913_v57 }
 0xae0   :  { %v1919_v59 = vsel %vm60_vm0, %v1915_v30, 0.0 }
 0xae1   :  { %1920 = vadd.xlane.f32.xlu0 %v1919_v59 }
 0xb6a   :  { %v1918_v39 = vpop.xlane.xlu0 %1917 }
 0xb6b   :  { %v1922_v40 = vmul.f32 0.032258064, %v1918_v39 }
 0xb6d   :  { %12657 = vrsqrt.f32 %v1922_v40  ;;  %vm1926_vm14 = vcmp.eq.f32.partialorder %v1922_v40, inf  ;;  %v1929_v46 = vand.u32 2147483648, %v1922_v40  ;;  %vm1928_vm15 = vcmp.eq.f32.partialorder %v1922_v40, 0.0 }
 0xb6e   :  { %v1921_v41 = vpop.xlane.xlu0 %1920 }
 0xb6f   :  { %v1923_v43 = vmul.f32 0.032258064, %v1921_v41 }
 0xb71   :  { %12659 = vrsqrt.f32 %v1923_v43  ;;  %vm1933_vm1 = vcmp.eq.f32.partialorder %v1923_v43, inf  ;;  %v1936_v54 = vand.u32 2147483648, %v1923_v43  ;;  %vm1935_vm2 = vcmp.eq.f32.partialorder %v1923_v43, 0.0 }
 0xb77   :  { %v12658_v44 = vpop.eup %12657 }
 0xb78   :  { %v1925_v45 = vmul.f32 %v12658_v44, %v1922_v40 }
 0xb7a   :  { %v1927_v47 = vsel %vm1926_vm14, %v1922_v40, %v1925_v45 }
 0xb7b   :  { %v12660_v48 = vpop.eup %12659  ;;  %v1930_v49 = vsel %vm1928_vm15, %v1929_v46, %v1927_v47 }
 0xb7c   :  { %v1932_v50 = vmul.f32 %v12660_v48, %v1923_v43  ;;  %v1938_v51 = vadd.f32 1e-06, %v1930_v49 }
 0xb7e   :  { %v1934_v56 = vsel %vm1933_vm1, %v1923_v43, %v1932_v50  ;;  %12661 = vrcp.f32 %v1938_v51 }
 0xb7f   :  { %v1937_v63 = vsel %vm1935_vm2, %v1936_v54, %v1934_v56 }
 0xb80   :  { %v1939_v4 = vadd.f32 1e-06, %v1937_v63 }
 0xb82   :  { %12663 = vrcp.f32 %v1939_v4 }
 0xb88   :  { %v12662_v52 = vpop.eup %12661 }
 0xb89   :  { %v1948_v6 = vmul.f32 %v12662_v52, %v1946_v61 }
 0xb8b   :  { %v1954_v8 = vadd.f32 %v1953_v2, %v1948_v6 }
 0xb8c   :  { %v12664_v55 = vpop.eup %12663 }
 0xb8d   :  { %v1949_v9 = vmul.f32 %v12664_v55, %v1947_v7  ;;  %11694 = vmatprep.mubr.msk.f32.mxu1 %vm60_vm0, %v1954_v8 }
 0xb8f   :  { %v1955_v58 = vadd.f32 %v1953_v2, %v1949_v9 }
 0xb91   :  { %11695 = vmatmul.mubr.msk.f32.vlgmr.msra.gmra.mrb[22].mxu1 %vm60_vm0, %v1955_v58 }
 0xb92   :  { %11699 = vmatprep.mubr.msk.f32.mxu1 %vm12922_vm5, %v12921_v53 }
 0xc64   :  { %v11696_v62 = vpop.f32.mrb[22].mxu1 }
 0xc65   :  { %v13396_v10 = vadd.f32 %v11696_v62, %v13393_v60  ;;  %v2041_v11 = vpop.f32.mrb[23].mxu1 }
 0xc66   :  { %v13403_v12 = vadd.f32 %v13393_v60, %v2041_v11 }
 0xc67   :  { %2058 = vrot.lane.b32.xlu1 %v13396_v10, %s12924_s26  ;;  %2054 = vrot.lane.b32.xlu0 %v13396_v10, %s12923_s25 }
 0xc6b   :  { %2052 = vrot.lane.b32.xlu1 %v13403_v12, %s12923_s25 }
 0xc6f   :  { %2056 = vrot.lane.b32.xlu1 %v13403_v12, %s12924_s26 }
 0xc73   :  { %2060 = vrot.lane.b32.xlu1 %v13403_v12, %s12925_s27 }
 0xc77   :  { %2062 = vrot.lane.b32.xlu1 %v13396_v10, %s12925_s27 }
 0xc7b   :  { %2064 = vrot.lane.b32.xlu1 %v13403_v12, %s12926_s28 }
 0xc7f   :  { %2140 = vrot.lane.b32.xlu1 %v13396_v10, %s12926_s28 }
 0xcd9   :  { %v13417_v13 = vpop.permute.xlu1 %2058  ;;  %v13419_v1 = vpop.permute.xlu0 %2054 }
 0xcda   :  { %2292 = vrot.lane.b32.xlu1 %v13419_v1, %s12926_s28 }
 0xcdd   :  { %v13423_v16 = vpop.permute.xlu1 %2052 }
 0xcde   :  { %2444 = vrot.lane.b32.xlu1 %v13417_v13, %s12926_s28  ;;  %2216 = vrot.lane.b32.xlu0 %v13423_v16, %s12926_s28 }
 0xce1   :  { %v13429_v0 = vpop.permute.xlu1 %2056 }
 0xce2   :  { %2368 = vrot.lane.b32.xlu0 %v13429_v0, %s12926_s28 }
 0xce5   :  { %v13433_v19 = vpop.permute.xlu1 %2060 }
 0xce6   :  { %2520 = vrot.lane.b32.xlu0 %v13433_v19, %s12926_s28 }
 0xce9   :  { %v13437_v18 = vpop.permute.xlu1 %2062 }
 0xcea   :  { %2596 = vrot.lane.b32.xlu1 %v13437_v18, %s12926_s28 }
 0xced   :  { %v2065_v15 = vpop.permute.xlu1 %2064 }
 0xcee   :  { %11698 = vmatpush3.xpose.msk.msra.mxu1 %vm222_vm6, %v2065_v15 }
 0xcef   :  { %11702 = vmatprep.subr.mxu1 %v12921_v53 }
 0xcf1   :  { %11700 = vmatmul.mubr.msk.f32.vlgmr.msra.gmra.mrb[24].mxu1 %vm222_vm6, %v13403_v12  ;;  %v2141_v21 = vpop.permute.xlu1 %2140 }
 0xcf2   :  { %11703 = vmatpush3.xpose.msk.msra.mxu1 %vm222_vm6, %v2141_v21  ;;  %11704 = vmatprep.mubr.msk.f32.mxu1 %vm12922_vm5, %v12921_v53 }
 0xcf3   :  { %11712 = vmatprep.subr.mxu1 %v12921_v53 }
 0xcf5   :  { %11705 = vmatmul.mubr.msk.f32.vlgmr.msra.gmra.mrb[26].mxu1 %vm222_vm6, %v13396_v10 }
 0xcf6   :  { %11714 = vmatprep.mubr.msk.f32.mxu1 %vm12922_vm5, %v12921_v53 }
 0xd4c   :  { %v2293_v22 = vpop.permute.xlu1 %2292 }
 0xd4d   :  { %11713 = vmatpush3.xpose.msk.msra.mxu1 %vm222_vm6, %v2293_v22 }
 0xd4e   :  { %11722 = vmatprep.subr.mxu1 %v12921_v53 }
 0xd50   :  { %v2217_v23 = vpop.permute.xlu0 %2216  ;;  %11715 = vmatmul.mubr.msk.f32.vlgmr.msra.gmra.mrb[28].mxu1 %vm222_vm6, %v13419_v1  ;;  %v2445_v24 = vpop.permute.xlu1 %2444 }
 0xd51   :  { %11708 = vmatpush3.xpose.msk.msra.mxu0 %vm222_vm6, %v2217_v23  ;;  %11723 = vmatpush3.xpose.msk.msra.mxu1 %vm222_vm6, %v2445_v24 }
 0xd52   :  { %11724 = vmatprep.mubr.msk.f32.mxu1 %vm12922_vm5, %v12921_v53  ;;  %11717 = vmatprep.subr.mxu0 %v12921_v53 }
 0xd53   :  { %11732 = vmatprep.subr.mxu1 %v12921_v53 }
 0xd54   :  { %11710 = vmatmul.mubr.msk.f32.vlgmr.msra.gmra.mrb[18].mxu0 %vm222_vm6, %v13423_v16  ;;  %v2369_v25 = vpop.permute.xlu0 %2368  ;;  %11725 = vmatmul.mubr.msk.f32.vlgmr.msra.gmra.mrb[30].mxu1 %vm222_vm6, %v13417_v13 }
 0xd55   :  { %11718 = vmatpush3.xpose.msk.msra.mxu0 %vm222_vm6, %v2369_v25  ;;  %11719 = vmatprep.mubr.msk.f32.mxu0 %vm12922_vm5, %v12921_v53 }
 0xd56   :  { %11727 = vmatprep.subr.mxu0 %v12921_v53  ;;  %11734 = vmatprep.mubr.msk.f32.mxu1 %vm12922_vm5, %v12921_v53 }
 0xd58   :  { %11720 = vmatmul.mubr.msk.f32.vlgmr.msra.gmra.mrb[20].mxu0 %vm222_vm6, %v13429_v0  ;;  %v2521_v27 = vpop.permute.xlu0 %2520 }
 0xd59   :  { %11728 = vmatpush3.xpose.msk.msra.mxu0 %vm222_vm6, %v2521_v27  ;;  %11729 = vmatprep.mubr.msk.f32.mxu0 %vm12922_vm5, %v12921_v53 }
 0xd5a   :  { %11737 = vmatprep.subr.mxu0 %v12921_v53 }
 0xd5c   :  { %11730 = vmatmul.mubr.msk.f32.vlgmr.msra.gmra.mrb[22].mxu0 %vm222_vm6, %v13433_v19  ;;  %v2597_v28 = vpop.permute.xlu1 %2596 }
 0xd5d   :  { %11733 = vmatpush3.xpose.msk.msra.mxu1 %vm222_vm6, %v2597_v28  ;;  %11739 = vmatprep.mubr.msk.f32.mxu0 %vm12922_vm5, %v12921_v53 }
 0xd5e   :  { %11742 = vmatprep.subr.mxu1 %v12921_v53 }
 0xd60   :  { %11735 = vmatmul.mubr.msk.f32.vlgmr.msra.gmra.mrb[32].mxu1 %vm222_vm6, %v13437_v18 }
 0xd61   :  { %11744 = vmatprep.mubr.msk.f32.mxu1 %vm12922_vm5, %v12921_v53 }
 0xdc4   :  { %v2136_v57 = vpop.f32.mrb[24].mxu1 }
 0xdc5   :  { %v2137_v29 = vadd.f32 %v2136_v57, %v13151_v20  ;;  %v11701_v30 = vpop.f32.mrb[25].mxu1 }
 0xdc7   :  { %v2672_v59 = vsel %vm222_vm6, %v2137_v29, -inf }
 0xdc8   :  { %2673 = vmax.xlane.f32.xlu0 %v2672_v59  ;;  %v2212_v34 = vpop.f32.mrb[26].mxu1 }
 0xdc9   :  { %v2213_v36 = vadd.f32 %v2212_v34, %v13156_v26  ;;  %v11706_v39 = vpop.f32.mrb[27].mxu1 }
 0xdcb   :  { %v2675_v40 = vsel %vm222_vm6, %v2213_v36, -inf }
 0xdcc   :  { %2676 = vmax.xlane.f32.xlu1 %v2675_v40 }
 0xe23   :  { %v2364_v41 = vpop.f32.mrb[28].mxu1 }
 0xe24   :  { %v2365_v43 = vadd.f32 %v2364_v41, %v13156_v26  ;;  %v11716_v44 = vpop.f32.mrb[29].mxu1 }
 0xe26   :  { %v2681_v45 = vsel %vm222_vm6, %v2365_v43, -inf }
 0xe27   :  { %v2288_v46 = vpop.f32.mrb[18].mxu0  ;;  %2682 = vmax.xlane.f32.xlu0 %v2681_v45  ;;  %v2516_v47 = vpop.f32.mrb[30].mxu1 }
 0xe28   :  { %v2289_v48 = vadd.f32 %v2288_v46, %v13151_v20  ;;  %v2517_v49 = vadd.f32 %v2516_v47, %v13156_v26  ;;  %v11711_v50 = vpop.f32.mrb[19].mxu0  ;;  %v11726_v51 = vpop.f32.mrb[31].mxu1 }
 0xe2a   :  { %v2678_v54 = vsel %vm222_vm6, %v2289_v48, -inf  ;;  %v2687_v56 = vsel %vm222_vm6, %v2517_v49, -inf }
 0xe2b   :  { %v2440_v63 = vpop.f32.mrb[20].mxu0  ;;  %2679 = vmax.xlane.f32.xlu0 %v2678_v54  ;;  %2688 = vmax.xlane.f32.xlu1 %v2687_v56 }
 0xe2c   :  { %v2441_v3 = vadd.f32 %v2440_v63, %v13151_v20  ;;  %v11721_v4 = vpop.f32.mrb[21].mxu0 }
 0xe2e   :  { %v2684_v5 = vsel %vm222_vm6, %v2441_v3, -inf }
 0xe2f   :  { %v2592_v61 = vpop.f32.mrb[22].mxu0  ;;  %2685 = vmax.xlane.f32.xlu0 %v2684_v5 }
 0xe30   :  { %v2593_v2 = vadd.f32 %v2592_v61, %v13151_v20  ;;  %v11731_v52 = vpop.f32.mrb[23].mxu0 }
 0xe32   :  { %v2690_v6 = vsel %vm222_vm6, %v2593_v2, -inf }
 0xe33   :  { %2691 = vmax.xlane.f32.xlu0 %v2690_v6  ;;  %v2668_v7 = vpop.f32.mrb[32].mxu1 }
 0xe34   :  { %v2669_v8 = vadd.f32 %v2668_v7, %v13156_v26  ;;  %v11736_v55 = vpop.f32.mrb[33].mxu1 }
 0xe36   :  { %v2693_v9 = vsel %vm222_vm6, %v2669_v8, -inf }
 0xe37   :  { %2694 = vmax.xlane.f32.xlu1 %v2693_v9 }
 0xe48   :  { %2836 = vrot.lane.b32.xlu1 %v13396_v10, %s12927_s1 }
 0xe49   :  { %2760 = vrot.lane.b32.xlu0 %v13403_v12, %s12927_s1 }
 0xe4c   :  { %2912 = vrot.lane.b32.xlu1 %v13423_v16, %s12927_s1 }
 0xe4d   :  { %3064 = vrot.lane.b32.xlu0 %v13429_v0, %s12927_s1 }
 0xe50   :  { %2988 = vrot.lane.b32.xlu1 %v13419_v1, %s12927_s1 }
 0xe54   :  { %3140 = vrot.lane.b32.xlu1 %v13417_v13, %s12927_s1 }
 0xe55   :  { %v2674_v58 = vpop.xlane.xlu0 %2673 }
 0xe56   :  { %v2696_v62 = vsub.f32 %v2137_v29, %v2674_v58 }
 0xe58   :  { %v2704_v11 = vmul.f32 1.442695, %v2696_v62 }
 0xe59   :  { %v2677_v10 = vpop.xlane.xlu1 %2676 }
 0xe5a   :  { %12665 = vpow2.f32 %v2704_v11  ;;  %v2697_v15 = vsub.f32 %v2213_v36, %v2677_v10 }
 0xe5c   :  { %v2706_v21 = vmul.f32 1.442695, %v2697_v15 }
 0xe5e   :  { %12667 = vpow2.f32 %v2706_v21 }
 0xe64   :  { %v13517_v12 = vpop.eup %12665 }
 0xe65   :  { %v2720_v16 = vsel %vm222_vm6, %v13517_v12, 0.0 }
 0xe68   :  { %v13521_v0 = vpop.eup %12667 }
 0xe69   :  { %v2723_v1 = vsel %vm222_vm6, %v13521_v0, 0.0 }
 0xe6c   :  { %2721 = vadd.xlane.f32.xlu0 %v2720_v16 }
 0xe78   :  { %2724 = vadd.xlane.f32.xlu1 %v2723_v1 }
 0xeb4   :  { %v2683_v13 = vpop.xlane.xlu0 %2682 }
 0xeb5   :  { %v2699_v22 = vsub.f32 %v2365_v43, %v2683_v13 }
 0xeb7   :  { %v2710_v23 = vmul.f32 1.442695, %v2699_v22 }
 0xeb8   :  { %v2680_v24 = vpop.xlane.xlu0 %2679  ;;  %v2689_v25 = vpop.xlane.xlu1 %2688 }
 0xeb9   :  { %12669 = vpow2.f32 %v2710_v23  ;;  %v2698_v27 = vsub.f32 %v2289_v48, %v2680_v24  ;;  %v2701_v28 = vsub.f32 %v2517_v49, %v2689_v25  ;;  %v12539_v24 = vpack.i.bf16 %v13362_v33, %v13357_v31 }
 0xebb   :  { %v2708_v57 = vmul.f32 1.442695, %v2698_v27  ;;  %v2714_v29 = vmul.f32 1.442695, %v2701_v28 }
 0xebc   :  { %v2686_v30 = vpop.xlane.xlu0 %2685 }
 0xebd   :  { %12671 = vpow2.f32 %v2708_v57  ;;  %v2700_v59 = vsub.f32 %v2441_v3, %v2686_v30 }
 0xebe   :  { %12673 = vpow2.f32 %v2714_v29 }
 0xebf   :  { %v2712_v34 = vmul.f32 1.442695, %v2700_v59 }
 0xec0   :  { %v2692_v36 = vpop.xlane.xlu0 %2691 }
 0xec1   :  { %12675 = vpow2.f32 %v2712_v34  ;;  %v2702_v39 = vsub.f32 %v2593_v2, %v2692_v36 }
 0xec3   :  { %v13525_v40 = vpop.eup %12669  ;;  %v2716_v41 = vmul.f32 1.442695, %v2702_v39 }
 0xec4   :  { %v2761_v43 = vpop.permute.xlu0 %2760  ;;  %v2695_v44 = vpop.xlane.xlu1 %2694  ;;  %v2729_v45 = vsel %vm222_vm6, %v13525_v40, 0.0 }
 0xec5   :  { %12677 = vpow2.f32 %v2716_v41  ;;  %v2703_v46 = vsub.f32 %v2669_v8, %v2695_v44  ;;  %11738 = vmatpush3.msra.mxu0 %v2761_v43  ;;  %2730 = vadd.xlane.f32.xlu1 %v2729_v45 }
 0xec6   :  { %11747 = vmatprep.subr.mxu0 %v12921_v53 }
 0xec7   :  { %v12672_v47 = vpop.eup %12671  ;;  %v2718_v48 = vmul.f32 1.442695, %v2703_v46 }
 0xec8   :  { %v12674_v49 = vpop.eup %12673  ;;  %v2837_v50 = vpop.permute.xlu1 %2836  ;;  %v2726_v51 = vsel %vm222_vm6, %v12672_v47, 0.0 }
 0xec9   :  { %12679 = vpow2.f32 %v2718_v48  ;;  %2727 = vadd.xlane.f32.xlu0 %v2726_v51  ;;  %v2735_v54 = vsel %vm222_vm6, %v12674_v49, 0.0  ;;  %11743 = vmatpush3.msra.mxu1 %v2837_v50  ;;  %v3065_v2 = vpop.permute.xlu0 %3064 }
 0xeca   :  { %2736 = vadd.xlane.f32.xlu1 %v2735_v54  ;;  %11752 = vmatprep.subr.mxu1 %v12921_v53 }
 0xecb   :  { %v12676_v56 = vpop.eup %12675 }
 0xecc   :  { %v2732_v63 = vsel %vm222_vm6, %v12676_v56, 0.0  ;;  %v2913_v52 = vpop.permute.xlu1 %2912 }
 0xecd   :  { %2733 = vadd.xlane.f32.xlu0 %v2732_v63 }
 0xecf   :  { %v13534_v3 = vpop.eup %12677 }
 0xed0   :  { %v2738_v4 = vsel %vm222_vm6, %v13534_v3, 0.0  ;;  %v2989_v7 = vpop.permute.xlu1 %2988 }
 0xed1   :  { %2739 = vadd.xlane.f32.xlu0 %v2738_v4 }
 0xed3   :  { %v13538_v5 = vpop.eup %12679 }
 0xed4   :  { %v2741_v61 = vsel %vm222_vm6, %v13538_v5, 0.0  ;;  %v3141_v8 = vpop.permute.xlu1 %3140 }
 0xed5   :  { %2742 = vadd.xlane.f32.xlu1 %v2741_v61 }
 0xee6   :  { %3292 = vrot.lane.b32.xlu1 %v13437_v18, %s12927_s1 }
 0xee7   :  { %3216 = vrot.lane.b32.xlu0 %v13433_v19, %s12927_s1 }
 0xeea   :  { %12545 = vrot.lane.b32.xlu1 %v12544_v38, %s12928_s12 }
 0xeeb   :  { %12540 = vrot.lane.b32.xlu0 %v12539_v24, %s12928_s12 }
 0xef9   :  { %v2722_v6 = vpop.xlane.xlu0 %2721 }
 0xefa   :  { %12681 = vrcp.f32 %v2722_v6 }
 0xf04   :  { %v12682_v55 = vpop.eup %12681 }
 0xf05   :  { %v2725_v9 = vpop.xlane.xlu1 %2724  ;;  %v2752_v58 = vmul.f32 %v12682_v55, %v13517_v12 }
 0xf06   :  { %12683 = vrcp.f32 %v2725_v9 }
 0xf07   :  { %11740 = vmatmul.mubr.msk.f32.vlgmr.msra.gmra.mrb[24].mxu0 %vm222_vm6, %v2752_v58 }
 0xf08   :  { %11748 = vmatpush3.msra.mxu0 %v2913_v52  ;;  %11749 = vmatprep.mubr.msk.f32.mxu0 %vm12922_vm5, %v12921_v53 }
 0xf09   :  { %11757 = vmatprep.subr.mxu0 %v12921_v53 }
 0xf10   :  { %v12684_v32 = vpop.eup %12683 }
 0xf11   :  { %v2753_v35 = vmul.f32 %v12684_v32, %v13521_v0 }
 0xf13   :  { %11745 = vmatmul.mubr.msk.f32.vlgmr.msra.gmra.mrb[34].mxu1 %vm222_vm6, %v2753_v35 }
 0xf14   :  { %11753 = vmatpush3.msra.mxu1 %v2989_v7  ;;  %11754 = vmatprep.mubr.msk.f32.mxu1 %vm12922_vm5, %v12921_v53 }
 0xf15   :  { %11762 = vmatprep.subr.mxu1 %v12921_v53 }
 0xf52   :  { %v2731_v38 = vpop.xlane.xlu1 %2730 }
 0xf53   :  { %12685 = vrcp.f32 %v2731_v38 }
 0xf56   :  { %v2728_v19 = vpop.xlane.xlu0 %2727 }
 0xf57   :  { %12687 = vrcp.f32 %v2728_v19  ;;  %v2737_v18 = vpop.xlane.xlu1 %2736 }
 0xf58   :  { %12689 = vrcp.f32 %v2737_v18 }
 0xf5a   :  { %v2734_v62 = vpop.xlane.xlu0 %2733 }
 0xf5b   :  { %12691 = vrcp.f32 %v2734_v62 }
 0xf5d   :  { %v12686_v11 = vpop.eup %12685 }
 0xf5e   :  { %v2740_v10 = vpop.xlane.xlu0 %2739  ;;  %v2755_v15 = vmul.f32 %v12686_v11, %v13525_v40 }
 0xf5f   :  { %12693 = vrcp.f32 %v2740_v10 }
 0xf60   :  { %11755 = vmatmul.mubr.msk.f32.vlgmr.msra.gmra.mrb[36].mxu1 %vm222_vm6, %v2755_v15 }
 0xf61   :  { %v12688_v21 = vpop.eup %12687  ;;  %11763 = vmatpush3.msra.mxu1 %v3141_v8  ;;  %11764 = vmatprep.mubr.msk.f32.mxu1 %vm12922_vm5, %v12921_v53 }
 0xf62   :  { %v12690_v12 = vpop.eup %12689  ;;  %v2743_v16 = vpop.xlane.xlu1 %2742  ;;  %v2754_v0 = vmul.f32 %v12688_v21, %v12672_v47  ;;  %11772 = vmatprep.subr.mxu1 %v12921_v53  ;;  %v13607_v21 = vld [vmem:[%s14929_s0 + $0x10] sm:$0xff] }
 0xf63   :  { %12695 = vrcp.f32 %v2743_v16  ;;  %v2757_v1 = vmul.f32 %v12690_v12, %v12674_v49  ;;  %v3217_v25 = vpop.permute.xlu0 %3216 }
 0xf64   :  { %11750 = vmatmul.mubr.msk.f32.vlgmr.msra.gmra.mrb[26].mxu0 %vm222_vm6, %v2754_v0 }
 0xf65   :  { %v12692_v13 = vpop.eup %12691  ;;  %11758 = vmatpush3.msra.mxu0 %v3065_v2  ;;  %11765 = vmatmul.mubr.msk.f32.vlgmr.msra.gmra.mrb[38].mxu1 %vm222_vm6, %v2757_v1 }
 0xf66   :  { %v3293_v22 = vpop.permute.xlu1 %3292  ;;  %11759 = vmatprep.mubr.msk.f32.mxu0 %vm12922_vm5, %v12921_v53  ;;  %11767 = vmatprep.subr.mxu0 %v12921_v53  ;;  %v2756_v23 = vmul.f32 %v12692_v13, %v12676_v56 }
 0xf67   :  { %11773 = vmatpush3.msra.mxu1 %v3293_v22  ;;  %11774 = vmatprep.mubr.msk.f32.mxu1 %vm12922_vm5, %v12921_v53  ;;  %v12541_v34 = vpop.permute.xlu0 %12540 }
 0xf68   :  { %11760 = vmatmul.mubr.msk.f32.vlgmr.msra.gmra.mrb[28].mxu0 %vm222_vm6, %v2756_v23  ;;  %v12543_v36 = vunpack.i.h.bf16 %v12541_v34  ;;  %v12542_v39 = vunpack.i.l.bf16 %v12541_v34 }
 0xf69   :  { %v12694_v27 = vpop.eup %12693  ;;  %11768 = vmatpush3.msra.mxu0 %v3217_v25  ;;  %11769 = vmatprep.mubr.msk.f32.mxu0 %vm12922_vm5, %v12921_v53 }
 0xf6a   :  { %v2758_v28 = vmul.f32 %v12694_v27, %v13534_v3  ;;  %v12356_v40 = vpack.c.bf16 %v12543_v36, %v12542_v39  ;;  %v12546_v41 = vpop.permute.xlu1 %12545 }
 0xf6b   :  { %v12548_v43 = vunpack.i.h.bf16 %v12546_v41  ;;  %v12547_v44 = vunpack.i.l.bf16 %v12546_v41 }
 0xf6c   :  { %11770 = vmatmul.mubr.msk.f32.vlgmr.msra.gmra.mrb[30].mxu0 %vm222_vm6, %v2758_v28  ;;  %12357 = vmatprep.subr.bf16.mxu0 %v12356_v40 }
 0xf6d   :  { %v12696_v57 = vpop.eup %12695  ;;  %12359 = vmatpush3.bf16.msra.mxu0 %v12356_v40  ;;  %v12360_v45 = vpack.c.bf16 %v12548_v43, %v12547_v44  ;;  %v11013_v44 = vld [vmem:[%s14934_s5 + $0x20] sm:$0xff] }
 0xf6e   :  { %v2759_v29 = vmul.f32 %v12696_v57, %v13538_v5 }
 0xf6f   :  { %12361 = vmatprep.subr.bf16.mxu0 %v12360_v45 }
 0xf70   :  { %11775 = vmatmul.mubr.msk.f32.vlgmr.msra.gmra.mrb[40].mxu1 %vm222_vm6, %v2759_v29 }
 0xf71   :  { %12363 = vmatpush3.bf16.msra.mxu0 %v12360_v45  ;;  %v11014_v45 = vld [vmem:[%s14934_s5 + $0x28] sm:$0xff] }
 0xfda   :  { %v2832_v31 = vpop.f32.mrb[24].mxu0 }
 0xfdb   :  { %v11741_v33 = vpop.f32.mrb[25].mxu0 }
 0xfe6   :  { %v2908_v30 = vpop.f32.mrb[34].mxu1 }
 0xfe7   :  { %v11746_v59 = vpop.f32.mrb[35].mxu1 }
0x1033   :  { %v3060_v46 = vpop.f32.mrb[36].mxu1 }
0x1034   :  { %3372 = vrot.lane.b32.xlu1 %v3060_v46, %s12929_s13  ;;  %v11756_v47 = vpop.f32.mrb[37].mxu1  ;;  %v12364_v46 = vpack.c.bf16 %v11014_v45, %v11013_v44 }
0x1035   :  { %v11015_v47 = vld [vmem:[%s14934_s5 + $0x30] sm:$0xff] }
0x1036   :  { %12365 = vmatprep.subr.bf16.mxu1 %v12364_v46 }
0x1037   :  { %v2984_v48 = vpop.f32.mrb[26].mxu0  ;;  %12367 = vmatpush3.bf16.msra.mxu1 %v12364_v46 }
0x1038   :  { %v3212_v49 = vpop.f32.mrb[38].mxu1  ;;  %3370 = vrot.lane.b32.xlu0 %v2984_v48, %s12929_s13  ;;  %v11751_v50 = vpop.f32.mrb[27].mxu0  ;;  %v11016_v48 = vld [vmem:[%s14934_s5 + $0x38] sm:$0xff] }
0x1039   :  { %3380 = vrot.lane.b32.xlu1 %v3212_v49, %s12930_s14  ;;  %v11766_v51 = vpop.f32.mrb[39].mxu1  ;;  %v12368_v49 = vpack.c.bf16 %v11016_v48, %v11015_v47  ;;  %v13661_v50 = vld [vmem:[%s14932_s3 + $0x40] sm:$0xff] }
0x103a   :  { %v13666_v51 = vld [vmem:[%s14932_s3 + $0x48] sm:$0xff] }
0x103b   :  { %v3136_v54 = vpop.f32.mrb[28].mxu0  ;;  %12369 = vmatprep.subr.bf16.mxu1 %v12368_v49 }
0x103c   :  { %3378 = vrot.lane.b32.xlu0 %v3136_v54, %s12930_s14  ;;  %v11761_v56 = vpop.f32.mrb[29].mxu0  ;;  %12371 = vmatpush3.bf16.msra.mxu1 %v12368_v49  ;;  %v13670_v54 = vpack.c.bf16 %v13666_v51, %v13661_v50  ;;  %v11031_v49 = vld [vmem:[%s14937_s8 + $0xa] sm:$0x3] }
0x103d   :  { %v12549_v56 = vpack.i.bf16 %v13666_v51, %v13661_v50 }
0x103e   :  { %12389 = vmatprep.subr.bf16.mxu1 %v13670_v54 }
0x103f   :  { %v3288_v63 = vpop.f32.mrb[30].mxu0 }
0x1040   :  { %3386 = vrot.lane.b32.xlu0 %v3288_v63, %s12931_s15  ;;  %v11771_v3 = vpop.f32.mrb[31].mxu0  ;;  %v13678_v63 = vld [vmem:[%s14932_s3 + $0x50] sm:$0xff] }
0x1041   :  { %v13683_v3 = vld [vmem:[%s14932_s3 + $0x58] sm:$0xff] }
0x1043   :  { %v3364_v4 = vpop.f32.mrb[40].mxu1 }
0x1044   :  { %3388 = vrot.lane.b32.xlu1 %v3364_v4, %s12931_s15  ;;  %v11776_v5 = vpop.f32.mrb[41].mxu1  ;;  %3414 = vrot.lane.b32.xlu0 %v13393_v60, %s12928_s12  ;;  %v12554_v4 = vpack.i.bf16 %v13683_v3, %v13678_v63 }
0x1045   :  { %v11020_v5 = vld [vmem:[%s14935_s6 + $0x40] sm:$0xff] }
0x10a6   :  { %v3373_v2 = vpop.permute.xlu1 %3372 }
0x10a7   :  { %v3393_v58 = vsel %vm222_vm6, %v2908_v30, %v3373_v2  ;;  %v11022_v2 = vld [vmem:[%s14935_s6 + $0x50] sm:$0xff] }
0x10aa   :  { %v3371_v61 = vpop.permute.xlu0 %3370 }
0x10ab   :  { %v3392_v6 = vsel %vm222_vm6, %v2832_v31, %v3371_v61  ;;  %v3381_v7 = vpop.permute.xlu1 %3380  ;;  %v11021_v61 = vld [vmem:[%s14935_s6 + $0x48] sm:$0xff] }
0x10ac   :  { %v3395_v32 = vsel %vm1551_vm7, %v3393_v58, %v3381_v7 }
0x10ae   :  { %v3379_v52 = vpop.permute.xlu0 %3378 }
0x10af   :  { %v3394_v8 = vsel %vm1551_vm7, %v3392_v6, %v3379_v52  ;;  %v12372_v52 = vpack.c.bf16 %v11021_v61, %v11020_v5  ;;  %v11023_v6 = vld [vmem:[%s14935_s6 + $0x58] sm:$0xff] }
0x10b0   :  { %v12376_v7 = vpack.c.bf16 %v11023_v6, %v11022_v2 }
0x10b1   :  { %12373 = vmatprep.subr.bf16.mxu0 %v12372_v52 }
0x10b2   :  { %v3387_v55 = vpop.permute.xlu0 %3386 }
0x10b3   :  { %v3396_v9 = vsel %vm1554_vm8, %v3394_v8, %v3387_v55  ;;  %v11024_v8 = vld [vmem:[%s14935_s6 + $0x60] sm:$0xff]  ;;  %v11025_v55 = vld [vmem:[%s14935_s6 + $0x68] sm:$0xff] }
0x10b4   :  { %11785 = vmatprep.mubr.msk.f32.mxu0 %vm60_vm0, %v3396_v9  ;;  %v12380_v9 = vpack.c.bf16 %v11025_v55, %v11024_v8 }
0x10b6   :  { %v3389_v35 = vpop.permute.xlu1 %3388  ;;  %v3415_v38 = vpop.permute.xlu0 %3414 }
0x10b7   :  { %v3397_v60 = vsel %vm1554_vm8, %v3395_v32, %v3389_v35 }
0x10b8   :  { %11786 = vmatmul.mubr.msk.f32.vlgmr.msra.gmra.mrb[32].mxu0 %vm60_vm0, %v3397_v60 }
0x10b9   :  { %12375 = vmatpush3.bf16.msra.mxu0 %v12372_v52  ;;  %v3844_v52 = vrot.slane %v11031_v49, %v13028_v37 }
0x10ba   :  { %12377 = vmatprep.subr.bf16.mxu0 %v12376_v7 }
0x10bd   :  { %12379 = vmatpush3.bf16.msra.mxu0 %v12376_v7 }
0x10be   :  { %12381 = vmatprep.subr.bf16.mxu0 %v12380_v9 }
0x10c1   :  { %12383 = vmatpush3.bf16.msra.mxu0 %v12380_v9 }
0x118b   :  { %v11787_v19 = vpop.f32.mrb[32].mxu0 }
0x118c   :  { %v3495_v18 = vadd.f32 %v11787_v19, %v3415_v38  ;;  %v3489_v62 = vpop.f32.mrb[33].mxu0 }
0x118d   :  { %v3490_v11 = vadd.f32 %v3489_v62, %v3415_v38 }
0x118e   :  { %v13599_v10 = vadd.f32 %v3495_v18, %v13346_v17  ;;  %v3803_v17 = vsel %vm60_vm0, %v13607_v21, 0.0 }
0x118f   :  { %v13602_v15 = vadd.f32 %v3490_v11, %v13341_v14  ;;  %v13618_v14 = vld [vmem:[%s14929_s0 + $0x18] sm:$0xff] }
0x1190   :  { %v3505_v12 = vsel %vm60_vm0, %v13599_v10, 0.0  ;;  %v3806_v0 = vsel %vm60_vm0, %v13618_v14, 0.0 }
0x1191   :  { %3506 = vadd.xlane.f32.xlu0 %v3505_v12  ;;  %v3502_v16 = vsel %vm60_vm0, %v13602_v15, 0.0 }
0x1192   :  { %3503 = vadd.xlane.f32.xlu1 %v3502_v16 }
0x1195   :  { %3804 = vadd.xlane.f32.xlu0 %v3803_v17 }
0x1199   :  { %3807 = vadd.xlane.f32.xlu0 %v3806_v0 }
0x121e   :  { %v3507_v1 = vpop.xlane.xlu0 %3506 }
0x121f   :  { %v3509_v13 = vmul.f32 0.03125, %v3507_v1  ;;  %v3504_v22 = vpop.xlane.xlu1 %3503 }
0x1220   :  { %v3508_v23 = vmul.f32 0.03125, %v3504_v22 }
0x1221   :  { %v13623_v24 = vsub.f32 %v13599_v10, %v3509_v13 }
0x1222   :  { %v13626_v25 = vsub.f32 %v13602_v15, %v3508_v23  ;;  %v3805_v27 = vpop.xlane.xlu0 %3804 }
0x1223   :  { %v3809_v28 = vmul.f32 0.03125, %v3805_v27  ;;  %v3513_v57 = vmul.f32 %v13623_v24, %v13623_v24 }
0x1224   :  { %v3512_v29 = vmul.f32 %v13626_v25, %v13626_v25 }
0x1225   :  { %v13633_v31 = vsub.f32 %v13607_v21, %v3809_v28  ;;  %v3517_v33 = vsel %vm60_vm0, %v3513_v57, 0.0 }
0x1226   :  { %3518 = vadd.xlane.f32.xlu0 %v3517_v33  ;;  %v3808_v30 = vpop.xlane.xlu0 %3807  ;;  %v3514_v59 = vsel %vm60_vm0, %v3512_v29, 0.0 }
0x1227   :  { %v3810_v34 = vmul.f32 0.03125, %v3808_v30  ;;  %3515 = vadd.xlane.f32.xlu1 %v3514_v59  ;;  %v3813_v36 = vmul.f32 %v13633_v31, %v13633_v31  ;;  %v3845_v9 = vmul.f32 %v3844_v52, %v13633_v31 }
0x1229   :  { %v13640_v39 = vsub.f32 %v13618_v14, %v3810_v34  ;;  %v3815_v40 = vsel %vm60_vm0, %v3813_v36, 0.0  ;;  %v11011_v36 = vld [vmem:[%s14937_s8 + $0x6] sm:$0x3] }
0x122a   :  { %v3543_v46 = vrot.slane %v11011_v36, %v13028_v37  ;;  %v3551_v6 = vrot.slane %v11011_v36, %v13034_v42 }
0x122b   :  { %3816 = vadd.xlane.f32.xlu1 %v3815_v40  ;;  %v3814_v41 = vmul.f32 %v13640_v39, %v13640_v39 }
0x122c   :  { %v3545_v5 = vmul.f32 %v3543_v46, %v13623_v24  ;;  %v3544_v2 = vmul.f32 %v3543_v46, %v13626_v25  ;;  %v12392_v24 = vpack.c.bf16 %v13683_v3, %v13678_v63 }
0x122d   :  { %v3818_v43 = vsel %vm60_vm0, %v3814_v41, 0.0 }
0x122e   :  { %3819 = vadd.xlane.f32.xlu0 %v3818_v43 }
0x12b3   :  { %v3519_v58 = vpop.xlane.xlu0 %3518 }
0x12b4   :  { %v3521_v32 = vmul.f32 0.032258064, %v3519_v58  ;;  %v3516_v35 = vpop.xlane.xlu1 %3515 }
0x12b5   :  { %v3520_v60 = vmul.f32 0.032258064, %v3516_v35 }
0x12b6   :  { %12697 = vrsqrt.f32 %v3521_v32  ;;  %vm3531_vm3 = vcmp.eq.f32.partialorder %v3521_v32, inf  ;;  %v3534_v17 = vand.u32 2147483648, %v3521_v32  ;;  %vm3533_vm4 = vcmp.eq.f32.partialorder %v3521_v32, 0.0 }
0x12b7   :  { %12699 = vrsqrt.f32 %v3520_v60  ;;  %vm3524_vm9 = vcmp.eq.f32.partialorder %v3520_v60, inf  ;;  %v3527_v13 = vand.u32 2147483648, %v3520_v60  ;;  %vm3526_vm10 = vcmp.eq.f32.partialorder %v3520_v60, 0.0 }
0x12b8   :  { %v3817_v38 = vpop.xlane.xlu1 %3816 }
0x12b9   :  { %v3821_v19 = vmul.f32 0.032258064, %v3817_v38  ;;  %v3846_v38 = vmul.f32 %v3844_v52, %v13640_v39  ;;  %v11026_v39 = vld [vmem:[%s14935_s6 + $0x70] sm:$0xff] }
0x12bb   :  { %12701 = vrsqrt.f32 %v3821_v19  ;;  %v3820_v18 = vpop.xlane.xlu0 %3819  ;;  %vm3825_vm11 = vcmp.eq.f32.partialorder %v3821_v19, inf  ;;  %v3828_v30 = vand.u32 2147483648, %v3821_v19  ;;  %vm3827_vm12 = vcmp.eq.f32.partialorder %v3821_v19, 0.0 }
0x12bc   :  { %v3822_v62 = vmul.f32 0.032258064, %v3820_v18 }
0x12be   :  { %12703 = vrsqrt.f32 %v3822_v62  ;;  %vm3832_vm14 = vcmp.eq.f32.partialorder %v3822_v62, inf  ;;  %v3835_v43 = vand.u32 2147483648, %v3822_v62  ;;  %vm3834_vm15 = vcmp.eq.f32.partialorder %v3822_v62, 0.0 }
0x12c0   :  { %v12698_v11 = vpop.eup %12697 }
0x12c1   :  { %v12700_v12 = vpop.eup %12699  ;;  %v3530_v16 = vmul.f32 %v12698_v11, %v3521_v32 }
0x12c2   :  { %v3523_v0 = vmul.f32 %v12700_v12, %v3520_v60  ;;  %v13739_v12 = vld [vmem:[%s14936_s7 + $0x1] ss:$0 sm:$0xff] }
0x12c3   :  { %v3532_v1 = vsel %vm3531_vm3, %v3521_v32, %v3530_v16  ;;  %v3852_v32 = vrot.slane %v11031_v49, %v13034_v42 }
0x12c4   :  { %v3535_v22 = vsel %vm3533_vm4, %v3534_v17, %v3532_v1  ;;  %v3525_v23 = vsel %vm3524_vm9, %v3520_v60, %v3523_v0 }
0x12c5   :  { %v12702_v27 = vpop.eup %12701  ;;  %v3537_v28 = vadd.f32 1e-06, %v3535_v22  ;;  %v3528_v57 = vsel %vm3526_vm10, %v3527_v13, %v3525_v23  ;;  %v13747_v23 = vld [vmem:[%s14933_s4 + $0x2] ss:$0 sm:$0xff] }
0x12c6   :  { %v3824_v29 = vmul.f32 %v12702_v27, %v3821_v19  ;;  %v3536_v33 = vadd.f32 1e-06, %v3528_v57 }
0x12c7   :  { %12705 = vrcp.f32 %v3537_v28 }
0x12c8   :  { %v12704_v59 = vpop.eup %12703  ;;  %v3826_v34 = vsel %vm3825_vm11, %v3821_v19, %v3824_v29  ;;  %12707 = vrcp.f32 %v3536_v33 }
0x12c9   :  { %v3831_v40 = vmul.f32 %v12704_v59, %v3822_v62  ;;  %v3829_v41 = vsel %vm3827_vm12, %v3828_v30, %v3826_v34 }
0x12ca   :  { %v3837_v44 = vadd.f32 1e-06, %v3829_v41 }
0x12cb   :  { %v3833_v45 = vsel %vm3832_vm14, %v3822_v62, %v3831_v40 }
0x12cc   :  { %v3836_v47 = vsel %vm3834_vm15, %v3835_v43, %v3833_v45  ;;  %12709 = vrcp.f32 %v3837_v44 }
0x12cd   :  { %v3838_v48 = vadd.f32 1e-06, %v3836_v47 }
0x12cf   :  { %12711 = vrcp.f32 %v3838_v48 }
0x12d1   :  { %v12706_v61 = vpop.eup %12705 }
0x12d2   :  { %v12708_v7 = vpop.eup %12707  ;;  %v3547_v8 = vmul.f32 %v12706_v61, %v3545_v5 }
0x12d3   :  { %v3546_v55 = vmul.f32 %v12708_v7, %v3544_v2  ;;  %v39_v2 = vld [vmem:[%s14931_s2] sm:$0xff] }
0x12d4   :  { %v3553_v60 = vadd.f32 %v3551_v6, %v3547_v8  ;;  %v10939_v52 = vadd.f32 -1.0, %v39_v2 }
0x12d5   :  { %v3552_v58 = vadd.f32 %v3551_v6, %v3546_v55  ;;  %v40_v6 = vld [vmem:[%s14931_s2 + $0x8] sm:$0xff] }
0x12d6   :  { %v12710_v35 = vpop.eup %12709  ;;  %v13856_v7 = vmul.f32 1e+09, %v10939_v52  ;;  %v10940_v8 = vadd.f32 -1.0, %v40_v6 }
0x12d7   :  { %11796 = vmatprep.mubr.msk.f32.mxu1 %vm60_vm0, %v3552_v58  ;;  %v3847_v25 = vmul.f32 %v12710_v35, %v3845_v9 }
0x12d8   :  { %11797 = vmatmul.mubr.msk.f32.vlgmr.msra.gmra.mrb[42].mxu1 %vm60_vm0, %v3553_v60 }
0x12d9   :  { %v12712_v19 = vpop.eup %12711  ;;  %12391 = vmatpush3.bf16.msra.mxu1 %v13670_v54  ;;  %v3853_v18 = vadd.f32 %v3852_v32, %v3847_v25  ;;  %v11027_v54 = vld [vmem:[%s14935_s6 + $0x78] sm:$0xff] }
0x12da   :  { %12393 = vmatprep.subr.bf16.mxu1 %v12392_v24  ;;  %v3848_v31 = vmul.f32 %v12712_v19, %v3846_v38  ;;  %v12384_v11 = vpack.c.bf16 %v11027_v54, %v11026_v39 }
0x12db   :  { %11826 = vmatprep.mubr.msk.f32.mxu1 %vm60_vm0, %v3853_v18 }
0x12dc   :  { %v3854_v62 = vadd.f32 %v3852_v32, %v3848_v31  ;;  %12385 = vmatprep.subr.bf16.mxu0 %v12384_v11  ;;  %v13859_v32 = vmul.f32 1e+09, %v10940_v8 }
0x12dd   :  { %12395 = vmatpush3.bf16.msra.mxu1 %v12392_v24  ;;  %12387 = vmatpush3.bf16.msra.mxu0 %v12384_v11 }
0x12de   :  { %11829 = vmatprep.subr.mxu1 %v12921_v53  ;;  %11839 = vmatprep.subr.mxu0 %v12921_v53 }
0x12e0   :  { %11827 = vmatmul.mubr.msk.f32.vlgmr.msra.gmra.mrb[44].mxu1 %vm60_vm0, %v3854_v62 }
0x12e1   :  { %11831 = vmatprep.mubr.msk.f32.mxu1 %vm12922_vm5, %v12921_v53 }
0x13ab   :  { %v11798_v16 = vpop.f32.mrb[42].mxu1 }
0x13ac   :  { %v3645_v17 = vadd.f32 %v11798_v16, %v13739_v12  ;;  %v3639_v0 = vpop.f32.mrb[43].mxu1 }
0x13ad   :  { %v3640_v1 = vadd.f32 %v13739_v12, %v3639_v0 }
0x13ae   :  { %v3649_v22 = vmax.f32 %v3645_v17, 0.0 }
0x13af   :  { %v3648_v13 = vmax.f32 %v3640_v1, 0.0 }
0x13b1   :  { %11815 = vmatprep.mubr.msk.f32.mxu0 %vm1818_vm13, %v3648_v13 }
0x13b2   :  { %11816 = vmatmul.mubr.msk.f32.vlgmr.msra.gmra.mrb[34].mxu0 %vm1818_vm13, %v3649_v22 }
0x13b3   :  { %v11828_v27 = vpop.f32.mrb[44].mxu1  ;;  %11841 = vmatprep.mubr.msk.f32.mxu0 %vm12922_vm5, %v12921_v53 }
0x13b4   :  { %v13753_v28 = vadd.f32 %v11828_v27, %v13747_v23  ;;  %v3940_v57 = vpop.f32.mrb[45].mxu1 }
0x13b5   :  { %v13760_v29 = vadd.f32 %v13747_v23, %v3940_v57 }
0x13b6   :  { %3957 = vrot.lane.b32.xlu1 %v13753_v28, %s12924_s26  ;;  %3953 = vrot.lane.b32.xlu0 %v13753_v28, %s12923_s25 }
0x13ba   :  { %3961 = vrot.lane.b32.xlu0 %v13753_v28, %s12925_s27  ;;  %3951 = vrot.lane.b32.xlu1 %v13760_v29, %s12923_s25 }
0x13be   :  { %4039 = vrot.lane.b32.xlu0 %v13753_v28, %s12926_s28  ;;  %3955 = vrot.lane.b32.xlu1 %v13760_v29, %s12924_s26 }
0x13c2   :  { %3959 = vrot.lane.b32.xlu1 %v13760_v29, %s12925_s27 }
0x13c6   :  { %3963 = vrot.lane.b32.xlu1 %v13760_v29, %s12926_s28 }
0x1428   :  { %v13774_v33 = vpop.permute.xlu1 %3957  ;;  %v13776_v30 = vpop.permute.xlu0 %3953 }
0x1429   :  { %4191 = vrot.lane.b32.xlu0 %v13776_v30, %s12926_s28 }
0x142c   :  { %v13780_v59 = vpop.permute.xlu1 %3951  ;;  %v13786_v34 = vpop.permute.xlu0 %3961 }
0x142d   :  { %4343 = vrot.lane.b32.xlu0 %v13774_v33, %s12926_s28  ;;  %4115 = vrot.lane.b32.xlu1 %v13780_v59, %s12926_s28 }
0x1430   :  { %v13788_v36 = vpop.permute.xlu1 %3955  ;;  %v4040_v43 = vpop.permute.xlu0 %4039 }
0x1431   :  { %4495 = vrot.lane.b32.xlu0 %v13786_v34, %s12926_s28  ;;  %4267 = vrot.lane.b32.xlu1 %v13788_v36, %s12926_s28 }
0x1434   :  { %v13794_v40 = vpop.permute.xlu1 %3959 }
0x1435   :  { %4419 = vrot.lane.b32.xlu1 %v13794_v40, %s12926_s28 }
0x1438   :  { %v3964_v41 = vpop.permute.xlu1 %3963 }
0x1439   :  { %11830 = vmatpush3.xpose.msk.msra.mxu1 %vm222_vm6, %v3964_v41 }
0x143a   :  { %11834 = vmatprep.subr.mxu1 %v12921_v53 }
0x143c   :  { %11832 = vmatmul.mubr.msk.f32.vlgmr.msra.gmra.mrb[46].mxu1 %vm222_vm6, %v13760_v29 }
0x143d   :  { %11835 = vmatpush3.xpose.msk.msra.mxu1 %vm222_vm6, %v4040_v43  ;;  %11836 = vmatprep.mubr.msk.f32.mxu1 %vm12922_vm5, %v12921_v53 }
0x143e   :  { %11844 = vmatprep.subr.mxu1 %v12921_v53 }
0x1440   :  { %11837 = vmatmul.mubr.msk.f32.vlgmr.msra.gmra.mrb[48].mxu1 %vm222_vm6, %v13753_v28 }
0x1441   :  { %11846 = vmatprep.mubr.msk.f32.mxu1 %vm12922_vm5, %v12921_v53 }
0x1485   :  { %v13810_v44 = vpop.f32.mrb[34].mxu0 }
0x1486   :  { %v13812_v45 = vpop.f32.mrb[35].mxu0 }
0x149b   :  { %v4192_v46 = vpop.permute.xlu0 %4191 }
0x149c   :  { %11845 = vmatpush3.xpose.msk.msra.mxu1 %vm222_vm6, %v4192_v46 }
0x149d   :  { %11854 = vmatprep.subr.mxu1 %v12921_v53 }
0x149f   :  { %v4344_v47 = vpop.permute.xlu0 %4343  ;;  %11847 = vmatmul.mubr.msk.f32.vlgmr.msra.gmra.mrb[50].mxu1 %vm222_vm6, %v13776_v30  ;;  %v4116_v48 = vpop.permute.xlu1 %4115 }
0x14a0   :  { %11840 = vmatpush3.xpose.msk.msra.mxu0 %vm222_vm6, %v4116_v48  ;;  %11855 = vmatpush3.xpose.msk.msra.mxu1 %vm222_vm6, %v4344_v47 }
0x14a1   :  { %11856 = vmatprep.mubr.msk.f32.mxu1 %vm12922_vm5, %v12921_v53  ;;  %11849 = vmatprep.subr.mxu0 %v12921_v53 }
0x14a2   :  { %11864 = vmatprep.subr.mxu1 %v12921_v53 }
0x14a3   :  { %v4496_v49 = vpop.permute.xlu0 %4495  ;;  %11842 = vmatmul.mubr.msk.f32.vlgmr.msra.gmra.mrb[36].mxu0 %vm222_vm6, %v13780_v59  ;;  %11857 = vmatmul.mubr.msk.f32.vlgmr.msra.gmra.mrb[52].mxu1 %vm222_vm6, %v13774_v33  ;;  %v4268_v5 = vpop.permute.xlu1 %4267 }
0x14a4   :  { %11850 = vmatpush3.xpose.msk.msra.mxu0 %vm222_vm6, %v4268_v5  ;;  %11865 = vmatpush3.xpose.msk.msra.mxu1 %vm222_vm6, %v4496_v49 }
0x14a5   :  { %11851 = vmatprep.mubr.msk.f32.mxu0 %vm12922_vm5, %v12921_v53  ;;  %11866 = vmatprep.mubr.msk.f32.mxu1 %vm12922_vm5, %v12921_v53 }
0x14a6   :  { %11859 = vmatprep.subr.mxu0 %v12921_v53  ;;  %11874 = vmatprep.subr.mxu1 %v12921_v53 }
0x14a7   :  { %11852 = vmatmul.mubr.msk.f32.vlgmr.msra.gmra.mrb[38].mxu0 %vm222_vm6, %v13788_v36  ;;  %11867 = vmatmul.mubr.msk.f32.vlgmr.msra.gmra.mrb[54].mxu1 %vm222_vm6, %v13786_v34  ;;  %v4420_v61 = vpop.permute.xlu1 %4419 }
0x14a8   :  { %11860 = vmatpush3.xpose.msk.msra.mxu0 %vm222_vm6, %v4420_v61  ;;  %11861 = vmatprep.mubr.msk.f32.mxu0 %vm12922_vm5, %v12921_v53 }
0x14a9   :  { %11869 = vmatprep.subr.mxu0 %v12921_v53  ;;  %11876 = vmatprep.mubr.msk.f32.mxu1 %vm12922_vm5, %v12921_v53 }
0x14ab   :  { %11862 = vmatmul.mubr.msk.f32.vlgmr.msra.gmra.mrb[40].mxu0 %vm222_vm6, %v13794_v40 }
0x14ac   :  { %11871 = vmatprep.mubr.msk.f32.mxu0 %vm12922_vm5, %v12921_v53 }
0x150f   :  { %v4035_v55 = vpop.f32.mrb[46].mxu1 }
0x1510   :  { %v4036_v9 = vadd.f32 %v4035_v55, %v13856_v7  ;;  %v11833_v58 = vpop.f32.mrb[47].mxu1 }
0x1512   :  { %v4571_v35 = vsel %vm222_vm6, %v4036_v9, -inf }
0x1513   :  { %4572 = vmax.xlane.f32.xlu1 %v4571_v35  ;;  %v4111_v60 = vpop.f32.mrb[48].mxu1 }
0x1514   :  { %v4112_v24 = vadd.f32 %v4111_v60, %v13859_v32  ;;  %v11838_v25 = vpop.f32.mrb[49].mxu1 }
0x1516   :  { %v4574_v38 = vsel %vm222_vm6, %v4112_v24, -inf }
0x1517   :  { %4575 = vmax.xlane.f32.xlu0 %v4574_v38 }
0x1572   :  { %v4263_v19 = vpop.f32.mrb[50].mxu1 }
0x1573   :  { %v11848_v18 = vpop.f32.mrb[51].mxu1  ;;  %v4264_v16 = vadd.f32 %v4263_v19, %v13859_v32 }
0x1575   :  { %v4580_v41 = vsel %vm222_vm6, %v4264_v16, -inf }
0x1576   :  { %v4187_v31 = vpop.f32.mrb[36].mxu0  ;;  %v4415_v62 = vpop.f32.mrb[52].mxu1 }
0x1577   :  { %v4188_v39 = vadd.f32 %v4187_v31, %v13856_v7  ;;  %v11843_v54 = vpop.f32.mrb[37].mxu0  ;;  %v11858_v11 = vpop.f32.mrb[53].mxu1  ;;  %v4416_v57 = vadd.f32 %v4415_v62, %v13859_v32 }
0x1579   :  { %v4577_v17 = vsel %vm222_vm6, %v4188_v39, -inf  ;;  %v4586_v5 = vsel %vm222_vm6, %v4416_v57, -inf }
0x157a   :  { %v4567_v0 = vpop.f32.mrb[54].mxu1  ;;  %4578 = vmax.xlane.f32.xlu0 %v4577_v17  ;;  %v4339_v1 = vpop.f32.mrb[38].mxu0 }
0x157b   :  { %v4340_v13 = vadd.f32 %v4339_v1, %v13856_v7  ;;  %v11853_v22 = vpop.f32.mrb[39].mxu0  ;;  %v11868_v27 = vpop.f32.mrb[55].mxu1  ;;  %v4568_v49 = vadd.f32 %v4567_v0, %v13859_v32 }
0x157d   :  { %v4583_v43 = vsel %vm222_vm6, %v4340_v13, -inf  ;;  %v4592_v2 = vsel %vm222_vm6, %v4568_v49, -inf }
0x157e   :  { %4581 = vmax.xlane.f32.xlu0 %v4580_v41  ;;  %4584 = vmax.xlane.f32.xlu1 %v4583_v43  ;;  %v4491_v46 = vpop.f32.mrb[40].mxu0 }
0x157f   :  { %v4492_v47 = vadd.f32 %v4491_v46, %v13856_v7  ;;  %v11863_v48 = vpop.f32.mrb[41].mxu0 }
0x1581   :  { %v4589_v61 = vsel %vm222_vm6, %v4492_v47, -inf }
0x1582   :  { %4587 = vmax.xlane.f32.xlu0 %v4586_v5  ;;  %4590 = vmax.xlane.f32.xlu1 %v4589_v61 }
0x1586   :  { %4593 = vmax.xlane.f32.xlu0 %v4592_v2 }
0x1593   :  { %4659 = vrot.lane.b32.xlu1 %v13760_v29, %s12927_s1 }
0x1597   :  { %4811 = vrot.lane.b32.xlu1 %v13780_v59, %s12927_s1 }
0x159b   :  { %4887 = vrot.lane.b32.xlu1 %v13776_v30, %s12927_s1 }
0x159c   :  { %4735 = vrot.lane.b32.xlu0 %v13753_v28, %s12927_s1 }
0x159f   :  { %4963 = vrot.lane.b32.xlu1 %v13788_v36, %s12927_s1 }
0x15a0   :  { %5039 = vrot.lane.b32.xlu0 %v13774_v33, %s12927_s1  ;;  %v4573_v8 = vpop.xlane.xlu1 %4572 }
0x15a1   :  { %v4595_v55 = vsub.f32 %v4036_v9, %v4573_v8 }
0x15a3   :  { %v4603_v58 = vmul.f32 1.442695, %v4595_v55 }
0x15a4   :  { %v4576_v52 = vpop.xlane.xlu0 %4575 }
0x15a5   :  { %v4596_v6 = vsub.f32 %v4112_v24, %v4576_v52 }
0x15a7   :  { %v4605_v29 = vmul.f32 1.442695, %v4596_v6 }
0x15a9   :  { %12713 = vpow2.f32 %v4605_v29 }
0x15aa   :  { %12715 = vpow2.f32 %v4603_v58 }
0x15b3   :  { %v13888_v59 = vpop.eup %12713 }
0x15b4   :  { %v4622_v30 = vsel %vm222_vm6, %v13888_v59, 0.0  ;;  %v13892_v28 = vpop.eup %12715 }
0x15b5   :  { %v4619_v36 = vsel %vm222_vm6, %v13892_v28, 0.0 }
0x15bf   :  { %4623 = vadd.xlane.f32.xlu0 %v4622_v30 }
0x15c3   :  { %4620 = vadd.xlane.f32.xlu1 %v4619_v36 }
0x1607   :  { %v4579_v33 = vpop.xlane.xlu0 %4578 }
0x1608   :  { %v4597_v35 = vsub.f32 %v4188_v39, %v4579_v33 }
0x160a   :  { %v4607_v60 = vmul.f32 1.442695, %v4597_v35 }
0x160b   :  { %v4582_v9 = vpop.xlane.xlu0 %4581  ;;  %v4585_v24 = vpop.xlane.xlu1 %4584 }
0x160c   :  { %12717 = vpow2.f32 %v4607_v60  ;;  %v4598_v25 = vsub.f32 %v4264_v16, %v4582_v9  ;;  %v4599_v38 = vsub.f32 %v4340_v13, %v4585_v24 }
0x160e   :  { %v4609_v19 = vmul.f32 1.442695, %v4598_v25  ;;  %v4611_v18 = vmul.f32 1.442695, %v4599_v38 }
0x160f   :  { %v4588_v31 = vpop.xlane.xlu0 %4587  ;;  %v4591_v62 = vpop.xlane.xlu1 %4590 }
0x1610   :  { %12719 = vpow2.f32 %v4609_v19  ;;  %v4600_v54 = vsub.f32 %v4416_v57, %v4588_v31  ;;  %v4601_v11 = vsub.f32 %v4492_v47, %v4591_v62 }
0x1611   :  { %12721 = vpow2.f32 %v4611_v18 }
0x1612   :  { %v4613_v17 = vmul.f32 1.442695, %v4600_v54  ;;  %v4615_v0 = vmul.f32 1.442695, %v4601_v11 }
0x1613   :  { %v4594_v1 = vpop.xlane.xlu0 %4593  ;;  %v4660_v22 = vpop.permute.xlu1 %4659 }
0x1614   :  { %12723 = vpow2.f32 %v4613_v17  ;;  %v4602_v39 = vsub.f32 %v4568_v49, %v4594_v1  ;;  %11870 = vmatpush3.msra.mxu0 %v4660_v22 }
0x1615   :  { %12725 = vpow2.f32 %v4615_v0  ;;  %11879 = vmatprep.subr.mxu0 %v12921_v53 }
0x1616   :  { %v12718_v16 = vpop.eup %12717  ;;  %v4617_v13 = vmul.f32 1.442695, %v4602_v39 }
0x1617   :  { %v4736_v27 = vpop.permute.xlu0 %4735  ;;  %v4625_v41 = vsel %vm222_vm6, %v12718_v16, 0.0  ;;  %v4812_v6 = vpop.permute.xlu1 %4811 }
0x1618   :  { %12727 = vpow2.f32 %v4617_v13  ;;  %11875 = vmatpush3.msra.mxu1 %v4736_v27  ;;  %4626 = vadd.xlane.f32.xlu1 %v4625_v41 }
0x1619   :  { %11884 = vmatprep.subr.mxu1 %v12921_v53 }
0x161a   :  { %v12720_v57 = vpop.eup %12719 }
0x161b   :  { %v12722_v43 = vpop.eup %12721  ;;  %v4628_v46 = vsel %vm222_vm6, %v12720_v57, 0.0  ;;  %v4888_v8 = vpop.permute.xlu1 %4887 }
0x161c   :  { %4629 = vadd.xlane.f32.xlu0 %v4628_v46  ;;  %v4631_v47 = vsel %vm222_vm6, %v12722_v43, 0.0  ;;  %v5040_v55 = vpop.permute.xlu0 %5039 }
0x161d   :  { %4632 = vadd.xlane.f32.xlu1 %v4631_v47 }
0x161e   :  { %v13901_v48 = vpop.eup %12723 }
0x161f   :  { %v13903_v49 = vpop.eup %12725  ;;  %v4634_v5 = vsel %vm222_vm6, %v13901_v48, 0.0  ;;  %v4964_v29 = vpop.permute.xlu1 %4963 }
0x1620   :  { %4635 = vadd.xlane.f32.xlu0 %v4634_v5  ;;  %v4637_v61 = vsel %vm222_vm6, %v13903_v49, 0.0 }
0x1621   :  { %4638 = vadd.xlane.f32.xlu1 %v4637_v61 }
0x1622   :  { %v13909_v2 = vpop.eup %12727 }
0x1623   :  { %v4640_v52 = vsel %vm222_vm6, %v13909_v2, 0.0 }
0x1624   :  { %4641 = vadd.xlane.f32.xlu0 %v4640_v52 }
0x1632   :  { %5115 = vrot.lane.b32.xlu1 %v13794_v40, %s12927_s1 }
0x1636   :  { %12550 = vrot.lane.b32.xlu1 %v12549_v56, %s12928_s12 }
0x163a   :  { %5191 = vrot.lane.b32.xlu0 %v13786_v34, %s12927_s1 }
0x163e   :  { %12555 = vrot.lane.b32.xlu0 %v12554_v4, %s12928_s12 }
0x164c   :  { %v4624_v58 = vpop.xlane.xlu0 %4623 }
0x164d   :  { %12729 = vrcp.f32 %v4624_v58 }
0x1650   :  { %v4621_v40 = vpop.xlane.xlu1 %4620 }
0x1651   :  { %12731 = vrcp.f32 %v4621_v40 }
0x1657   :  { %v12730_v30 = vpop.eup %12729 }
0x1658   :  { %v4652_v50 = vmul.f32 %v12730_v30, %v13888_v59 }
0x165a   :  { %11877 = vmatmul.mubr.msk.f32.vlgmr.msra.gmra.mrb[56].mxu1 %vm222_vm6, %v4652_v50 }
0x165b   :  { %v12732_v51 = vpop.eup %12731  ;;  %11885 = vmatpush3.msra.mxu1 %v4888_v8  ;;  %11886 = vmatprep.mubr.msk.f32.mxu1 %vm12922_vm5, %v12921_v53 }
0x165c   :  { %v4651_v56 = vmul.f32 %v12732_v51, %v13892_v28  ;;  %11894 = vmatprep.subr.mxu1 %v12921_v53 }
0x165e   :  { %11872 = vmatmul.mubr.msk.f32.vlgmr.msra.gmra.mrb[42].mxu0 %vm222_vm6, %v4651_v56 }
0x165f   :  { %11880 = vmatpush3.msra.mxu0 %v4812_v6  ;;  %11881 = vmatprep.mubr.msk.f32.mxu0 %vm12922_vm5, %v12921_v53 }
0x1660   :  { %11889 = vmatprep.subr.mxu0 %v12921_v53 }
0x16a5   :  { %v4627_v63 = vpop.xlane.xlu1 %4626 }
0x16a6   :  { %12733 = vrcp.f32 %v4627_v63 }
0x16a9   :  { %v4630_v3 = vpop.xlane.xlu0 %4629 }
0x16aa   :  { %12735 = vrcp.f32 %v4630_v3  ;;  %v4633_v4 = vpop.xlane.xlu1 %4632 }
0x16ab   :  { %12737 = vrcp.f32 %v4633_v4 }
0x16ad   :  { %v4636_v34 = vpop.xlane.xlu0 %4635 }
0x16ae   :  { %12739 = vrcp.f32 %v4636_v34  ;;  %v4639_v59 = vpop.xlane.xlu1 %4638 }
0x16af   :  { %12741 = vrcp.f32 %v4639_v59 }
0x16b0   :  { %v12734_v28 = vpop.eup %12733 }
0x16b1   :  { %v4642_v36 = vpop.xlane.xlu0 %4641  ;;  %v4653_v33 = vmul.f32 %v12734_v28, %v12718_v16 }
0x16b2   :  { %12743 = vrcp.f32 %v4642_v36  ;;  %v5116_v38 = vpop.permute.xlu1 %5115 }
0x16b3   :  { %11882 = vmatmul.mubr.msk.f32.vlgmr.msra.gmra.mrb[44].mxu0 %vm222_vm6, %v4653_v33 }
0x16b4   :  { %v12736_v35 = vpop.eup %12735  ;;  %11890 = vmatpush3.msra.mxu0 %v4964_v29  ;;  %11891 = vmatprep.mubr.msk.f32.mxu0 %vm12922_vm5, %v12921_v53 }
0x16b5   :  { %v12738_v60 = vpop.eup %12737  ;;  %11899 = vmatprep.subr.mxu0 %v12921_v53  ;;  %v4654_v9 = vmul.f32 %v12736_v35, %v12720_v57  ;;  %v5192_v62 = vpop.permute.xlu0 %5191 }
0x16b6   :  { %v4655_v24 = vmul.f32 %v12738_v60, %v12722_v43  ;;  %v12551_v39 = vpop.permute.xlu1 %12550 }
0x16b7   :  { %11887 = vmatmul.mubr.msk.f32.vlgmr.msra.gmra.mrb[58].mxu1 %vm222_vm6, %v4654_v9  ;;  %v12553_v16 = vunpack.i.h.bf16 %v12551_v39  ;;  %v12552_v13 = vunpack.i.l.bf16 %v12551_v39 }
0x16b8   :  { %v12740_v25 = vpop.eup %12739  ;;  %11892 = vmatmul.mubr.msk.f32.vlgmr.msra.gmra.mrb[46].mxu0 %vm222_vm6, %v4655_v24  ;;  %11895 = vmatpush3.msra.mxu1 %v5040_v55 }
0x16b9   :  { %v12742_v19 = vpop.eup %12741  ;;  %11900 = vmatpush3.msra.mxu0 %v5116_v38  ;;  %11896 = vmatprep.mubr.msk.f32.mxu1 %vm12922_vm5, %v12921_v53  ;;  %v4656_v18 = vmul.f32 %v12740_v25, %v13901_v48  ;;  %v12556_v27 = vpop.permute.xlu0 %12555  ;;  %v12396_v43 = vpack.c.bf16 %v12553_v16, %v12552_v13  ;;  %v11030_v38 = vld [vmem:[%s14937_s8 + $0x8] sm:$0x3] }
0x16ba   :  { %11901 = vmatprep.mubr.msk.f32.mxu0 %vm12922_vm5, %v12921_v53  ;;  %11904 = vmatprep.subr.mxu1 %v12921_v53  ;;  %v4657_v31 = vmul.f32 %v12742_v19, %v13903_v49  ;;  %v12558_v41 = vunpack.i.h.bf16 %v12556_v27  ;;  %v12557_v57 = vunpack.i.l.bf16 %v12556_v27 }
0x16bb   :  { %11897 = vmatmul.mubr.msk.f32.vlgmr.msra.gmra.mrb[60].mxu1 %vm222_vm6, %v4656_v18  ;;  %12397 = vmatprep.subr.bf16.mxu0 %v12396_v43 }
0x16bc   :  { %v12744_v54 = vpop.eup %12743  ;;  %11902 = vmatmul.mubr.msk.f32.vlgmr.msra.gmra.mrb[48].mxu0 %vm222_vm6, %v4657_v31  ;;  %11905 = vmatpush3.msra.mxu1 %v5192_v62  ;;  %v12400_v46 = vpack.c.bf16 %v12558_v41, %v12557_v57 }
0x16bd   :  { %11906 = vmatprep.mubr.msk.f32.mxu1 %vm12922_vm5, %v12921_v53  ;;  %v4658_v11 = vmul.f32 %v12744_v54, %v13909_v2  ;;  %12399 = vmatpush3.bf16.msra.mxu0 %v12396_v43 }
0x16be   :  { %12401 = vmatprep.subr.bf16.mxu0 %v12400_v46 }
0x16bf   :  { %11907 = vmatmul.mubr.msk.f32.vlgmr.msra.gmra.mrb[62].mxu1 %vm222_vm6, %v4658_v11 }
0x16c1   :  { %12403 = vmatpush3.bf16.msra.mxu0 %v12400_v46 }
0x172d   :  { %v4807_v17 = vpop.f32.mrb[56].mxu1 }
0x172e   :  { %v11878_v0 = vpop.f32.mrb[57].mxu1 }
0x1731   :  { %v4731_v1 = vpop.f32.mrb[42].mxu0 }
0x1732   :  { %v11873_v22 = vpop.f32.mrb[43].mxu0 }
0x1786   :  { %v4883_v47 = vpop.f32.mrb[44].mxu0 }
0x1787   :  { %5269 = vrot.lane.b32.xlu1 %v4883_v47, %s12929_s13  ;;  %v11883_v48 = vpop.f32.mrb[45].mxu0 }
0x178a   :  { %v4959_v49 = vpop.f32.mrb[58].mxu1 }
0x178b   :  { %v5035_v5 = vpop.f32.mrb[46].mxu0  ;;  %5271 = vrot.lane.b32.xlu0 %v4959_v49, %s12929_s13  ;;  %v11888_v61 = vpop.f32.mrb[59].mxu1 }
0x178c   :  { %5277 = vrot.lane.b32.xlu1 %v5035_v5, %s12930_s14  ;;  %v11893_v2 = vpop.f32.mrb[47].mxu0 }
0x178d   :  { %v13997_v2 = vrot.slane %v11030_v38, %v13034_v42 }
0x178e   :  { %v5111_v52 = vpop.f32.mrb[60].mxu1 }
0x178f   :  { %v5187_v6 = vpop.f32.mrb[48].mxu0  ;;  %5279 = vrot.lane.b32.xlu0 %v5111_v52, %s12930_s14  ;;  %v11898_v8 = vpop.f32.mrb[61].mxu1 }
0x1790   :  { %5285 = vrot.lane.b32.xlu1 %v5187_v6, %s12931_s15  ;;  %v11903_v55 = vpop.f32.mrb[49].mxu0 }
0x1792   :  { %v5263_v29 = vpop.f32.mrb[62].mxu1 }
0x1793   :  { %5287 = vrot.lane.b32.xlu0 %v5263_v29, %s12931_s15  ;;  %v11908_v58 = vpop.f32.mrb[63].mxu1 }
0x1794   :  { %3659 = vrot.lane.b32.xlu1 %v13739_v12, %s12927_s1 }
0x1797   :  { %5313 = vrot.lane.b32.xlu0 %v13747_v23, %s12928_s12 }
0x17f9   :  { %v5270_v40 = vpop.permute.xlu1 %5269 }
0x17fa   :  { %v5291_v51 = vsel %vm222_vm6, %v4731_v1, %v5270_v40 }
0x17fd   :  { %v5272_v30 = vpop.permute.xlu0 %5271 }
0x17fe   :  { %v5278_v50 = vpop.permute.xlu1 %5277  ;;  %v5292_v34 = vsel %vm222_vm6, %v4807_v17, %v5272_v30 }
0x17ff   :  { %v5293_v63 = vsel %vm1551_vm7, %v5291_v51, %v5278_v50 }
0x1801   :  { %v5280_v56 = vpop.permute.xlu0 %5279 }
0x1802   :  { %v5286_v3 = vpop.permute.xlu1 %5285  ;;  %v5294_v12 = vsel %vm1551_vm7, %v5292_v34, %v5280_v56  ;;  %v11068_v34 = vld [vmem:[%s14932_s3 + $0x88] sm:$0xff] }
0x1803   :  { %v5295_v4 = vsel %vm1554_vm8, %v5293_v63, %v5286_v3 }
0x1804   :  { %11917 = vmatprep.mubr.msk.f32.mxu0 %vm60_vm0, %v5295_v4  ;;  %v11067_v4 = vld [vmem:[%s14932_s3 + $0x80] sm:$0xff] }
0x1805   :  { %v5288_v59 = vpop.permute.xlu0 %5287 }
0x1806   :  { %v5296_v23 = vsel %vm1554_vm8, %v5294_v12, %v5288_v59  ;;  %v3660_v28 = vpop.permute.xlu1 %3659  ;;  %v14022_v12 = vpack.i.bf16 %v11068_v34, %v11067_v4  ;;  %v11069_v59 = vld [vmem:[%s14932_s3 + $0x90] sm:$0xff] }
0x1807   :  { %v3735_v36 = vadd.f32 %v13812_v45, %v3660_v28  ;;  %v3740_v33 = vadd.f32 %v13810_v44, %v3660_v28  ;;  %11918 = vmatmul.mubr.msk.f32.vlgmr.msra.gmra.mrb[50].mxu0 %vm60_vm0, %v5296_v23  ;;  %v3788_v44 = vrot.slane %v11030_v38, %v13028_v37  ;;  %v11070_v23 = vld [vmem:[%s14932_s3 + $0x98] sm:$0xff] }
0x1808   :  { %v14032_v28 = vpack.i.bf16 %v11070_v23, %v11069_v59 }
0x1809   :  { %v3744_v35 = vadd.f32 %v3740_v33, %v13599_v10  ;;  %v3743_v60 = vadd.f32 %v3735_v36, %v13602_v15  ;;  %v5314_v25 = vpop.permute.xlu0 %5313  ;;  %v12404_v36 = vpack.c.bf16 %v11068_v34, %v11067_v4  ;;  %v12408_v33 = vpack.c.bf16 %v11070_v23, %v11069_v59 }
0x180b   :  { %v3750_v9 = vsel %vm60_vm0, %v3744_v35, 0.0  ;;  %v3747_v24 = vsel %vm60_vm0, %v3743_v60, 0.0  ;;  %12405 = vmatprep.subr.bf16.mxu1 %v12404_v36 }
0x180c   :  { %3751 = vadd.xlane.f32.xlu0 %v3750_v9  ;;  %3748 = vadd.xlane.f32.xlu1 %v3747_v24 }
0x180d   :  { %12407 = vmatpush3.bf16.msra.mxu1 %v12404_v36 }
0x180e   :  { %12409 = vmatprep.subr.bf16.mxu1 %v12408_v33 }
0x1811   :  { %12411 = vmatpush3.bf16.msra.mxu1 %v12408_v33 }
0x1812   :  { %11942 = vmatprep.subr.mxu1 %v12921_v53 }
0x1899   :  { %v3752_v45 = vpop.xlane.xlu0 %3751  ;;  %v3749_v19 = vpop.xlane.xlu1 %3748 }
0x189a   :  { %v3754_v18 = vmul.f32 0.03125, %v3752_v45  ;;  %v3753_v31 = vmul.f32 0.03125, %v3749_v19 }
0x189c   :  { %v3756_v10 = vsub.f32 %v3744_v35, %v3754_v18  ;;  %v3755_v62 = vsub.f32 %v3743_v60, %v3753_v31  ;;  %v14040_v35 = vld [vmem:[%s14933_s4 + $0x4] ss:$0 sm:$0xff] }
0x189e   :  { %v13982_v15 = vmul.f32 %v3788_v44, %v3756_v10  ;;  %v3757_v54 = vmul.f32 %v3755_v62, %v3755_v62  ;;  %v3758_v41 = vmul.f32 %v3756_v10, %v3756_v10  ;;  %v3789_v61 = vmul.f32 %v3788_v44, %v3755_v62 }
0x18a0   :  { %v3759_v11 = vsel %vm60_vm0, %v3757_v54, 0.0  ;;  %v3762_v57 = vsel %vm60_vm0, %v3758_v41, 0.0 }
0x18a1   :  { %3760 = vadd.xlane.f32.xlu1 %v3759_v11 }
0x18da   :  { %v11919_v17 = vpop.f32.mrb[50].mxu0 }
0x18db   :  { %v5388_v0 = vpop.f32.mrb[51].mxu0  ;;  %v5394_v1 = vadd.f32 %v11919_v17, %v5314_v25 }
0x18dc   :  { %v5389_v22 = vadd.f32 %v5388_v0, %v5314_v25 }
0x18dd   :  { %v13989_v16 = vadd.f32 %v5394_v1, %v13618_v14 }
0x18de   :  { %v13986_v39 = vadd.f32 %v5389_v22, %v13607_v21 }
0x18df   :  { %v5404_v27 = vsel %vm60_vm0, %v13989_v16, 0.0 }
0x18e0   :  { %v5401_v13 = vsel %vm60_vm0, %v13986_v39, 0.0 }
0x18e1   :  { %5402 = vadd.xlane.f32.xlu0 %v5401_v13 }
0x18e5   :  { %5405 = vadd.xlane.f32.xlu0 %v5404_v27 }
0x18e9   :  { %3763 = vadd.xlane.f32.xlu0 %v3762_v57 }
0x192e   :  { %v3761_v43 = vpop.xlane.xlu1 %3760 }
0x192f   :  { %v3765_v46 = vmul.f32 0.032258064, %v3761_v43 }
0x1931   :  { %12745 = vrsqrt.f32 %v3765_v46  ;;  %vm3769_vm1 = vcmp.eq.f32.partialorder %v3765_v46, inf  ;;  %v3772_v14 = vand.u32 2147483648, %v3765_v46  ;;  %vm3771_vm2 = vcmp.eq.f32.partialorder %v3765_v46, 0.0 }
0x193b   :  { %v12746_v21 = vpop.eup %12745 }
0x193c   :  { %v3768_v47 = vmul.f32 %v12746_v21, %v3765_v46 }
0x193e   :  { %v3770_v48 = vsel %vm3769_vm1, %v3765_v46, %v3768_v47 }
0x193f   :  { %v3773_v49 = vsel %vm3771_vm2, %v3772_v14, %v3770_v48 }
0x1940   :  { %v3781_v5 = vadd.f32 1e-06, %v3773_v49 }
0x1942   :  { %12747 = vrcp.f32 %v3781_v5 }
0x194c   :  { %v12748_v52 = vpop.eup %12747 }
0x194d   :  { %v3791_v6 = vmul.f32 %v12748_v52, %v3789_v61 }
0x194f   :  { %v14000_v8 = vadd.f32 %v13997_v2, %v3791_v6 }
0x1951   :  { %11939 = vmatprep.mubr.msk.f32.mxu0 %vm60_vm0, %v14000_v8 }
0x196e   :  { %v5403_v55 = vpop.xlane.xlu0 %5402 }
0x196f   :  { %v5407_v29 = vmul.f32 0.03125, %v5403_v55 }
0x1971   :  { %v14005_v58 = vsub.f32 %v13986_v39, %v5407_v29 }
0x1972   :  { %v5406_v40 = vpop.xlane.xlu0 %5405 }
0x1973   :  { %v5408_v30 = vmul.f32 0.03125, %v5406_v40  ;;  %v5411_v50 = vmul.f32 %v14005_v58, %v14005_v58 }
0x1975   :  { %v14010_v51 = vsub.f32 %v13989_v16, %v5408_v30  ;;  %v5413_v56 = vsel %vm60_vm0, %v5411_v50, 0.0 }
0x1976   :  { %5414 = vadd.xlane.f32.xlu1 %v5413_v56  ;;  %v3764_v60 = vpop.xlane.xlu0 %3763 }
0x1977   :  { %v5412_v63 = vmul.f32 %v14010_v51, %v14010_v51  ;;  %v3766_v9 = vmul.f32 0.032258064, %v3764_v60 }
0x1979   :  { %v5416_v3 = vsel %vm60_vm0, %v5412_v63, 0.0  ;;  %12749 = vrsqrt.f32 %v3766_v9  ;;  %vm3776_vm3 = vcmp.eq.f32.partialorder %v3766_v9, inf  ;;  %v3779_v45 = vand.u32 2147483648, %v3766_v9 }
0x197a   :  { %5417 = vadd.xlane.f32.xlu0 %v5416_v3  ;;  %vm3778_vm4 = vcmp.eq.f32.partialorder %v3766_v9, 0.0 }
0x1983   :  { %v12750_v24 = vpop.eup %12749 }
0x1984   :  { %v3775_v25 = vmul.f32 %v12750_v24, %v3766_v9 }
0x1986   :  { %v3777_v38 = vsel %vm3776_vm3, %v3766_v9, %v3775_v25 }
0x1987   :  { %12560 = vrot.lane.b32.xlu1 %v14022_v12, %s12926_s28  ;;  %v3780_v19 = vsel %vm3778_vm4, %v3779_v45, %v3777_v38 }
0x1988   :  { %v3782_v44 = vadd.f32 1e-06, %v3780_v19 }
0x198a   :  { %12751 = vrcp.f32 %v3782_v44 }
0x198b   :  { %5563 = vrot.lane.b32.xlu1 %v14040_v35, %s12926_s28 }
0x1990   :  { %12565 = vrot.lane.b32.xlu0 %v14032_v28, %s12926_s28 }
0x1994   :  { %v12752_v1 = vpop.eup %12751 }
0x1995   :  { %v3792_v57 = vmul.f32 %v12752_v1, %v13982_v15 }
0x1997   :  { %v14046_v14 = vadd.f32 %v13997_v2, %v3792_v57  ;;  %v11066_v2 = vld [vmem:[%s14937_s8 + $0xc] sm:$0x3] }
0x1998   :  { %v5442_v29 = vrot.slane %v11066_v2, %v13028_v37  ;;  %v5450_v30 = vrot.slane %v11066_v2, %v13034_v42 }
0x199a   :  { %v5443_v40 = vmul.f32 %v5442_v29, %v14005_v58  ;;  %v5444_v3 = vmul.f32 %v5442_v29, %v14010_v51 }
0x1a03   :  { %v5415_v18 = vpop.xlane.xlu1 %5414 }
0x1a04   :  { %v5419_v31 = vmul.f32 0.032258064, %v5415_v18 }
0x1a06   :  { %12753 = vrsqrt.f32 %v5419_v31  ;;  %vm5423_vm9 = vcmp.eq.f32.partialorder %v5419_v31, inf  ;;  %v5426_v21 = vand.u32 2147483648, %v5419_v31  ;;  %vm5425_vm10 = vcmp.eq.f32.partialorder %v5419_v31, 0.0 }
0x1a07   :  { %v12561_v10 = vpop.permute.xlu1 %12560  ;;  %v5418_v11 = vpop.xlane.xlu0 %5417 }
0x1a08   :  { %v12563_v62 = vunpack.i.h.bf16 %v12561_v10  ;;  %v12562_v54 = vunpack.i.l.bf16 %v12561_v10  ;;  %v5420_v17 = vmul.f32 0.032258064, %v5418_v11 }
0x1a0a   :  { %v12412_v0 = vpack.c.bf16 %v12563_v62, %v12562_v54  ;;  %12755 = vrsqrt.f32 %v5420_v17  ;;  %vm5430_vm11 = vcmp.eq.f32.partialorder %v5420_v17, inf  ;;  %v5433_v61 = vand.u32 2147483648, %v5420_v17 }
0x1a0b   :  { %v12566_v22 = vpop.permute.xlu0 %12565  ;;  %vm5432_vm12 = vcmp.eq.f32.partialorder %v5420_v17, 0.0  ;;  %v5564_v23 = vpop.permute.xlu1 %5563 }
0x1a0c   :  { %12413 = vmatprep.subr.bf16.mxu0 %v12412_v0  ;;  %v12568_v13 = vunpack.i.h.bf16 %v12566_v22  ;;  %v12567_v27 = vunpack.i.l.bf16 %v12566_v22 }
0x1a0d   :  { %12415 = vmatpush3.bf16.msra.mxu0 %v12412_v0 }
0x1a0e   :  { %v12416_v41 = vpack.c.bf16 %v12568_v13, %v12567_v27 }
0x1a10   :  { %v12754_v43 = vpop.eup %12753  ;;  %12417 = vmatprep.subr.bf16.mxu0 %v12416_v41 }
0x1a11   :  { %v5422_v46 = vmul.f32 %v12754_v43, %v5419_v31  ;;  %12419 = vmatpush3.bf16.msra.mxu0 %v12416_v41 }
0x1a12   :  { %11952 = vmatprep.subr.mxu0 %v12921_v53 }
0x1a13   :  { %v5424_v47 = vsel %vm5423_vm9, %v5419_v31, %v5422_v46 }
0x1a14   :  { %v5427_v48 = vsel %vm5425_vm10, %v5426_v21, %v5424_v47  ;;  %v12756_v49 = vpop.eup %12755  ;;  %11940 = vmatmul.mubr.msk.f32.vlgmr.msra.gmra.mrb[52].mxu0 %vm60_vm0, %v14046_v14 }
0x1a15   :  { %v5435_v5 = vadd.f32 1e-06, %v5427_v48  ;;  %v5429_v15 = vmul.f32 %v12756_v49, %v5420_v17  ;;  %11954 = vmatprep.mubr.msk.f32.mxu0 %vm12922_vm5, %v12921_v53 }
0x1a17   :  { %12757 = vrcp.f32 %v5435_v5  ;;  %v5431_v52 = vsel %vm5430_vm11, %v5420_v17, %v5429_v15 }
0x1a18   :  { %v5434_v6 = vsel %vm5432_vm12, %v5433_v61, %v5431_v52 }
0x1a19   :  { %v5436_v55 = vadd.f32 1e-06, %v5434_v6 }
0x1a1b   :  { %12759 = vrcp.f32 %v5436_v55 }
0x1a21   :  { %v12758_v50 = vpop.eup %12757 }
0x1a22   :  { %v5445_v56 = vmul.f32 %v12758_v50, %v5443_v40 }
0x1a24   :  { %v5451_v63 = vadd.f32 %v5450_v30, %v5445_v56 }
0x1a25   :  { %v12760_v4 = vpop.eup %12759 }
0x1a26   :  { %11928 = vmatprep.mubr.msk.f32.mxu1 %vm60_vm0, %v5451_v63  ;;  %v5446_v34 = vmul.f32 %v12760_v4, %v5444_v3 }
0x1a28   :  { %v5452_v59 = vadd.f32 %v5450_v30, %v5446_v34 }
0x1a2a   :  { %11929 = vmatmul.mubr.msk.f32.vlgmr.msra.gmra.mrb[64].mxu1 %vm60_vm0, %v5452_v59 }
0x1a2b   :  { %11944 = vmatprep.mubr.msk.f32.mxu1 %vm12922_vm5, %v12921_v53 }
0x1ae7   :  { %v11941_v36 = vpop.f32.mrb[52].mxu0 }
0x1ae8   :  { %v5638_v58 = vpop.f32.mrb[53].mxu0  ;;  %v14072_v51 = vadd.f32 %v11941_v36, %v5564_v23 }
0x1ae9   :  { %v14064_v33 = vadd.f32 %v5638_v58, %v5564_v23 }
0x1aeb   :  { %5667 = vrot.lane.b32.xlu0 %v14064_v33, %s12924_s26  ;;  %5663 = vrot.lane.b32.xlu1 %v14064_v33, %s12923_s25 }
0x1aec   :  { %11943 = vmatpush3.xpose.msk.msra.mxu1 %vm222_vm6, %v14064_v33 }
0x1aed   :  { %11947 = vmatprep.subr.mxu1 %v12921_v53 }
0x1aef   :  { %5671 = vrot.lane.b32.xlu0 %v14064_v33, %s12925_s27  ;;  %5665 = vrot.lane.b32.xlu1 %v14072_v51, %s12923_s25 }
0x1af3   :  { %5669 = vrot.lane.b32.xlu1 %v14072_v51, %s12924_s26 }
0x1af7   :  { %5673 = vrot.lane.b32.xlu1 %v14072_v51, %s12925_s27 }
0x1afd   :  { %v11930_v60 = vpop.f32.mrb[64].mxu1 }
0x1afe   :  { %v5544_v9 = vadd.f32 %v11930_v60, %v14040_v35  ;;  %v5538_v24 = vpop.f32.mrb[65].mxu1 }
0x1aff   :  { %v5539_v25 = vadd.f32 %v14040_v35, %v5538_v24 }
0x1b00   :  { %5651 = vrot.lane.b32.xlu1 %v5544_v9, %s12923_s25 }
0x1b01   :  { %5649 = vrot.lane.b32.xlu0 %v5539_v25, %s12923_s25  ;;  %11945 = vmatmul.mubr.msk.f32.vlgmr.msra.gmra.mrb[66].mxu1 %vm222_vm6, %v5539_v25 }
0x1b02   :  { %11948 = vmatpush3.xpose.msk.msra.mxu1 %vm222_vm6, %v14072_v51  ;;  %11949 = vmatprep.mubr.msk.f32.mxu1 %vm12922_vm5, %v12921_v53 }
0x1b03   :  { %11957 = vmatprep.subr.mxu1 %v12921_v53 }
0x1b04   :  { %5655 = vrot.lane.b32.xlu1 %v5544_v9, %s12924_s26 }
0x1b05   :  { %5653 = vrot.lane.b32.xlu0 %v5539_v25, %s12924_s26  ;;  %11950 = vmatmul.mubr.msk.f32.vlgmr.msra.gmra.mrb[68].mxu1 %vm222_vm6, %v5544_v9 }
0x1b06   :  { %11959 = vmatprep.mubr.msk.f32.mxu1 %vm12922_vm5, %v12921_v53 }
0x1b08   :  { %5659 = vrot.lane.b32.xlu1 %v5544_v9, %s12925_s27 }
0x1b09   :  { %5657 = vrot.lane.b32.xlu0 %v5539_v25, %s12925_s27 }
0x1b5d   :  { %v14100_v38 = vpop.permute.xlu1 %5663  ;;  %v14112_v44 = vpop.permute.xlu0 %5667 }
0x1b5e   :  { %11953 = vmatpush3.xpose.msk.msra.mxu0 %vm222_vm6, %v14100_v38 }
0x1b5f   :  { %11962 = vmatprep.subr.mxu0 %v12921_v53 }
0x1b61   :  { %v14105_v45 = vpop.permute.xlu1 %5665  ;;  %v14116_v31 = vpop.permute.xlu0 %5671 }
0x1b62   :  { %11958 = vmatpush3.xpose.msk.msra.mxu1 %vm222_vm6, %v14105_v45 }
0x1b63   :  { %11967 = vmatprep.subr.mxu1 %v12921_v53 }
0x1b65   :  { %v14110_v19 = vpop.permute.xlu1 %5669 }
0x1b69   :  { %v14114_v18 = vpop.permute.xlu1 %5673 }
0x1b72   :  { %v5652_v10 = vpop.permute.xlu1 %5651 }
0x1b73   :  { %v5650_v62 = vpop.permute.xlu0 %5649  ;;  %11960 = vmatmul.mubr.msk.f32.vlgmr.msra.gmra.mrb[70].mxu1 %vm222_vm6, %v5652_v10 }
0x1b74   :  { %11968 = vmatpush3.xpose.msk.msra.mxu1 %vm222_vm6, %v14110_v19  ;;  %11955 = vmatmul.mubr.msk.f32.vlgmr.msra.gmra.mrb[54].mxu0 %vm222_vm6, %v5650_v62 }
0x1b75   :  { %11963 = vmatpush3.xpose.msk.msra.mxu0 %vm222_vm6, %v14112_v44  ;;  %11969 = vmatprep.mubr.msk.f32.mxu1 %vm12922_vm5, %v12921_v53 }
0x1b76   :  { %v5656_v54 = vpop.permute.xlu1 %5655  ;;  %11977 = vmatprep.subr.mxu1 %v12921_v53  ;;  %11964 = vmatprep.mubr.msk.f32.mxu0 %vm12922_vm5, %v12921_v53 }
0x1b77   :  { %v5654_v11 = vpop.permute.xlu0 %5653  ;;  %11970 = vmatmul.mubr.msk.f32.vlgmr.msra.gmra.mrb[72].mxu1 %vm222_vm6, %v5656_v54  ;;  %11972 = vmatprep.subr.mxu0 %v12921_v53 }
0x1b78   :  { %11978 = vmatpush3.xpose.msk.msra.mxu1 %vm222_vm6, %v14114_v18  ;;  %11965 = vmatmul.mubr.msk.f32.vlgmr.msra.gmra.mrb[56].mxu0 %vm222_vm6, %v5654_v11 }
0x1b79   :  { %11973 = vmatpush3.xpose.msk.msra.mxu0 %vm222_vm6, %v14116_v31  ;;  %11979 = vmatprep.mubr.msk.f32.mxu1 %vm12922_vm5, %v12921_v53 }
0x1b7a   :  { %v5660_v17 = vpop.permute.xlu1 %5659  ;;  %11974 = vmatprep.mubr.msk.f32.mxu0 %vm12922_vm5, %v12921_v53  ;;  %11987 = vmatprep.subr.mxu1 %v12921_v53 }
0x1b7b   :  { %v5658_v0 = vpop.permute.xlu0 %5657  ;;  %11980 = vmatmul.mubr.msk.f32.vlgmr.msra.gmra.mrb[74].mxu1 %vm222_vm6, %v5660_v17  ;;  %11982 = vmatprep.subr.mxu0 %v12921_v53 }
0x1b7c   :  { %11975 = vmatmul.mubr.msk.f32.vlgmr.msra.gmra.mrb[58].mxu0 %vm222_vm6, %v5658_v0  ;;  %11989 = vmatprep.mubr.msk.f32.mxu1 %vm12922_vm5, %v12921_v53 }
0x1b7d   :  { %11984 = vmatprep.mubr.msk.f32.mxu0 %vm12922_vm5, %v12921_v53 }
0x1bd4   :  { %v5745_v1 = vpop.f32.mrb[66].mxu1 }
0x1bd5   :  { %v5746_v22 = vadd.f32 %v5745_v1, %v13151_v20  ;;  %v11946_v13 = vpop.f32.mrb[67].mxu1 }
0x1bd7   :  { %v6267_v27 = vsel %vm222_vm6, %v5746_v22, -inf }
0x1bd8   :  { %6268 = vmax.xlane.f32.xlu0 %v6267_v27  ;;  %v5819_v41 = vpop.f32.mrb[68].mxu1 }
0x1bd9   :  { %v5820_v57 = vadd.f32 %v5819_v41, %v13156_v26  ;;  %v11951_v43 = vpop.f32.mrb[69].mxu1 }
0x1bdb   :  { %v6270_v46 = vsel %vm222_vm6, %v5820_v57, -inf }
0x1bdc   :  { %6271 = vmax.xlane.f32.xlu1 %v6270_v46 }
0x1c46   :  { %v5967_v21 = vpop.f32.mrb[70].mxu1 }
0x1c47   :  { %v5968_v47 = vadd.f32 %v5967_v21, %v13156_v26  ;;  %v5893_v48 = vpop.f32.mrb[54].mxu0  ;;  %v11961_v49 = vpop.f32.mrb[71].mxu1 }
0x1c48   :  { %v11956_v5 = vpop.f32.mrb[55].mxu0  ;;  %v5894_v15 = vadd.f32 %v5893_v48, %v13151_v20 }
0x1c49   :  { %v6276_v61 = vsel %vm222_vm6, %v5968_v47, -inf }
0x1c4a   :  { %6277 = vmax.xlane.f32.xlu0 %v6276_v61  ;;  %v6115_v52 = vpop.f32.mrb[72].mxu1  ;;  %v6273_v30 = vsel %vm222_vm6, %v5894_v15, -inf }
0x1c4b   :  { %v6116_v2 = vadd.f32 %v6115_v52, %v13156_v26  ;;  %v6041_v6 = vpop.f32.mrb[56].mxu0  ;;  %v11971_v55 = vpop.f32.mrb[73].mxu1 }
0x1c4c   :  { %v11966_v29 = vpop.f32.mrb[57].mxu0  ;;  %v6042_v40 = vadd.f32 %v6041_v6, %v13151_v20 }
0x1c4d   :  { %v6282_v50 = vsel %vm222_vm6, %v6116_v2, -inf }
0x1c4e   :  { %6274 = vmax.xlane.f32.xlu0 %v6273_v30  ;;  %6283 = vmax.xlane.f32.xlu1 %v6282_v50  ;;  %v6263_v56 = vpop.f32.mrb[74].mxu1  ;;  %v6279_v23 = vsel %vm222_vm6, %v6042_v40, -inf }
0x1c4f   :  { %v6264_v63 = vadd.f32 %v6263_v56, %v13156_v26  ;;  %v6189_v3 = vpop.f32.mrb[58].mxu0  ;;  %v11981_v4 = vpop.f32.mrb[75].mxu1 }
0x1c50   :  { %v11976_v34 = vpop.f32.mrb[59].mxu0  ;;  %v6190_v59 = vadd.f32 %v6189_v3, %v13151_v20 }
0x1c51   :  { %v6288_v36 = vsel %vm222_vm6, %v6264_v63, -inf }
0x1c52   :  { %6280 = vmax.xlane.f32.xlu0 %v6279_v23  ;;  %6289 = vmax.xlane.f32.xlu1 %v6288_v36  ;;  %v6285_v58 = vsel %vm222_vm6, %v6190_v59, -inf }
0x1c56   :  { %6286 = vmax.xlane.f32.xlu0 %v6285_v58 }
0x1c63   :  { %6431 = vrot.lane.b32.xlu1 %v14072_v51, %s12926_s28 }
0x1c65   :  { %v6269_v60 = vpop.xlane.xlu0 %6268 }
0x1c66   :  { %v6291_v9 = vsub.f32 %v5746_v22, %v6269_v60 }
0x1c67   :  { %6507 = vrot.lane.b32.xlu1 %v14100_v38, %s12926_s28 }
0x1c68   :  { %v6299_v25 = vmul.f32 1.442695, %v6291_v9 }
0x1c69   :  { %v6272_v24 = vpop.xlane.xlu1 %6271 }
0x1c6a   :  { %v6292_v51 = vsub.f32 %v5820_v57, %v6272_v24  ;;  %12761 = vpow2.f32 %v6299_v25 }
0x1c6b   :  { %6583 = vrot.lane.b32.xlu1 %v14105_v45, %s12926_s28 }
0x1c6c   :  { %6355 = vrot.lane.b32.xlu0 %v14064_v33, %s12926_s28  ;;  %v6301_v10 = vmul.f32 1.442695, %v6292_v51 }
0x1c6e   :  { %12763 = vpow2.f32 %v6301_v10 }
0x1c6f   :  { %6735 = vrot.lane.b32.xlu1 %v14110_v19, %s12926_s28 }
0x1c70   :  { %6659 = vrot.lane.b32.xlu0 %v14112_v44, %s12926_s28 }
0x1c74   :  { %v14176_v38 = vpop.eup %12761 }
0x1c75   :  { %v6315_v45 = vsel %vm222_vm6, %v14176_v38, 0.0 }
0x1c78   :  { %v14180_v33 = vpop.eup %12763 }
0x1c79   :  { %v6318_v19 = vsel %vm222_vm6, %v14180_v33, 0.0 }
0x1c8f   :  { %6316 = vadd.xlane.f32.xlu0 %v6315_v45 }
0x1c93   :  { %6319 = vadd.xlane.f32.xlu1 %v6318_v19 }
0x1cd7   :  { %v6278_v44 = vpop.xlane.xlu0 %6277 }
0x1cd8   :  { %v6294_v62 = vsub.f32 %v5968_v47, %v6278_v44 }
0x1cda   :  { %v6305_v54 = vmul.f32 1.442695, %v6294_v62 }
0x1cdb   :  { %v6275_v11 = vpop.xlane.xlu0 %6274  ;;  %v6284_v17 = vpop.xlane.xlu1 %6283 }
0x1cdc   :  { %12765 = vpow2.f32 %v6305_v54  ;;  %v6293_v0 = vsub.f32 %v5894_v15, %v6275_v11  ;;  %v6296_v1 = vsub.f32 %v6116_v2, %v6284_v17 }
0x1cde   :  { %v6303_v22 = vmul.f32 1.442695, %v6293_v0  ;;  %v6309_v13 = vmul.f32 1.442695, %v6296_v1 }
0x1cdf   :  { %v6281_v27 = vpop.xlane.xlu0 %6280  ;;  %v6290_v41 = vpop.xlane.xlu1 %6289 }
0x1ce0   :  { %12767 = vpow2.f32 %v6303_v22  ;;  %v6295_v57 = vsub.f32 %v6042_v40, %v6281_v27  ;;  %v6298_v43 = vsub.f32 %v6264_v63, %v6290_v41 }
0x1ce1   :  { %12769 = vpow2.f32 %v6309_v13 }
0x1ce2   :  { %v6307_v46 = vmul.f32 1.442695, %v6295_v57  ;;  %v6313_v21 = vmul.f32 1.442695, %v6298_v43 }
0x1ce3   :  { %v6287_v48 = vpop.xlane.xlu0 %6286  ;;  %v6432_v49 = vpop.permute.xlu1 %6431 }
0x1ce4   :  { %12771 = vpow2.f32 %v6307_v46  ;;  %v6297_v47 = vsub.f32 %v6190_v59, %v6287_v48  ;;  %11988 = vmatpush3.msra.mxu1 %v6432_v49 }
0x1ce5   :  { %12773 = vpow2.f32 %v6313_v21  ;;  %11997 = vmatprep.subr.mxu1 %v12921_v53 }
0x1ce6   :  { %v12766_v5 = vpop.eup %12765  ;;  %v6311_v15 = vmul.f32 1.442695, %v6297_v47 }
0x1ce7   :  { %v6356_v61 = vpop.permute.xlu0 %6355  ;;  %v6324_v52 = vsel %vm222_vm6, %v12766_v5, 0.0  ;;  %v6508_v4 = vpop.permute.xlu1 %6507 }
0x1ce8   :  { %12775 = vpow2.f32 %v6311_v15  ;;  %11983 = vmatpush3.msra.mxu0 %v6356_v61  ;;  %6325 = vadd.xlane.f32.xlu1 %v6324_v52 }
0x1ce9   :  { %11992 = vmatprep.subr.mxu0 %v12921_v53 }
0x1cea   :  { %v12768_v2 = vpop.eup %12767 }
0x1ceb   :  { %v12770_v6 = vpop.eup %12769  ;;  %v6321_v55 = vsel %vm222_vm6, %v12768_v2, 0.0  ;;  %v6584_v34 = vpop.permute.xlu1 %6583 }
0x1cec   :  { %6322 = vadd.xlane.f32.xlu0 %v6321_v55  ;;  %v6330_v29 = vsel %vm222_vm6, %v12770_v6, 0.0  ;;  %v6660_v59 = vpop.permute.xlu0 %6659 }
0x1ced   :  { %6331 = vadd.xlane.f32.xlu1 %v6330_v29 }
0x1cee   :  { %v14189_v40 = vpop.eup %12771 }
0x1cef   :  { %v14191_v30 = vpop.eup %12773  ;;  %v6327_v50 = vsel %vm222_vm6, %v14189_v40, 0.0  ;;  %v6736_v23 = vpop.permute.xlu1 %6735 }
0x1cf0   :  { %6328 = vadd.xlane.f32.xlu0 %v6327_v50  ;;  %v6336_v56 = vsel %vm222_vm6, %v14191_v30, 0.0 }
0x1cf1   :  { %6337 = vadd.xlane.f32.xlu1 %v6336_v56 }
0x1cf2   :  { %v14197_v63 = vpop.eup %12775 }
0x1cf3   :  { %v6333_v3 = vsel %vm222_vm6, %v14197_v63, 0.0 }
0x1cf4   :  { %6334 = vadd.xlane.f32.xlu0 %v6333_v3 }
0x1d02   :  { %6887 = vrot.lane.b32.xlu1 %v14114_v18, %s12926_s28 }
0x1d06   :  { %12575 = vrot.lane.b32.xlu1 %v14032_v28, %s12928_s12 }
0x1d0a   :  { %6811 = vrot.lane.b32.xlu0 %v14116_v31, %s12926_s28 }
0x1d0e   :  { %12570 = vrot.lane.b32.xlu0 %v14022_v12, %s12928_s12 }
0x1d1c   :  { %v6317_v36 = vpop.xlane.xlu0 %6316 }
0x1d1d   :  { %12777 = vrcp.f32 %v6317_v36 }
0x1d20   :  { %v6320_v58 = vpop.xlane.xlu1 %6319 }
0x1d21   :  { %12779 = vrcp.f32 %v6320_v58 }
0x1d27   :  { %v12778_v60 = vpop.eup %12777 }
0x1d28   :  { %v6347_v9 = vmul.f32 %v12778_v60, %v14176_v38 }
0x1d2a   :  { %11985 = vmatmul.mubr.msk.f32.vlgmr.msra.gmra.mrb[60].mxu0 %vm222_vm6, %v6347_v9 }
0x1d2b   :  { %v12780_v24 = vpop.eup %12779  ;;  %11993 = vmatpush3.msra.mxu0 %v6508_v4  ;;  %11994 = vmatprep.mubr.msk.f32.mxu0 %vm12922_vm5, %v12921_v53 }
0x1d2c   :  { %v6348_v18 = vmul.f32 %v12780_v24, %v14180_v33  ;;  %12002 = vmatprep.subr.mxu0 %v12921_v53 }
0x1d2e   :  { %11990 = vmatmul.mubr.msk.f32.vlgmr.msra.gmra.mrb[76].mxu1 %vm222_vm6, %v6348_v18 }
0x1d2f   :  { %11998 = vmatpush3.msra.mxu1 %v6584_v34  ;;  %11999 = vmatprep.mubr.msk.f32.mxu1 %vm12922_vm5, %v12921_v53 }
0x1d30   :  { %12007 = vmatprep.subr.mxu1 %v12921_v53 }
0x1d75   :  { %v6326_v31 = vpop.xlane.xlu1 %6325 }
0x1d76   :  { %12781 = vrcp.f32 %v6326_v31 }
0x1d79   :  { %v6323_v25 = vpop.xlane.xlu0 %6322 }
0x1d7a   :  { %12783 = vrcp.f32 %v6323_v25  ;;  %v6332_v51 = vpop.xlane.xlu1 %6331 }
0x1d7b   :  { %12785 = vrcp.f32 %v6332_v51 }
0x1d7d   :  { %v6329_v10 = vpop.xlane.xlu0 %6328 }
0x1d7e   :  { %12787 = vrcp.f32 %v6329_v10  ;;  %v6338_v38 = vpop.xlane.xlu1 %6337 }
0x1d7f   :  { %12789 = vrcp.f32 %v6338_v38 }
0x1d80   :  { %v12782_v45 = vpop.eup %12781 }
0x1d81   :  { %v6335_v33 = vpop.xlane.xlu0 %6334  ;;  %v6350_v19 = vmul.f32 %v12782_v45, %v12766_v5 }
0x1d82   :  { %12791 = vrcp.f32 %v6335_v33  ;;  %v6888_v0 = vpop.permute.xlu1 %6887 }
0x1d83   :  { %12000 = vmatmul.mubr.msk.f32.vlgmr.msra.gmra.mrb[78].mxu1 %vm222_vm6, %v6350_v19 }
0x1d84   :  { %v12784_v44 = vpop.eup %12783  ;;  %12008 = vmatpush3.msra.mxu1 %v6736_v23  ;;  %12009 = vmatprep.mubr.msk.f32.mxu1 %vm12922_vm5, %v12921_v53 }
0x1d85   :  { %v12786_v62 = vpop.eup %12785  ;;  %12017 = vmatprep.subr.mxu1 %v12921_v53  ;;  %v6349_v54 = vmul.f32 %v12784_v44, %v12768_v2  ;;  %v6812_v28 = vpop.permute.xlu0 %6811 }
0x1d86   :  { %v6352_v11 = vmul.f32 %v12786_v62, %v12770_v6  ;;  %v12576_v47 = vpop.permute.xlu1 %12575 }
0x1d87   :  { %11995 = vmatmul.mubr.msk.f32.vlgmr.msra.gmra.mrb[62].mxu0 %vm222_vm6, %v6349_v54  ;;  %v12578_v5 = vunpack.i.h.bf16 %v12576_v47  ;;  %v12577_v15 = vunpack.i.l.bf16 %v12576_v47  ;;  %v11113_v47 = vld [vmem:[%s14935_s6 + $0x88] sm:$0xff] }
0x1d88   :  { %v12788_v17 = vpop.eup %12787  ;;  %12003 = vmatpush3.msra.mxu0 %v6660_v59  ;;  %12010 = vmatmul.mubr.msk.f32.vlgmr.msra.gmra.mrb[80].mxu1 %vm222_vm6, %v6352_v11 }
0x1d89   :  { %v12790_v1 = vpop.eup %12789  ;;  %12018 = vmatpush3.msra.mxu1 %v6888_v0  ;;  %12004 = vmatprep.mubr.msk.f32.mxu0 %vm12922_vm5, %v12921_v53  ;;  %v6351_v22 = vmul.f32 %v12788_v17, %v14189_v40  ;;  %v12571_v21 = vpop.permute.xlu0 %12570  ;;  %v12424_v52 = vpack.c.bf16 %v12578_v5, %v12577_v15  ;;  %v11114_v5 = vld [vmem:[%s14935_s6 + $0x90] sm:$0xff] }
0x1d8a   :  { %12012 = vmatprep.subr.mxu0 %v12921_v53  ;;  %12019 = vmatprep.mubr.msk.f32.mxu1 %vm12922_vm5, %v12921_v53  ;;  %v6354_v12 = vmul.f32 %v12790_v1, %v14191_v30  ;;  %v12573_v48 = vunpack.i.h.bf16 %v12571_v21  ;;  %v12572_v49 = vunpack.i.l.bf16 %v12571_v21  ;;  %v11108_v21 = vld [vmem:[%s14934_s5 + $0x58] sm:$0xff] }
0x1d8b   :  { %12005 = vmatmul.mubr.msk.f32.vlgmr.msra.gmra.mrb[64].mxu0 %vm222_vm6, %v6351_v22 }
0x1d8c   :  { %v12792_v13 = vpop.eup %12791  ;;  %12013 = vmatpush3.msra.mxu0 %v6812_v28  ;;  %12020 = vmatmul.mubr.msk.f32.vlgmr.msra.gmra.mrb[82].mxu1 %vm222_vm6, %v6354_v12  ;;  %v12420_v61 = vpack.c.bf16 %v12573_v48, %v12572_v49  ;;  %v11112_v49 = vld [vmem:[%s14935_s6 + $0x80] sm:$0xff] }
0x1d8d   :  { %12014 = vmatprep.mubr.msk.f32.mxu0 %vm12922_vm5, %v12921_v53  ;;  %v6353_v27 = vmul.f32 %v12792_v13, %v14197_v63  ;;  %v12436_v15 = vpack.c.bf16 %v11113_v47, %v11112_v49 }
0x1d8e   :  { %12421 = vmatprep.subr.bf16.mxu0 %v12420_v61 }
0x1d8f   :  { %12015 = vmatmul.mubr.msk.f32.vlgmr.msra.gmra.mrb[66].mxu0 %vm222_vm6, %v6353_v27 }
0x1d90   :  { %12423 = vmatpush3.bf16.msra.mxu0 %v12420_v61  ;;  %v11115_v61 = vld [vmem:[%s14935_s6 + $0x98] sm:$0xff] }
0x1d91   :  { %12425 = vmatprep.subr.bf16.mxu0 %v12424_v52 }
0x1d94   :  { %12427 = vmatpush3.bf16.msra.mxu0 %v12424_v52  ;;  %v12440_v52 = vpack.c.bf16 %v11115_v61, %v11114_v5 }
0x1d95   :  { %12437 = vmatprep.subr.bf16.mxu0 %v12436_v15 }
0x1dfd   :  { %v6427_v41 = vpop.f32.mrb[60].mxu0 }
0x1dfe   :  { %v11986_v57 = vpop.f32.mrb[61].mxu0 }
0x1dff   :  { %v11106_v57 = vld [vmem:[%s14934_s5 + $0x48] sm:$0xff] }
0x1e01   :  { %v6503_v43 = vpop.f32.mrb[76].mxu1 }
0x1e02   :  { %v11991_v46 = vpop.f32.mrb[77].mxu1 }
0x1e56   :  { %v6655_v2 = vpop.f32.mrb[78].mxu1 }
0x1e57   :  { %6967 = vrot.lane.b32.xlu1 %v6655_v2, %s12929_s13  ;;  %v12001_v6 = vpop.f32.mrb[79].mxu1  ;;  %v11116_v2 = vld [vmem:[%s14935_s6 + $0xa0] sm:$0xff] }
0x1e58   :  { %v11117_v6 = vld [vmem:[%s14935_s6 + $0xa8] sm:$0xff] }
0x1e5a   :  { %v6579_v55 = vpop.f32.mrb[62].mxu0 }
0x1e5b   :  { %v6807_v29 = vpop.f32.mrb[80].mxu1  ;;  %6965 = vrot.lane.b32.xlu0 %v6579_v55, %s12929_s13  ;;  %v11996_v40 = vpop.f32.mrb[63].mxu0  ;;  %v12444_v55 = vpack.c.bf16 %v11117_v6, %v11116_v2 }
0x1e5c   :  { %6975 = vrot.lane.b32.xlu1 %v6807_v29, %s12930_s14  ;;  %v12011_v30 = vpop.f32.mrb[81].mxu1 }
0x1e5e   :  { %v6731_v50 = vpop.f32.mrb[64].mxu0 }
0x1e5f   :  { %v6959_v56 = vpop.f32.mrb[82].mxu1  ;;  %6973 = vrot.lane.b32.xlu0 %v6731_v50, %s12930_s14  ;;  %v12006_v63 = vpop.f32.mrb[65].mxu0 }
0x1e60   :  { %6983 = vrot.lane.b32.xlu1 %v6959_v56, %s12931_s15  ;;  %v12021_v3 = vpop.f32.mrb[83].mxu1 }
0x1e62   :  { %v6883_v4 = vpop.f32.mrb[66].mxu0 }
0x1e63   :  { %6981 = vrot.lane.b32.xlu0 %v6883_v4, %s12931_s15  ;;  %v12016_v34 = vpop.f32.mrb[67].mxu0 }
0x1e67   :  { %7005 = vrot.lane.b32.xlu0 %v14040_v35, %s12928_s12 }
0x1ec9   :  { %v6968_v59 = vpop.permute.xlu1 %6967 }
0x1eca   :  { %v6988_v24 = vsel %vm222_vm6, %v6503_v43, %v6968_v59  ;;  %v11107_v43 = vld [vmem:[%s14934_s5 + $0x50] sm:$0xff] }
0x1ecb   :  { %v12432_v48 = vpack.c.bf16 %v11108_v21, %v11107_v43 }
0x1ecd   :  { %v6966_v23 = vpop.permute.xlu0 %6965 }
0x1ece   :  { %v6976_v36 = vpop.permute.xlu1 %6975  ;;  %v6987_v60 = vsel %vm222_vm6, %v6427_v41, %v6966_v23  ;;  %v11105_v41 = vld [vmem:[%s14934_s5 + $0x40] sm:$0xff] }
0x1ecf   :  { %v6990_v25 = vsel %vm1551_vm7, %v6988_v24, %v6976_v36  ;;  %v12428_v46 = vpack.c.bf16 %v11106_v57, %v11105_v41  ;;  %v11103_v24 = vld [vmem:[%s14937_s8 + $0xe] sm:$0x3] }
0x1ed1   :  { %v6974_v58 = vpop.permute.xlu0 %6973  ;;  %12429 = vmatprep.subr.bf16.mxu1 %v12428_v46 }
0x1ed2   :  { %v6984_v9 = vpop.permute.xlu1 %6983  ;;  %v6989_v18 = vsel %vm1551_vm7, %v6987_v60, %v6974_v58  ;;  %12431 = vmatpush3.bf16.msra.mxu1 %v12428_v46 }
0x1ed3   :  { %v6992_v10 = vsel %vm1554_vm8, %v6990_v25, %v6984_v9  ;;  %12433 = vmatprep.subr.bf16.mxu1 %v12432_v48 }
0x1ed5   :  { %v6982_v31 = vpop.permute.xlu0 %6981 }
0x1ed6   :  { %v6991_v51 = vsel %vm1554_vm8, %v6989_v18, %v6982_v31  ;;  %12435 = vmatpush3.bf16.msra.mxu1 %v12432_v48  ;;  %v7134_v31 = vrot.slane %v11103_v24, %v13028_v37 }
0x1ed7   :  { %12030 = vmatprep.mubr.msk.f32.mxu0 %vm60_vm0, %v6991_v51  ;;  %v7142_v51 = vrot.slane %v11103_v24, %v13034_v42 }
0x1ed8   :  { %12031 = vmatmul.mubr.msk.f32.vlgmr.msra.gmra.mrb[68].mxu0 %vm60_vm0, %v6992_v10 }
0x1ed9   :  { %v7006_v35 = vpop.permute.xlu0 %7005  ;;  %12439 = vmatpush3.bf16.msra.mxu0 %v12436_v15 }
0x1eda   :  { %12441 = vmatprep.subr.bf16.mxu0 %v12440_v52 }
0x1edd   :  { %12443 = vmatpush3.bf16.msra.mxu0 %v12440_v52 }
0x1ede   :  { %12445 = vmatprep.subr.bf16.mxu0 %v12444_v55 }
0x1ee1   :  { %12447 = vmatpush3.bf16.msra.mxu0 %v12444_v55 }
0x1fab   :  { %v12032_v38 = vpop.f32.mrb[68].mxu0 }
0x1fac   :  { %v7086_v45 = vadd.f32 %v12032_v38, %v7006_v35  ;;  %v7080_v33 = vpop.f32.mrb[69].mxu0 }
0x1fad   :  { %v7081_v19 = vadd.f32 %v7080_v33, %v7006_v35 }
0x1fae   :  { %v14255_v44 = vadd.f32 %v7086_v45, %v13989_v16 }
0x1faf   :  { %v14258_v62 = vadd.f32 %v7081_v19, %v13986_v39 }
0x1fb0   :  { %v7096_v54 = vsel %vm60_vm0, %v14255_v44, 0.0 }
0x1fb1   :  { %7097 = vadd.xlane.f32.xlu0 %v7096_v54  ;;  %v7093_v11 = vsel %vm60_vm0, %v14258_v62, 0.0 }
0x1fb2   :  { %7094 = vadd.xlane.f32.xlu1 %v7093_v11  ;;  %v11109_v11 = vld [vmem:[%s14936_s7 + $0x2] ss:$0 sm:$0xff] }
0x1fc3   :  { %7250 = vrot.lane.b32.xlu1 %v11109_v11, %s12927_s1 }
0x203e   :  { %v7098_v17 = vpop.xlane.xlu0 %7097 }
0x203f   :  { %v7100_v0 = vmul.f32 0.03125, %v7098_v17  ;;  %v7095_v1 = vpop.xlane.xlu1 %7094  ;;  %v11118_v17 = vld [vmem:[%s14935_s6 + $0xb0] sm:$0xff] }
0x2040   :  { %v7099_v22 = vmul.f32 0.03125, %v7095_v1 }
0x2041   :  { %v14265_v12 = vsub.f32 %v14255_v44, %v7100_v0  ;;  %v11119_v0 = vld [vmem:[%s14935_s6 + $0xb8] sm:$0xff] }
0x2042   :  { %v7101_v16 = vsub.f32 %v14258_v62, %v7099_v22  ;;  %v12448_v1 = vpack.c.bf16 %v11119_v0, %v11118_v17 }
0x2043   :  { %v7104_v13 = vmul.f32 %v14265_v12, %v14265_v12  ;;  %v7136_v38 = vmul.f32 %v7134_v31, %v14265_v12 }
0x2044   :  { %v7103_v28 = vmul.f32 %v7101_v16, %v7101_v16  ;;  %v7135_v25 = vmul.f32 %v7134_v31, %v7101_v16  ;;  %12449 = vmatprep.subr.bf16.mxu0 %v12448_v1 }
0x2045   :  { %v7108_v27 = vsel %vm60_vm0, %v7104_v13, 0.0  ;;  %12451 = vmatpush3.bf16.msra.mxu0 %v12448_v1 }
0x2046   :  { %v7105_v39 = vsel %vm60_vm0, %v7103_v28, 0.0  ;;  %12084 = vmatprep.subr.mxu0 %v12921_v53 }
0x2047   :  { %7106 = vadd.xlane.f32.xlu0 %v7105_v39 }
0x204b   :  { %7109 = vadd.xlane.f32.xlu0 %v7108_v27  ;;  %v7251_v27 = vpop.permute.xlu1 %7250 }
0x20d4   :  { %v7107_v29 = vpop.xlane.xlu0 %7106 }
0x20d5   :  { %v7111_v40 = vmul.f32 0.032258064, %v7107_v29 }
0x20d7   :  { %12793 = vrsqrt.f32 %v7111_v40  ;;  %vm7115_vm14 = vcmp.eq.f32.partialorder %v7111_v40, inf  ;;  %v7118_v3 = vand.u32 2147483648, %v7111_v40  ;;  %vm7117_vm15 = vcmp.eq.f32.partialorder %v7111_v40, 0.0 }
0x20d8   :  { %v7110_v30 = vpop.xlane.xlu0 %7109 }
0x20d9   :  { %v7112_v50 = vmul.f32 0.032258064, %v7110_v30  ;;  %v14347_v30 = vld [vmem:[%s14932_s3 + $0x68] sm:$0xff] }
0x20db   :  { %12795 = vrsqrt.f32 %v7112_v50  ;;  %vm7122_vm1 = vcmp.eq.f32.partialorder %v7112_v50, inf  ;;  %v7125_v58 = vand.u32 2147483648, %v7112_v50  ;;  %vm7124_vm2 = vcmp.eq.f32.partialorder %v7112_v50, 0.0 }
0x20e1   :  { %v12794_v56 = vpop.eup %12793 }
0x20e2   :  { %v7114_v63 = vmul.f32 %v12794_v56, %v7111_v40 }
0x20e4   :  { %v7116_v4 = vsel %vm7115_vm14, %v7111_v40, %v7114_v63  ;;  %v14342_v40 = vld [vmem:[%s14932_s3 + $0x60] sm:$0xff] }
0x20e5   :  { %v12796_v34 = vpop.eup %12795  ;;  %v7119_v59 = vsel %vm7117_vm15, %v7118_v3, %v7116_v4  ;;  %v12579_v56 = vpack.i.bf16 %v14347_v30, %v14342_v40  ;;  %v12452_v63 = vpack.c.bf16 %v14347_v30, %v14342_v40  ;;  %v14361_v3 = vld [vmem:[%s14932_s3 + $0x78] sm:$0xff] }
0x20e6   :  { %v7121_v23 = vmul.f32 %v12796_v34, %v7112_v50  ;;  %v7127_v36 = vadd.f32 1e-06, %v7119_v59 }
0x20e7   :  { %12453 = vmatprep.subr.bf16.mxu1 %v12452_v63 }
0x20e8   :  { %v7123_v60 = vsel %vm7122_vm1, %v7112_v50, %v7121_v23  ;;  %12797 = vrcp.f32 %v7127_v36  ;;  %v14352_v50 = vld [vmem:[%s14932_s3 + $0x70] sm:$0xff] }
0x20e9   :  { %v7126_v9 = vsel %vm7124_vm2, %v7125_v58, %v7123_v60  ;;  %v12584_v4 = vpack.i.bf16 %v14361_v3, %v14352_v50  ;;  %v12456_v34 = vpack.c.bf16 %v14361_v3, %v14352_v50 }
0x20ea   :  { %v7128_v18 = vadd.f32 1e-06, %v7126_v9 }
0x20ec   :  { %12799 = vrcp.f32 %v7128_v18 }
0x20f2   :  { %v12798_v10 = vpop.eup %12797 }
0x20f3   :  { %v7137_v35 = vmul.f32 %v12798_v10, %v7135_v25 }
0x20f5   :  { %v7143_v45 = vadd.f32 %v7142_v51, %v7137_v35 }
0x20f6   :  { %v12800_v33 = vpop.eup %12799 }
0x20f7   :  { %v7138_v19 = vmul.f32 %v12800_v33, %v7136_v38  ;;  %12041 = vmatprep.mubr.msk.f32.mxu1 %vm60_vm0, %v7143_v45  ;;  %v11122_v33 = vld [vmem:[%s14937_s8 + $0x10] sm:$0x3] }
0x20f8   :  { %v7387_v17 = vrot.slane %v11122_v33, %v13034_v42 }
0x20f9   :  { %v7144_v54 = vadd.f32 %v7142_v51, %v7138_v19 }
0x20fb   :  { %12042 = vmatmul.mubr.msk.f32.vlgmr.msra.gmra.mrb[84].mxu1 %vm60_vm0, %v7144_v54  ;;  %v7379_v54 = vrot.slane %v11122_v33, %v13028_v37 }
0x20fc   :  { %12455 = vmatpush3.bf16.msra.mxu1 %v12452_v63 }
0x20fd   :  { %12457 = vmatprep.subr.bf16.mxu1 %v12456_v34 }
0x2100   :  { %12459 = vmatpush3.bf16.msra.mxu1 %v12456_v34 }
0x2101   :  { %12074 = vmatprep.subr.mxu1 %v12921_v53 }
0x21ce   :  { %v12043_v22 = vpop.f32.mrb[84].mxu1 }
0x21cf   :  { %v7236_v12 = vadd.f32 %v12043_v22, %v11109_v11  ;;  %v7230_v16 = vpop.f32.mrb[85].mxu1 }
0x21d0   :  { %v7231_v28 = vadd.f32 %v11109_v11, %v7230_v16 }
0x21d1   :  { %v7240_v13 = vmax.f32 %v7236_v12, 0.0 }
0x21d2   :  { %v7239_v39 = vmax.f32 %v7231_v28, 0.0 }
0x21d4   :  { %12060 = vmatprep.mubr.msk.f32.mxu0 %vm1818_vm13, %v7239_v39 }
0x21d5   :  { %12061 = vmatmul.mubr.msk.f32.vlgmr.msra.gmra.mrb[70].mxu0 %vm1818_vm13, %v7240_v13  ;;  %v14380_v13 = vld [vmem:[%s14933_s4 + $0x3] ss:$0 sm:$0xff] }
0x21d6   :  { %12086 = vmatprep.mubr.msk.f32.mxu0 %vm12922_vm5, %v12921_v53 }
0x22a8   :  { %v12062_v41 = vpop.f32.mrb[70].mxu0 }
0x22a9   :  { %v7325_v57 = vpop.f32.mrb[71].mxu0  ;;  %v7331_v43 = vadd.f32 %v12062_v41, %v7251_v27 }
0x22aa   :  { %v7326_v46 = vadd.f32 %v7325_v57, %v7251_v27 }
0x22ab   :  { %v14329_v48 = vadd.f32 %v7331_v43, %v14255_v44 }
0x22ac   :  { %v14326_v21 = vadd.f32 %v7326_v46, %v14258_v62 }
0x22ad   :  { %v7341_v47 = vsel %vm60_vm0, %v14329_v48, 0.0 }
0x22ae   :  { %v7338_v49 = vsel %vm60_vm0, %v14326_v21, 0.0 }
0x22af   :  { %7339 = vadd.xlane.f32.xlu0 %v7338_v49 }
0x22b3   :  { %7342 = vadd.xlane.f32.xlu0 %v7341_v47 }
0x233c   :  { %v7340_v5 = vpop.xlane.xlu0 %7339 }
0x233d   :  { %v7344_v15 = vmul.f32 0.03125, %v7340_v5 }
0x233f   :  { %v7346_v61 = vsub.f32 %v14326_v21, %v7344_v15 }
0x2340   :  { %v7343_v52 = vpop.xlane.xlu0 %7342 }
0x2341   :  { %v7345_v2 = vmul.f32 0.03125, %v7343_v52  ;;  %v7348_v6 = vmul.f32 %v7346_v61, %v7346_v61  ;;  %v7380_v11 = vmul.f32 %v7379_v54, %v7346_v61 }
0x2343   :  { %v7347_v62 = vsub.f32 %v14329_v48, %v7345_v2  ;;  %v7350_v44 = vsel %vm60_vm0, %v7348_v6, 0.0 }
0x2344   :  { %7351 = vadd.xlane.f32.xlu0 %v7350_v44 }
0x2345   :  { %v7349_v55 = vmul.f32 %v7347_v62, %v7347_v62  ;;  %v7381_v22 = vmul.f32 %v7379_v54, %v7347_v62 }
0x2347   :  { %v7353_v29 = vsel %vm60_vm0, %v7349_v55, 0.0 }
0x2348   :  { %7354 = vadd.xlane.f32.xlu0 %v7353_v29 }
0x23d1   :  { %v7352_v59 = vpop.xlane.xlu0 %7351 }
0x23d2   :  { %v7356_v23 = vmul.f32 0.032258064, %v7352_v59 }
0x23d4   :  { %12801 = vrsqrt.f32 %v7356_v23  ;;  %vm7360_vm3 = vcmp.eq.f32.partialorder %v7356_v23, inf  ;;  %v7363_v24 = vand.u32 2147483648, %v7356_v23  ;;  %vm7362_vm4 = vcmp.eq.f32.partialorder %v7356_v23, 0.0 }
0x23d5   :  { %v7355_v36 = vpop.xlane.xlu0 %7354 }
0x23d6   :  { %v7357_v58 = vmul.f32 0.032258064, %v7355_v36 }
0x23d8   :  { %12803 = vrsqrt.f32 %v7357_v58  ;;  %vm7367_vm9 = vcmp.eq.f32.partialorder %v7357_v58, inf  ;;  %v7370_v35 = vand.u32 2147483648, %v7357_v58  ;;  %vm7369_vm10 = vcmp.eq.f32.partialorder %v7357_v58, 0.0 }
0x23de   :  { %v12802_v60 = vpop.eup %12801 }
0x23df   :  { %v7359_v9 = vmul.f32 %v12802_v60, %v7356_v23 }
0x23e1   :  { %v7361_v18 = vsel %vm7360_vm3, %v7356_v23, %v7359_v9 }
0x23e2   :  { %v12804_v31 = vpop.eup %12803  ;;  %v7364_v25 = vsel %vm7362_vm4, %v7363_v24, %v7361_v18 }
0x23e3   :  { %v7366_v51 = vmul.f32 %v12804_v31, %v7357_v58  ;;  %v7372_v10 = vadd.f32 1e-06, %v7364_v25 }
0x23e5   :  { %v7368_v38 = vsel %vm7367_vm9, %v7357_v58, %v7366_v51  ;;  %12805 = vrcp.f32 %v7372_v10 }
0x23e6   :  { %v7371_v45 = vsel %vm7369_vm10, %v7370_v35, %v7368_v38 }
0x23e7   :  { %v7373_v19 = vadd.f32 1e-06, %v7371_v45 }
0x23e9   :  { %12807 = vrcp.f32 %v7373_v19 }
0x23ef   :  { %v12806_v0 = vpop.eup %12805 }
0x23f0   :  { %v7382_v1 = vmul.f32 %v12806_v0, %v7380_v11 }
0x23f2   :  { %v7388_v12 = vadd.f32 %v7387_v17, %v7382_v1 }
0x23f3   :  { %v12808_v16 = vpop.eup %12807 }
0x23f4   :  { %v7383_v28 = vmul.f32 %v12808_v16, %v7381_v22  ;;  %12071 = vmatprep.mubr.msk.f32.mxu1 %vm60_vm0, %v7388_v12 }
0x23f6   :  { %v7389_v39 = vadd.f32 %v7387_v17, %v7383_v28 }
0x23f8   :  { %12072 = vmatmul.mubr.msk.f32.vlgmr.msra.gmra.mrb[86].mxu1 %vm60_vm0, %v7389_v39 }
0x23f9   :  { %12076 = vmatprep.mubr.msk.f32.mxu1 %vm12922_vm5, %v12921_v53 }
0x24cb   :  { %v12073_v27 = vpop.f32.mrb[86].mxu1 }
0x24cc   :  { %v14383_v41 = vadd.f32 %v12073_v27, %v14380_v13  ;;  %v7475_v57 = vpop.f32.mrb[87].mxu1 }
0x24cd   :  { %v14390_v43 = vadd.f32 %v14380_v13, %v7475_v57 }
0x24ce   :  { %7492 = vrot.lane.b32.xlu1 %v14383_v41, %s12924_s26  ;;  %7488 = vrot.lane.b32.xlu0 %v14383_v41, %s12923_s25 }
0x24d2   :  { %7486 = vrot.lane.b32.xlu1 %v14390_v43, %s12923_s25 }
0x24d6   :  { %7490 = vrot.lane.b32.xlu1 %v14390_v43, %s12924_s26 }
0x24da   :  { %7494 = vrot.lane.b32.xlu1 %v14390_v43, %s12925_s27 }
0x24de   :  { %7496 = vrot.lane.b32.xlu1 %v14383_v41, %s12925_s27 }
0x24e2   :  { %7498 = vrot.lane.b32.xlu1 %v14390_v43, %s12926_s28 }
0x24e6   :  { %7574 = vrot.lane.b32.xlu1 %v14383_v41, %s12926_s28 }
0x2540   :  { %v14404_v46 = vpop.permute.xlu1 %7492  ;;  %v14406_v49 = vpop.permute.xlu0 %7488 }
0x2541   :  { %7726 = vrot.lane.b32.xlu1 %v14406_v49, %s12926_s28 }
0x2544   :  { %v14410_v47 = vpop.permute.xlu1 %7486 }
0x2545   :  { %7878 = vrot.lane.b32.xlu1 %v14404_v46, %s12926_s28  ;;  %7650 = vrot.lane.b32.xlu0 %v14410_v47, %s12926_s28 }
0x2548   :  { %v14416_v5 = vpop.permute.xlu1 %7490 }
0x2549   :  { %7802 = vrot.lane.b32.xlu0 %v14416_v5, %s12926_s28 }
0x254c   :  { %v14420_v15 = vpop.permute.xlu1 %7494 }
0x254d   :  { %7954 = vrot.lane.b32.xlu0 %v14420_v15, %s12926_s28 }
0x2550   :  { %v14424_v61 = vpop.permute.xlu1 %7496 }
0x2551   :  { %8030 = vrot.lane.b32.xlu1 %v14424_v61, %s12926_s28 }
0x2554   :  { %v7499_v52 = vpop.permute.xlu1 %7498 }
0x2555   :  { %12075 = vmatpush3.xpose.msk.msra.mxu1 %vm222_vm6, %v7499_v52 }
0x2556   :  { %12079 = vmatprep.subr.mxu1 %v12921_v53 }
0x2558   :  { %12077 = vmatmul.mubr.msk.f32.vlgmr.msra.gmra.mrb[88].mxu1 %vm222_vm6, %v14390_v43  ;;  %v7575_v2 = vpop.permute.xlu1 %7574 }
0x2559   :  { %12080 = vmatpush3.xpose.msk.msra.mxu1 %vm222_vm6, %v7575_v2  ;;  %12081 = vmatprep.mubr.msk.f32.mxu1 %vm12922_vm5, %v12921_v53 }
0x255a   :  { %12089 = vmatprep.subr.mxu1 %v12921_v53 }
0x255c   :  { %12082 = vmatmul.mubr.msk.f32.vlgmr.msra.gmra.mrb[90].mxu1 %vm222_vm6, %v14383_v41 }
0x255d   :  { %12091 = vmatprep.mubr.msk.f32.mxu1 %vm12922_vm5, %v12921_v53 }
0x25b3   :  { %v7727_v6 = vpop.permute.xlu1 %7726 }
0x25b4   :  { %12090 = vmatpush3.xpose.msk.msra.mxu1 %vm222_vm6, %v7727_v6 }
0x25b5   :  { %12099 = vmatprep.subr.mxu1 %v12921_v53 }
0x25b7   :  { %v7651_v62 = vpop.permute.xlu0 %7650  ;;  %12092 = vmatmul.mubr.msk.f32.vlgmr.msra.gmra.mrb[92].mxu1 %vm222_vm6, %v14406_v49  ;;  %v7879_v44 = vpop.permute.xlu1 %7878 }
0x25b8   :  { %12085 = vmatpush3.xpose.msk.msra.mxu0 %vm222_vm6, %v7651_v62  ;;  %12100 = vmatpush3.xpose.msk.msra.mxu1 %vm222_vm6, %v7879_v44 }
0x25b9   :  { %12101 = vmatprep.mubr.msk.f32.mxu1 %vm12922_vm5, %v12921_v53  ;;  %12094 = vmatprep.subr.mxu0 %v12921_v53 }
0x25ba   :  { %12109 = vmatprep.subr.mxu1 %v12921_v53 }
0x25bb   :  { %12087 = vmatmul.mubr.msk.f32.vlgmr.msra.gmra.mrb[72].mxu0 %vm222_vm6, %v14410_v47  ;;  %v7803_v55 = vpop.permute.xlu0 %7802  ;;  %12102 = vmatmul.mubr.msk.f32.vlgmr.msra.gmra.mrb[94].mxu1 %vm222_vm6, %v14404_v46 }
0x25bc   :  { %12095 = vmatpush3.xpose.msk.msra.mxu0 %vm222_vm6, %v7803_v55  ;;  %12096 = vmatprep.mubr.msk.f32.mxu0 %vm12922_vm5, %v12921_v53 }
0x25bd   :  { %12104 = vmatprep.subr.mxu0 %v12921_v53  ;;  %12111 = vmatprep.mubr.msk.f32.mxu1 %vm12922_vm5, %v12921_v53 }
0x25bf   :  { %12097 = vmatmul.mubr.msk.f32.vlgmr.msra.gmra.mrb[74].mxu0 %vm222_vm6, %v14416_v5  ;;  %v7955_v29 = vpop.permute.xlu0 %7954 }
0x25c0   :  { %12105 = vmatpush3.xpose.msk.msra.mxu0 %vm222_vm6, %v7955_v29  ;;  %12106 = vmatprep.mubr.msk.f32.mxu0 %vm12922_vm5, %v12921_v53 }
0x25c1   :  { %12114 = vmatprep.subr.mxu0 %v12921_v53 }
0x25c3   :  { %12107 = vmatmul.mubr.msk.f32.vlgmr.msra.gmra.mrb[76].mxu0 %vm222_vm6, %v14420_v15  ;;  %v8031_v63 = vpop.permute.xlu1 %8030 }
0x25c4   :  { %12110 = vmatpush3.xpose.msk.msra.mxu1 %vm222_vm6, %v8031_v63  ;;  %12116 = vmatprep.mubr.msk.f32.mxu0 %vm12922_vm5, %v12921_v53 }
0x25c5   :  { %12119 = vmatprep.subr.mxu1 %v12921_v53 }
0x25c7   :  { %12112 = vmatmul.mubr.msk.f32.vlgmr.msra.gmra.mrb[96].mxu1 %vm222_vm6, %v14424_v61 }
0x25c8   :  { %12121 = vmatprep.mubr.msk.f32.mxu1 %vm12922_vm5, %v12921_v53 }
0x262b   :  { %v7570_v34 = vpop.f32.mrb[88].mxu1 }
0x262c   :  { %v7571_v59 = vadd.f32 %v7570_v34, %v13856_v7  ;;  %v12078_v23 = vpop.f32.mrb[89].mxu1 }
0x262e   :  { %v8106_v36 = vsel %vm222_vm6, %v7571_v59, -inf }
0x262f   :  { %8107 = vmax.xlane.f32.xlu0 %v8106_v36  ;;  %v7646_v58 = vpop.f32.mrb[90].mxu1 }
0x2630   :  { %v7647_v60 = vadd.f32 %v7646_v58, %v13859_v32  ;;  %v12083_v9 = vpop.f32.mrb[91].mxu1 }
0x2632   :  { %v8109_v24 = vsel %vm222_vm6, %v7647_v60, -inf }
0x2633   :  { %8110 = vmax.xlane.f32.xlu1 %v8109_v24 }
0x268a   :  { %v7798_v18 = vpop.f32.mrb[92].mxu1 }
0x268b   :  { %v7799_v31 = vadd.f32 %v7798_v18, %v13859_v32  ;;  %v12093_v25 = vpop.f32.mrb[93].mxu1 }
0x268d   :  { %v8115_v51 = vsel %vm222_vm6, %v7799_v31, -inf }
0x268e   :  { %v7722_v10 = vpop.f32.mrb[72].mxu0  ;;  %8116 = vmax.xlane.f32.xlu0 %v8115_v51  ;;  %v7950_v35 = vpop.f32.mrb[94].mxu1 }
0x268f   :  { %v7723_v38 = vadd.f32 %v7722_v10, %v13856_v7  ;;  %v7951_v45 = vadd.f32 %v7950_v35, %v13859_v32  ;;  %v12088_v33 = vpop.f32.mrb[73].mxu0  ;;  %v12103_v19 = vpop.f32.mrb[95].mxu1 }
0x2691   :  { %v8112_v54 = vsel %vm222_vm6, %v7723_v38, -inf  ;;  %v8121_v11 = vsel %vm222_vm6, %v7951_v45, -inf }
0x2692   :  { %v7874_v17 = vpop.f32.mrb[74].mxu0  ;;  %8113 = vmax.xlane.f32.xlu0 %v8112_v54  ;;  %8122 = vmax.xlane.f32.xlu1 %v8121_v11 }
0x2693   :  { %v7875_v0 = vadd.f32 %v7874_v17, %v13856_v7  ;;  %v12098_v1 = vpop.f32.mrb[75].mxu0 }
0x2695   :  { %v8118_v22 = vsel %vm222_vm6, %v7875_v0, -inf }
0x2696   :  { %v8026_v12 = vpop.f32.mrb[76].mxu0  ;;  %8119 = vmax.xlane.f32.xlu0 %v8118_v22 }
0x2697   :  { %v8027_v16 = vadd.f32 %v8026_v12, %v13856_v7  ;;  %v12108_v28 = vpop.f32.mrb[77].mxu0 }
0x2699   :  { %v8124_v39 = vsel %vm222_vm6, %v8027_v16, -inf }
0x269a   :  { %8125 = vmax.xlane.f32.xlu0 %v8124_v39  ;;  %v8102_v27 = vpop.f32.mrb[96].mxu1 }
0x269b   :  { %v8103_v57 = vadd.f32 %v8102_v27, %v13859_v32  ;;  %v12113_v52 = vpop.f32.mrb[97].mxu1 }
0x269d   :  { %v8127_v2 = vsel %vm222_vm6, %v8103_v57, -inf }
0x269e   :  { %8128 = vmax.xlane.f32.xlu1 %v8127_v2 }
0x26af   :  { %8270 = vrot.lane.b32.xlu1 %v14383_v41, %s12927_s1 }
0x26b0   :  { %8194 = vrot.lane.b32.xlu0 %v14390_v43, %s12927_s1 }
0x26b3   :  { %8346 = vrot.lane.b32.xlu1 %v14410_v47, %s12927_s1 }
0x26b4   :  { %8498 = vrot.lane.b32.xlu0 %v14416_v5, %s12927_s1 }
0x26b7   :  { %8422 = vrot.lane.b32.xlu1 %v14406_v49, %s12927_s1 }
0x26bb   :  { %8574 = vrot.lane.b32.xlu1 %v14404_v46, %s12927_s1 }
0x26bc   :  { %v8108_v7 = vpop.xlane.xlu0 %8107 }
0x26bd   :  { %v8130_v32 = vsub.f32 %v7571_v59, %v8108_v7 }
0x26bf   :  { %v8138_v6 = vmul.f32 1.442695, %v8130_v32 }
0x26c0   :  { %v8111_v41 = vpop.xlane.xlu1 %8110 }
0x26c1   :  { %12809 = vpow2.f32 %v8138_v6  ;;  %v8131_v62 = vsub.f32 %v7647_v60, %v8111_v41 }
0x26c3   :  { %v8140_v44 = vmul.f32 1.442695, %v8131_v62 }
0x26c5   :  { %12811 = vpow2.f32 %v8140_v44 }
0x26cb   :  { %v14504_v43 = vpop.eup %12809 }
0x26cc   :  { %v8154_v47 = vsel %vm222_vm6, %v14504_v43, 0.0 }
0x26cf   :  { %v14508_v5 = vpop.eup %12811 }
0x26d0   :  { %v8157_v49 = vsel %vm222_vm6, %v14508_v5, 0.0 }
0x26d3   :  { %8155 = vadd.xlane.f32.xlu0 %v8154_v47 }
0x26df   :  { %8158 = vadd.xlane.f32.xlu1 %v8157_v49 }
0x271b   :  { %v8117_v46 = vpop.xlane.xlu0 %8116 }
0x271c   :  { %v8133_v55 = vsub.f32 %v7799_v31, %v8117_v46 }
0x271e   :  { %v8144_v29 = vmul.f32 1.442695, %v8133_v55 }
0x271f   :  { %v8114_v63 = vpop.xlane.xlu0 %8113  ;;  %v8123_v34 = vpop.xlane.xlu1 %8122 }
0x2720   :  { %12813 = vpow2.f32 %v8144_v29  ;;  %v8132_v59 = vsub.f32 %v7723_v38, %v8114_v63  ;;  %v8135_v23 = vsub.f32 %v7951_v45, %v8123_v34 }
0x2722   :  { %v8142_v36 = vmul.f32 1.442695, %v8132_v59  ;;  %v8148_v58 = vmul.f32 1.442695, %v8135_v23 }
0x2723   :  { %v8120_v60 = vpop.xlane.xlu0 %8119 }
0x2724   :  { %12815 = vpow2.f32 %v8142_v36  ;;  %v8134_v9 = vsub.f32 %v7875_v0, %v8120_v60 }
0x2725   :  { %12817 = vpow2.f32 %v8148_v58 }
0x2726   :  { %v8146_v24 = vmul.f32 1.442695, %v8134_v9 }
0x2727   :  { %v8126_v18 = vpop.xlane.xlu0 %8125 }
0x2728   :  { %12819 = vpow2.f32 %v8146_v24  ;;  %v8136_v25 = vsub.f32 %v8027_v16, %v8126_v18 }
0x272a   :  { %v14512_v51 = vpop.eup %12813  ;;  %v8150_v10 = vmul.f32 1.442695, %v8136_v25 }
0x272b   :  { %v8195_v31 = vpop.permute.xlu0 %8194  ;;  %v8129_v35 = vpop.xlane.xlu1 %8128  ;;  %v8163_v33 = vsel %vm222_vm6, %v14512_v51, 0.0 }
0x272c   :  { %12821 = vpow2.f32 %v8150_v10  ;;  %v8137_v38 = vsub.f32 %v8103_v57, %v8129_v35  ;;  %12115 = vmatpush3.msra.mxu0 %v8195_v31  ;;  %8164 = vadd.xlane.f32.xlu1 %v8163_v33 }
0x272d   :  { %12124 = vmatprep.subr.mxu0 %v12921_v53 }
0x272e   :  { %v12816_v45 = vpop.eup %12815  ;;  %v8152_v19 = vmul.f32 1.442695, %v8137_v38 }
0x272f   :  { %v12818_v54 = vpop.eup %12817  ;;  %v8271_v11 = vpop.permute.xlu1 %8270  ;;  %v8160_v17 = vsel %vm222_vm6, %v12816_v45, 0.0 }
0x2730   :  { %12823 = vpow2.f32 %v8152_v19  ;;  %8161 = vadd.xlane.f32.xlu0 %v8160_v17  ;;  %v8169_v0 = vsel %vm222_vm6, %v12818_v54, 0.0  ;;  %12120 = vmatpush3.msra.mxu1 %v8271_v11  ;;  %v8499_v27 = vpop.permute.xlu0 %8498 }
0x2731   :  { %8170 = vadd.xlane.f32.xlu1 %v8169_v0  ;;  %12129 = vmatprep.subr.mxu1 %v12921_v53 }
0x2732   :  { %v12820_v1 = vpop.eup %12819 }
0x2733   :  { %v8166_v22 = vsel %vm222_vm6, %v12820_v1, 0.0  ;;  %v8347_v57 = vpop.permute.xlu1 %8346 }
0x2734   :  { %8167 = vadd.xlane.f32.xlu0 %v8166_v22 }
0x2736   :  { %v14521_v12 = vpop.eup %12821 }
0x2737   :  { %v8172_v16 = vsel %vm222_vm6, %v14521_v12, 0.0  ;;  %v8423_v2 = vpop.permute.xlu1 %8422 }
0x2738   :  { %8173 = vadd.xlane.f32.xlu0 %v8172_v16 }
0x273a   :  { %v14525_v28 = vpop.eup %12823 }
0x273b   :  { %v8175_v39 = vsel %vm222_vm6, %v14525_v28, 0.0  ;;  %v8575_v7 = vpop.permute.xlu1 %8574 }
0x273c   :  { %8176 = vadd.xlane.f32.xlu1 %v8175_v39 }
0x274d   :  { %8726 = vrot.lane.b32.xlu1 %v14424_v61, %s12927_s1 }
0x274e   :  { %8650 = vrot.lane.b32.xlu0 %v14420_v15, %s12927_s1 }
0x2751   :  { %12585 = vrot.lane.b32.xlu1 %v12584_v4, %s12928_s12 }
0x2752   :  { %12580 = vrot.lane.b32.xlu0 %v12579_v56, %s12928_s12 }
0x2760   :  { %v8156_v52 = vpop.xlane.xlu0 %8155 }
0x2761   :  { %12825 = vrcp.f32 %v8156_v52 }
0x276b   :  { %v12826_v61 = vpop.eup %12825 }
0x276c   :  { %v8186_v32 = vmul.f32 %v12826_v61, %v14504_v43  ;;  %v8159_v15 = vpop.xlane.xlu1 %8158 }
0x276d   :  { %12827 = vrcp.f32 %v8159_v15 }
0x276e   :  { %12117 = vmatmul.mubr.msk.f32.vlgmr.msra.gmra.mrb[78].mxu0 %vm222_vm6, %v8186_v32 }
0x276f   :  { %12125 = vmatpush3.msra.mxu0 %v8347_v57  ;;  %12126 = vmatprep.mubr.msk.f32.mxu0 %vm12922_vm5, %v12921_v53 }
0x2770   :  { %12134 = vmatprep.subr.mxu0 %v12921_v53 }
0x2777   :  { %v12828_v40 = vpop.eup %12827 }
0x2778   :  { %v8187_v30 = vmul.f32 %v12828_v40, %v14508_v5 }
0x277a   :  { %12122 = vmatmul.mubr.msk.f32.vlgmr.msra.gmra.mrb[98].mxu1 %vm222_vm6, %v8187_v30 }
0x277b   :  { %12130 = vmatpush3.msra.mxu1 %v8423_v2  ;;  %12131 = vmatprep.mubr.msk.f32.mxu1 %vm12922_vm5, %v12921_v53 }
0x277c   :  { %12139 = vmatprep.subr.mxu1 %v12921_v53 }
0x27b9   :  { %v8165_v50 = vpop.xlane.xlu1 %8164 }
0x27ba   :  { %12829 = vrcp.f32 %v8165_v50 }
0x27bd   :  { %v8162_v56 = vpop.xlane.xlu0 %8161 }
0x27be   :  { %12831 = vrcp.f32 %v8162_v56  ;;  %v8171_v3 = vpop.xlane.xlu1 %8170 }
0x27bf   :  { %12833 = vrcp.f32 %v8171_v3 }
0x27c1   :  { %v8168_v4 = vpop.xlane.xlu0 %8167 }
0x27c2   :  { %12835 = vrcp.f32 %v8168_v4 }
0x27c4   :  { %v12830_v6 = vpop.eup %12829 }
0x27c5   :  { %v8189_v41 = vmul.f32 %v12830_v6, %v14512_v51  ;;  %v8174_v62 = vpop.xlane.xlu0 %8173 }
0x27c6   :  { %12837 = vrcp.f32 %v8174_v62 }
0x27c7   :  { %12132 = vmatmul.mubr.msk.f32.vlgmr.msra.gmra.mrb[100].mxu1 %vm222_vm6, %v8189_v41 }
0x27c8   :  { %v12832_v44 = vpop.eup %12831  ;;  %12140 = vmatpush3.msra.mxu1 %v8575_v7  ;;  %12141 = vmatprep.mubr.msk.f32.mxu1 %vm12922_vm5, %v12921_v53 }
0x27c9   :  { %v12834_v43 = vpop.eup %12833  ;;  %v8188_v47 = vmul.f32 %v12832_v44, %v12816_v45  ;;  %v8177_v5 = vpop.xlane.xlu1 %8176  ;;  %12149 = vmatprep.subr.mxu1 %v12921_v53 }
0x27ca   :  { %v8191_v49 = vmul.f32 %v12834_v43, %v12818_v54  ;;  %12839 = vrcp.f32 %v8177_v5  ;;  %v8651_v63 = vpop.permute.xlu0 %8650 }
0x27cb   :  { %12127 = vmatmul.mubr.msk.f32.vlgmr.msra.gmra.mrb[80].mxu0 %vm222_vm6, %v8188_v47 }
0x27cc   :  { %v12836_v46 = vpop.eup %12835  ;;  %12135 = vmatpush3.msra.mxu0 %v8499_v27  ;;  %12142 = vmatmul.mubr.msk.f32.vlgmr.msra.gmra.mrb[102].mxu1 %vm222_vm6, %v8191_v49 }
0x27cd   :  { %v8190_v55 = vmul.f32 %v12836_v46, %v12820_v1  ;;  %v8727_v29 = vpop.permute.xlu1 %8726  ;;  %12136 = vmatprep.mubr.msk.f32.mxu0 %vm12922_vm5, %v12921_v53  ;;  %12144 = vmatprep.subr.mxu0 %v12921_v53 }
0x27ce   :  { %12150 = vmatpush3.msra.mxu1 %v8727_v29  ;;  %12151 = vmatprep.mubr.msk.f32.mxu1 %vm12922_vm5, %v12921_v53  ;;  %v12581_v60 = vpop.permute.xlu0 %12580 }
0x27cf   :  { %12137 = vmatmul.mubr.msk.f32.vlgmr.msra.gmra.mrb[82].mxu0 %vm222_vm6, %v8190_v55  ;;  %v12583_v18 = vunpack.i.h.bf16 %v12581_v60  ;;  %v12582_v25 = vunpack.i.l.bf16 %v12581_v60  ;;  %v11161_v60 = vld [vmem:[%s14932_s3 + $0xb8] sm:$0xff] }
0x27d0   :  { %v12838_v34 = vpop.eup %12837  ;;  %12145 = vmatpush3.msra.mxu0 %v8651_v63  ;;  %12146 = vmatprep.mubr.msk.f32.mxu0 %vm12922_vm5, %v12921_v53 }
0x27d1   :  { %v8192_v59 = vmul.f32 %v12838_v34, %v14521_v12  ;;  %v12586_v58 = vpop.permute.xlu1 %12585  ;;  %v12460_v10 = vpack.c.bf16 %v12583_v18, %v12582_v25 }
0x27d2   :  { %v12588_v9 = vunpack.i.h.bf16 %v12586_v58  ;;  %v12587_v24 = vunpack.i.l.bf16 %v12586_v58  ;;  %v11160_v58 = vld [vmem:[%s14932_s3 + $0xb0] sm:$0xff] }
0x27d3   :  { %12147 = vmatmul.mubr.msk.f32.vlgmr.msra.gmra.mrb[84].mxu0 %vm222_vm6, %v8192_v59  ;;  %12461 = vmatprep.subr.bf16.mxu0 %v12460_v10  ;;  %v14622_v25 = vpack.i.bf16 %v11161_v60, %v11160_v58 }
0x27d4   :  { %v12840_v23 = vpop.eup %12839  ;;  %v12464_v51 = vpack.c.bf16 %v12588_v9, %v12587_v24  ;;  %12463 = vmatpush3.bf16.msra.mxu0 %v12460_v10 }
0x27d5   :  { %v8193_v36 = vmul.f32 %v12840_v23, %v14525_v28 }
0x27d6   :  { %12465 = vmatprep.subr.bf16.mxu0 %v12464_v51 }
0x27d7   :  { %12152 = vmatmul.mubr.msk.f32.vlgmr.msra.gmra.mrb[104].mxu1 %vm222_vm6, %v8193_v36 }
0x27d8   :  { %12467 = vmatpush3.bf16.msra.mxu0 %v12464_v51 }
0x2841   :  { %v8266_v31 = vpop.f32.mrb[78].mxu0 }
0x2842   :  { %v12118_v35 = vpop.f32.mrb[79].mxu0 }
0x2843   :  { %v14630_v35 = vld [vmem:[%s14933_s4 + $0x5] ss:$0 sm:$0xff] }
0x284d   :  { %v8342_v33 = vpop.f32.mrb[98].mxu1 }
0x284e   :  { %v12123_v38 = vpop.f32.mrb[99].mxu1 }
0x289a   :  { %v8494_v45 = vpop.f32.mrb[100].mxu1 }
0x289b   :  { %8806 = vrot.lane.b32.xlu1 %v8494_v45, %s12929_s13  ;;  %v12133_v19 = vpop.f32.mrb[101].mxu1 }
0x289e   :  { %v8418_v54 = vpop.f32.mrb[80].mxu0 }
0x289f   :  { %v8646_v11 = vpop.f32.mrb[102].mxu1  ;;  %8804 = vrot.lane.b32.xlu0 %v8418_v54, %s12929_s13  ;;  %v12128_v17 = vpop.f32.mrb[81].mxu0 }
0x28a0   :  { %8814 = vrot.lane.b32.xlu1 %v8646_v11, %s12930_s14  ;;  %v12143_v0 = vpop.f32.mrb[103].mxu1 }
0x28a2   :  { %v8570_v1 = vpop.f32.mrb[82].mxu0 }
0x28a3   :  { %8812 = vrot.lane.b32.xlu0 %v8570_v1, %s12930_s14  ;;  %v12138_v22 = vpop.f32.mrb[83].mxu0 }
0x28a6   :  { %v8722_v12 = vpop.f32.mrb[84].mxu0 }
0x28a7   :  { %8820 = vrot.lane.b32.xlu0 %v8722_v12, %s12931_s15  ;;  %v12148_v16 = vpop.f32.mrb[85].mxu0 }
0x28aa   :  { %v8798_v28 = vpop.f32.mrb[104].mxu1 }
0x28ab   :  { %8822 = vrot.lane.b32.xlu1 %v8798_v28, %s12931_s15  ;;  %v12153_v39 = vpop.f32.mrb[105].mxu1  ;;  %8848 = vrot.lane.b32.xlu0 %v14380_v13, %s12928_s12 }
0x290d   :  { %v8807_v57 = vpop.permute.xlu1 %8806 }
0x290e   :  { %v8827_v40 = vsel %vm222_vm6, %v8342_v33, %v8807_v57 }
0x2911   :  { %v8805_v27 = vpop.permute.xlu0 %8804 }
0x2912   :  { %v8826_v2 = vsel %vm222_vm6, %v8266_v31, %v8805_v27  ;;  %v8815_v7 = vpop.permute.xlu1 %8814  ;;  %v12472_v31 = vpack.c.bf16 %v11161_v60, %v11160_v58 }
0x2913   :  { %v8829_v30 = vsel %vm1551_vm7, %v8827_v40, %v8815_v7 }
0x2915   :  { %v8813_v52 = vpop.permute.xlu0 %8812 }
0x2916   :  { %v8828_v61 = vsel %vm1551_vm7, %v8826_v2, %v8813_v52 }
0x2919   :  { %v8821_v32 = vpop.permute.xlu0 %8820 }
0x291a   :  { %v8830_v15 = vsel %vm1554_vm8, %v8828_v61, %v8821_v32  ;;  %v11157_v61 = vld [vmem:[%s14937_s8 + $0x12] sm:$0x3] }
0x291b   :  { %12162 = vmatprep.mubr.msk.f32.mxu0 %vm60_vm0, %v8830_v15  ;;  %v8977_v15 = vrot.slane %v11157_v61, %v13028_v37 }
0x291d   :  { %v8823_v50 = vpop.permute.xlu1 %8822  ;;  %v8849_v56 = vpop.permute.xlu0 %8848 }
0x291e   :  { %v8831_v13 = vsel %vm1554_vm8, %v8829_v30, %v8823_v50 }
0x291f   :  { %12163 = vmatmul.mubr.msk.f32.vlgmr.msra.gmra.mrb[86].mxu0 %vm60_vm0, %v8831_v13 }
0x2920   :  { %12184 = vmatprep.mubr.msk.f32.mxu0 %vm60_vm0, %v14000_v8  ;;  %v11158_v8 = vld [vmem:[%s14932_s3 + $0xa0] sm:$0xff] }
0x29f2   :  { %v12164_v3 = vpop.f32.mrb[86].mxu0 }
0x29f3   :  { %v8929_v4 = vadd.f32 %v12164_v3, %v8849_v56  ;;  %v8923_v6 = vpop.f32.mrb[87].mxu0 }
0x29f4   :  { %v8924_v41 = vadd.f32 %v8923_v6, %v8849_v56 }
0x29f5   :  { %v14589_v62 = vadd.f32 %v8929_v4, %v14329_v48  ;;  %v11159_v48 = vld [vmem:[%s14932_s3 + $0xa8] sm:$0xff] }
0x29f6   :  { %v14592_v44 = vadd.f32 %v8924_v41, %v14326_v21  ;;  %v14604_v5 = vpack.i.bf16 %v11159_v48, %v11158_v8  ;;  %v12468_v10 = vpack.c.bf16 %v11159_v48, %v11158_v8 }
0x29f7   :  { %v8939_v43 = vsel %vm60_vm0, %v14589_v62, 0.0 }
0x29f8   :  { %8940 = vadd.xlane.f32.xlu0 %v8939_v43  ;;  %v8936_v47 = vsel %vm60_vm0, %v14592_v44, 0.0  ;;  %12469 = vmatprep.subr.bf16.mxu1 %v12468_v10 }
0x29f9   :  { %8937 = vadd.xlane.f32.xlu1 %v8936_v47  ;;  %12471 = vmatpush3.bf16.msra.mxu1 %v12468_v10 }
0x29fa   :  { %12473 = vmatprep.subr.bf16.mxu1 %v12472_v31 }
0x29fd   :  { %12475 = vmatpush3.bf16.msra.mxu1 %v12472_v31 }
0x29fe   :  { %12187 = vmatprep.subr.mxu1 %v12921_v53 }
0x2a0a   :  { %12590 = vrot.lane.b32.xlu1 %v14604_v5, %s12926_s28 }
0x2a0e   :  { %9098 = vrot.lane.b32.xlu1 %v14630_v35, %s12926_s28 }
0x2a85   :  { %v8941_v21 = vpop.xlane.xlu0 %8940 }
0x2a86   :  { %v8943_v49 = vmul.f32 0.03125, %v8941_v21  ;;  %v8938_v46 = vpop.xlane.xlu1 %8937 }
0x2a87   :  { %v8942_v55 = vmul.f32 0.03125, %v8938_v46 }
0x2a88   :  { %v14609_v29 = vsub.f32 %v14589_v62, %v8943_v49 }
0x2a89   :  { %v8944_v63 = vsub.f32 %v14592_v44, %v8942_v55 }
0x2a8a   :  { %v8947_v23 = vmul.f32 %v14609_v29, %v14609_v29  ;;  %v12591_v9 = vpop.permute.xlu1 %12590  ;;  %v8979_v13 = vmul.f32 %v8977_v15, %v14609_v29 }
0x2a8b   :  { %v8946_v34 = vmul.f32 %v8944_v63, %v8944_v63  ;;  %v12593_v24 = vunpack.i.h.bf16 %v12591_v9  ;;  %v12592_v18 = vunpack.i.l.bf16 %v12591_v9  ;;  %v8978_v40 = vmul.f32 %v8977_v15, %v8944_v63 }
0x2a8c   :  { %v8951_v36 = vsel %vm60_vm0, %v8947_v23, 0.0 }
0x2a8d   :  { %v8948_v59 = vsel %vm60_vm0, %v8946_v34, 0.0  ;;  %v12476_v51 = vpack.c.bf16 %v12593_v24, %v12592_v18 }
0x2a8e   :  { %8949 = vadd.xlane.f32.xlu0 %v8948_v59  ;;  %v9099_v41 = vpop.permute.xlu1 %9098 }
0x2a8f   :  { %12477 = vmatprep.subr.bf16.mxu0 %v12476_v51 }
0x2a90   :  { %12479 = vmatpush3.bf16.msra.mxu0 %v12476_v51 }
0x2a92   :  { %8952 = vadd.xlane.f32.xlu0 %v8951_v36 }
0x2aa8   :  { %12595 = vrot.lane.b32.xlu0 %v14622_v25, %s12926_s28 }
0x2b1b   :  { %v8950_v33 = vpop.xlane.xlu0 %8949 }
0x2b1c   :  { %v8954_v38 = vmul.f32 0.032258064, %v8950_v33 }
0x2b1e   :  { %12841 = vrsqrt.f32 %v8954_v38  ;;  %vm8958_vm11 = vcmp.eq.f32.partialorder %v8954_v38, inf  ;;  %v8961_v12 = vand.u32 2147483648, %v8954_v38  ;;  %vm8960_vm12 = vcmp.eq.f32.partialorder %v8954_v38, 0.0 }
0x2b1f   :  { %v8953_v45 = vpop.xlane.xlu0 %8952 }
0x2b20   :  { %v8955_v19 = vmul.f32 0.032258064, %v8953_v45 }
0x2b22   :  { %12843 = vrsqrt.f32 %v8955_v19  ;;  %vm8965_vm14 = vcmp.eq.f32.partialorder %v8955_v19, inf  ;;  %v8968_v52 = vand.u32 2147483648, %v8955_v19  ;;  %vm8967_vm15 = vcmp.eq.f32.partialorder %v8955_v19, 0.0 }
0x2b23   :  { %v12596_v54 = vpop.permute.xlu0 %12595 }
0x2b24   :  { %v12598_v11 = vunpack.i.h.bf16 %v12596_v54  ;;  %v12597_v17 = vunpack.i.l.bf16 %v12596_v54 }
0x2b26   :  { %v12480_v0 = vpack.c.bf16 %v12598_v11, %v12597_v17 }
0x2b28   :  { %v12842_v1 = vpop.eup %12841  ;;  %12481 = vmatprep.subr.bf16.mxu0 %v12480_v0 }
0x2b29   :  { %v8957_v22 = vmul.f32 %v12842_v1, %v8954_v38  ;;  %12483 = vmatpush3.bf16.msra.mxu0 %v12480_v0 }
0x2b2a   :  { %12197 = vmatprep.subr.mxu0 %v12921_v53 }
0x2b2b   :  { %v8959_v16 = vsel %vm8958_vm11, %v8954_v38, %v8957_v22 }
0x2b2c   :  { %v12844_v28 = vpop.eup %12843  ;;  %v8962_v39 = vsel %vm8960_vm12, %v8961_v12, %v8959_v16  ;;  %12185 = vmatmul.mubr.msk.f32.vlgmr.msra.gmra.mrb[88].mxu0 %vm60_vm0, %v14046_v14  ;;  %v8985_v14 = vrot.slane %v11157_v61, %v13034_v42 }
0x2b2d   :  { %v8964_v27 = vmul.f32 %v12844_v28, %v8955_v19  ;;  %v8970_v57 = vadd.f32 1e-06, %v8962_v39  ;;  %12199 = vmatprep.mubr.msk.f32.mxu0 %vm12922_vm5, %v12921_v53 }
0x2b2f   :  { %v8966_v2 = vsel %vm8965_vm14, %v8955_v19, %v8964_v27  ;;  %12845 = vrcp.f32 %v8970_v57 }
0x2b30   :  { %v8969_v7 = vsel %vm8967_vm15, %v8968_v52, %v8966_v2 }
0x2b31   :  { %v8971_v32 = vadd.f32 1e-06, %v8969_v7 }
0x2b33   :  { %12847 = vrcp.f32 %v8971_v32 }
0x2b39   :  { %v12846_v30 = vpop.eup %12845 }
0x2b3a   :  { %v8980_v50 = vmul.f32 %v12846_v30, %v8978_v40 }
0x2b3c   :  { %v8986_v56 = vadd.f32 %v8985_v14, %v8980_v50 }
0x2b3d   :  { %v12848_v3 = vpop.eup %12847 }
0x2b3e   :  { %12173 = vmatprep.mubr.msk.f32.mxu1 %vm60_vm0, %v8986_v56  ;;  %v8981_v4 = vmul.f32 %v12848_v3, %v8979_v13 }
0x2b40   :  { %v8987_v6 = vadd.f32 %v8985_v14, %v8981_v4 }
0x2b42   :  { %12174 = vmatmul.mubr.msk.f32.vlgmr.msra.gmra.mrb[106].mxu1 %vm60_vm0, %v8987_v6 }
0x2b43   :  { %12189 = vmatprep.mubr.msk.f32.mxu1 %vm12922_vm5, %v12921_v53 }
0x2bff   :  { %v12186_v43 = vpop.f32.mrb[88].mxu0 }
0x2c00   :  { %v9167_v47 = vpop.f32.mrb[89].mxu0  ;;  %v14657_v48 = vadd.f32 %v12186_v43, %v9099_v41 }
0x2c01   :  { %v14649_v8 = vadd.f32 %v9167_v47, %v9099_v41 }
0x2c03   :  { %9196 = vrot.lane.b32.xlu0 %v14649_v8, %s12924_s26  ;;  %9192 = vrot.lane.b32.xlu1 %v14649_v8, %s12923_s25 }
0x2c04   :  { %12188 = vmatpush3.xpose.msk.msra.mxu1 %vm222_vm6, %v14649_v8 }
0x2c05   :  { %12192 = vmatprep.subr.mxu1 %v12921_v53 }
0x2c07   :  { %9200 = vrot.lane.b32.xlu0 %v14649_v8, %s12925_s27  ;;  %9194 = vrot.lane.b32.xlu1 %v14657_v48, %s12923_s25 }
0x2c0b   :  { %9198 = vrot.lane.b32.xlu1 %v14657_v48, %s12924_s26 }
0x2c0f   :  { %9202 = vrot.lane.b32.xlu1 %v14657_v48, %s12925_s27 }
0x2c15   :  { %v12175_v21 = vpop.f32.mrb[106].mxu1 }
0x2c16   :  { %v9079_v49 = vadd.f32 %v12175_v21, %v14630_v35  ;;  %v9073_v46 = vpop.f32.mrb[107].mxu1 }
0x2c17   :  { %v9074_v55 = vadd.f32 %v14630_v35, %v9073_v46 }
0x2c18   :  { %9180 = vrot.lane.b32.xlu1 %v9079_v49, %s12923_s25 }
0x2c19   :  { %9178 = vrot.lane.b32.xlu0 %v9074_v55, %s12923_s25  ;;  %12190 = vmatmul.mubr.msk.f32.vlgmr.msra.gmra.mrb[108].mxu1 %vm222_vm6, %v9074_v55 }
0x2c1a   :  { %12193 = vmatpush3.xpose.msk.msra.mxu1 %vm222_vm6, %v14657_v48  ;;  %12194 = vmatprep.mubr.msk.f32.mxu1 %vm12922_vm5, %v12921_v53 }
0x2c1b   :  { %12202 = vmatprep.subr.mxu1 %v12921_v53 }
0x2c1c   :  { %9184 = vrot.lane.b32.xlu1 %v9079_v49, %s12924_s26 }
0x2c1d   :  { %9182 = vrot.lane.b32.xlu0 %v9074_v55, %s12924_s26  ;;  %12195 = vmatmul.mubr.msk.f32.vlgmr.msra.gmra.mrb[110].mxu1 %vm222_vm6, %v9079_v49 }
0x2c1e   :  { %12204 = vmatprep.mubr.msk.f32.mxu1 %vm12922_vm5, %v12921_v53 }
0x2c20   :  { %9188 = vrot.lane.b32.xlu1 %v9079_v49, %s12925_s27 }
0x2c21   :  { %9186 = vrot.lane.b32.xlu0 %v9074_v55, %s12925_s27 }
0x2c75   :  { %v14685_v29 = vpop.permute.xlu1 %9192  ;;  %v14697_v59 = vpop.permute.xlu0 %9196 }
0x2c76   :  { %12198 = vmatpush3.xpose.msk.msra.mxu0 %vm222_vm6, %v14685_v29 }
0x2c77   :  { %12207 = vmatprep.subr.mxu0 %v12921_v53 }
0x2c79   :  { %v14690_v63 = vpop.permute.xlu1 %9194  ;;  %v14701_v36 = vpop.permute.xlu0 %9200 }
0x2c7a   :  { %12203 = vmatpush3.xpose.msk.msra.mxu1 %vm222_vm6, %v14690_v63 }
0x2c7b   :  { %12212 = vmatprep.subr.mxu1 %v12921_v53 }
0x2c7d   :  { %v14695_v34 = vpop.permute.xlu1 %9198 }
0x2c81   :  { %v14699_v23 = vpop.permute.xlu1 %9202 }
0x2c8a   :  { %v9181_v58 = vpop.permute.xlu1 %9180 }
0x2c8b   :  { %v9179_v60 = vpop.permute.xlu0 %9178  ;;  %12205 = vmatmul.mubr.msk.f32.vlgmr.msra.gmra.mrb[112].mxu1 %vm222_vm6, %v9181_v58 }
0x2c8c   :  { %12213 = vmatpush3.xpose.msk.msra.mxu1 %vm222_vm6, %v14695_v34  ;;  %12200 = vmatmul.mubr.msk.f32.vlgmr.msra.gmra.mrb[90].mxu0 %vm222_vm6, %v9179_v60 }
0x2c8d   :  { %12208 = vmatpush3.xpose.msk.msra.mxu0 %vm222_vm6, %v14697_v59  ;;  %12214 = vmatprep.mubr.msk.f32.mxu1 %vm12922_vm5, %v12921_v53 }
0x2c8e   :  { %v9185_v9 = vpop.permute.xlu1 %9184  ;;  %12222 = vmatprep.subr.mxu1 %v12921_v53  ;;  %12209 = vmatprep.mubr.msk.f32.mxu0 %vm12922_vm5, %v12921_v53 }
0x2c8f   :  { %v9183_v24 = vpop.permute.xlu0 %9182  ;;  %12215 = vmatmul.mubr.msk.f32.vlgmr.msra.gmra.mrb[114].mxu1 %vm222_vm6, %v9185_v9  ;;  %12217 = vmatprep.subr.mxu0 %v12921_v53 }
0x2c90   :  { %12223 = vmatpush3.xpose.msk.msra.mxu1 %vm222_vm6, %v14699_v23  ;;  %12210 = vmatmul.mubr.msk.f32.vlgmr.msra.gmra.mrb[92].mxu0 %vm222_vm6, %v9183_v24 }
0x2c91   :  { %12218 = vmatpush3.xpose.msk.msra.mxu0 %vm222_vm6, %v14701_v36  ;;  %12224 = vmatprep.mubr.msk.f32.mxu1 %vm12922_vm5, %v12921_v53 }
0x2c92   :  { %v9189_v18 = vpop.permute.xlu1 %9188  ;;  %12219 = vmatprep.mubr.msk.f32.mxu0 %vm12922_vm5, %v12921_v53  ;;  %12232 = vmatprep.subr.mxu1 %v12921_v53 }
0x2c93   :  { %v9187_v51 = vpop.permute.xlu0 %9186  ;;  %12225 = vmatmul.mubr.msk.f32.vlgmr.msra.gmra.mrb[116].mxu1 %vm222_vm6, %v9189_v18  ;;  %12227 = vmatprep.subr.mxu0 %v12921_v53 }
0x2c94   :  { %12220 = vmatmul.mubr.msk.f32.vlgmr.msra.gmra.mrb[94].mxu0 %vm222_vm6, %v9187_v51  ;;  %12234 = vmatprep.mubr.msk.f32.mxu1 %vm12922_vm5, %v12921_v53 }
0x2c95   :  { %12229 = vmatprep.mubr.msk.f32.mxu0 %vm12922_vm5, %v12921_v53 }
0x2cec   :  { %v9274_v10 = vpop.f32.mrb[108].mxu1 }
0x2ced   :  { %v9275_v31 = vadd.f32 %v9274_v10, %v13151_v20  ;;  %v12191_v33 = vpop.f32.mrb[109].mxu1 }
0x2cef   :  { %v9796_v38 = vsel %vm222_vm6, %v9275_v31, -inf }
0x2cf0   :  { %9797 = vmax.xlane.f32.xlu0 %v9796_v38  ;;  %v9348_v45 = vpop.f32.mrb[110].mxu1 }
0x2cf1   :  { %v9349_v19 = vadd.f32 %v9348_v45, %v13156_v26  ;;  %v12196_v54 = vpop.f32.mrb[111].mxu1 }
0x2cf3   :  { %v9799_v11 = vsel %vm222_vm6, %v9349_v19, -inf }
0x2cf4   :  { %9800 = vmax.xlane.f32.xlu1 %v9799_v11 }
0x2d5e   :  { %v9496_v17 = vpop.f32.mrb[112].mxu1 }
0x2d5f   :  { %v9497_v0 = vadd.f32 %v9496_v17, %v13156_v26  ;;  %v9422_v1 = vpop.f32.mrb[90].mxu0  ;;  %v12206_v22 = vpop.f32.mrb[113].mxu1 }
0x2d60   :  { %v12201_v12 = vpop.f32.mrb[91].mxu0  ;;  %v9423_v16 = vadd.f32 %v9422_v1, %v13151_v20 }
0x2d61   :  { %v9805_v28 = vsel %vm222_vm6, %v9497_v0, -inf }
0x2d62   :  { %9806 = vmax.xlane.f32.xlu0 %v9805_v28  ;;  %v9644_v39 = vpop.f32.mrb[114].mxu1  ;;  %v9802_v61 = vsel %vm222_vm6, %v9423_v16, -inf }
0x2d63   :  { %v9645_v27 = vadd.f32 %v9644_v39, %v13156_v26  ;;  %v9570_v57 = vpop.f32.mrb[92].mxu0  ;;  %v12216_v52 = vpop.f32.mrb[115].mxu1 }
0x2d64   :  { %v12211_v2 = vpop.f32.mrb[93].mxu0  ;;  %v9571_v7 = vadd.f32 %v9570_v57, %v13151_v20 }
0x2d65   :  { %v9811_v32 = vsel %vm222_vm6, %v9645_v27, -inf }
0x2d66   :  { %9803 = vmax.xlane.f32.xlu0 %v9802_v61  ;;  %9812 = vmax.xlane.f32.xlu1 %v9811_v32  ;;  %v9792_v15 = vpop.f32.mrb[116].mxu1  ;;  %v9808_v56 = vsel %vm222_vm6, %v9571_v7, -inf }
0x2d67   :  { %v9793_v14 = vadd.f32 %v9792_v15, %v13156_v26  ;;  %v9718_v40 = vpop.f32.mrb[94].mxu0  ;;  %v12226_v30 = vpop.f32.mrb[117].mxu1 }
0x2d68   :  { %v12221_v50 = vpop.f32.mrb[95].mxu0  ;;  %v9719_v13 = vadd.f32 %v9718_v40, %v13151_v20 }
0x2d69   :  { %v9817_v3 = vsel %vm222_vm6, %v9793_v14, -inf }
0x2d6a   :  { %9809 = vmax.xlane.f32.xlu0 %v9808_v56  ;;  %9818 = vmax.xlane.f32.xlu1 %v9817_v3  ;;  %v9814_v4 = vsel %vm222_vm6, %v9719_v13, -inf }
0x2d6e   :  { %9815 = vmax.xlane.f32.xlu0 %v9814_v4 }
0x2d7b   :  { %9960 = vrot.lane.b32.xlu1 %v14657_v48, %s12926_s28 }
0x2d7d   :  { %v9798_v20 = vpop.xlane.xlu0 %9797 }
0x2d7e   :  { %v9820_v26 = vsub.f32 %v9275_v31, %v9798_v20 }
0x2d7f   :  { %10036 = vrot.lane.b32.xlu1 %v14685_v29, %s12926_s28 }
0x2d80   :  { %v9828_v41 = vmul.f32 1.442695, %v9820_v26 }
0x2d81   :  { %v9801_v6 = vpop.xlane.xlu1 %9800 }
0x2d82   :  { %v9821_v43 = vsub.f32 %v9349_v19, %v9801_v6  ;;  %12849 = vpow2.f32 %v9828_v41 }
0x2d83   :  { %10112 = vrot.lane.b32.xlu1 %v14690_v63, %s12926_s28 }
0x2d84   :  { %9884 = vrot.lane.b32.xlu0 %v14649_v8, %s12926_s28  ;;  %v9830_v47 = vmul.f32 1.442695, %v9821_v43 }
0x2d86   :  { %12851 = vpow2.f32 %v9830_v47 }
0x2d87   :  { %10264 = vrot.lane.b32.xlu1 %v14695_v34, %s12926_s28 }
0x2d88   :  { %10188 = vrot.lane.b32.xlu0 %v14697_v59, %s12926_s28 }
0x2d8c   :  { %v14761_v48 = vpop.eup %12849 }
0x2d8d   :  { %v9844_v21 = vsel %vm222_vm6, %v14761_v48, 0.0 }
0x2d90   :  { %v14765_v8 = vpop.eup %12851 }
0x2d91   :  { %v9847_v49 = vsel %vm222_vm6, %v14765_v8, 0.0 }
0x2da7   :  { %9845 = vadd.xlane.f32.xlu0 %v9844_v21 }
0x2dab   :  { %9848 = vadd.xlane.f32.xlu1 %v9847_v49 }
0x2def   :  { %v9807_v46 = vpop.xlane.xlu0 %9806 }
0x2df0   :  { %v9823_v55 = vsub.f32 %v9497_v0, %v9807_v46 }
0x2df2   :  { %v9834_v29 = vmul.f32 1.442695, %v9823_v55 }
0x2df3   :  { %v9804_v63 = vpop.xlane.xlu0 %9803  ;;  %v9813_v34 = vpop.xlane.xlu1 %9812 }
0x2df4   :  { %12853 = vpow2.f32 %v9834_v29  ;;  %v9822_v59 = vsub.f32 %v9423_v16, %v9804_v63  ;;  %v9825_v58 = vsub.f32 %v9645_v27, %v9813_v34 }
0x2df6   :  { %v9832_v60 = vmul.f32 1.442695, %v9822_v59  ;;  %v9838_v9 = vmul.f32 1.442695, %v9825_v58 }
0x2df7   :  { %v9810_v24 = vpop.xlane.xlu0 %9809  ;;  %v9819_v18 = vpop.xlane.xlu1 %9818 }
0x2df8   :  { %12855 = vpow2.f32 %v9832_v60  ;;  %v9824_v51 = vsub.f32 %v9571_v7, %v9810_v24  ;;  %v9827_v10 = vsub.f32 %v9793_v14, %v9819_v18 }
0x2df9   :  { %12857 = vpow2.f32 %v9838_v9 }
0x2dfa   :  { %v9836_v31 = vmul.f32 1.442695, %v9824_v51  ;;  %v9842_v33 = vmul.f32 1.442695, %v9827_v10 }
0x2dfb   :  { %v9816_v38 = vpop.xlane.xlu0 %9815  ;;  %v9961_v45 = vpop.permute.xlu1 %9960 }
0x2dfc   :  { %12859 = vpow2.f32 %v9836_v31  ;;  %v9826_v19 = vsub.f32 %v9719_v13, %v9816_v38  ;;  %12233 = vmatpush3.msra.mxu1 %v9961_v45 }
0x2dfd   :  { %12861 = vpow2.f32 %v9842_v33  ;;  %12242 = vmatprep.subr.mxu1 %v12921_v53 }
0x2dfe   :  { %v12854_v54 = vpop.eup %12853  ;;  %v9840_v11 = vmul.f32 1.442695, %v9826_v19 }
0x2dff   :  { %v9885_v17 = vpop.permute.xlu0 %9884  ;;  %v9853_v0 = vsel %vm222_vm6, %v12854_v54, 0.0  ;;  %v10037_v7 = vpop.permute.xlu1 %10036 }
0x2e00   :  { %12863 = vpow2.f32 %v9840_v11  ;;  %12228 = vmatpush3.msra.mxu0 %v9885_v17  ;;  %9854 = vadd.xlane.f32.xlu1 %v9853_v0 }
0x2e01   :  { %12237 = vmatprep.subr.mxu0 %v12921_v53 }
0x2e02   :  { %v12856_v1 = vpop.eup %12855 }
0x2e03   :  { %v12858_v22 = vpop.eup %12857  ;;  %v9850_v12 = vsel %vm222_vm6, %v12856_v1, 0.0  ;;  %v10113_v61 = vpop.permute.xlu1 %10112 }
0x2e04   :  { %9851 = vadd.xlane.f32.xlu0 %v9850_v12  ;;  %v9859_v16 = vsel %vm222_vm6, %v12858_v22, 0.0  ;;  %v10189_v32 = vpop.permute.xlu0 %10188 }
0x2e05   :  { %9860 = vadd.xlane.f32.xlu1 %v9859_v16 }
0x2e06   :  { %v12860_v28 = vpop.eup %12859 }
0x2e07   :  { %v14774_v39 = vpop.eup %12861  ;;  %v9856_v27 = vsel %vm222_vm6, %v12860_v28, 0.0  ;;  %v10265_v15 = vpop.permute.xlu1 %10264 }
0x2e08   :  { %9857 = vadd.xlane.f32.xlu0 %v9856_v27  ;;  %v9865_v57 = vsel %vm222_vm6, %v14774_v39, 0.0 }
0x2e09   :  { %9866 = vadd.xlane.f32.xlu1 %v9865_v57 }
0x2e0a   :  { %v14779_v52 = vpop.eup %12863 }
0x2e0b   :  { %v9862_v2 = vsel %vm222_vm6, %v14779_v52, 0.0 }
0x2e0c   :  { %9863 = vadd.xlane.f32.xlu0 %v9862_v2 }
0x2e1a   :  { %10416 = vrot.lane.b32.xlu1 %v14699_v23, %s12926_s28 }
0x2e1e   :  { %12605 = vrot.lane.b32.xlu1 %v14622_v25, %s12928_s12 }
0x2e22   :  { %10340 = vrot.lane.b32.xlu0 %v14701_v36, %s12926_s28 }
0x2e26   :  { %12600 = vrot.lane.b32.xlu0 %v14604_v5, %s12928_s12 }
0x2e34   :  { %v9846_v14 = vpop.xlane.xlu0 %9845 }
0x2e35   :  { %12865 = vrcp.f32 %v9846_v14 }
0x2e38   :  { %v9849_v40 = vpop.xlane.xlu1 %9848 }
0x2e39   :  { %12867 = vrcp.f32 %v9849_v40 }
0x2e3f   :  { %v12866_v30 = vpop.eup %12865 }
0x2e40   :  { %v9876_v50 = vmul.f32 %v12866_v30, %v14761_v48 }
0x2e42   :  { %12230 = vmatmul.mubr.msk.f32.vlgmr.msra.gmra.mrb[96].mxu0 %vm222_vm6, %v9876_v50 }
0x2e43   :  { %v12868_v13 = vpop.eup %12867  ;;  %12238 = vmatpush3.msra.mxu0 %v10037_v7  ;;  %12239 = vmatprep.mubr.msk.f32.mxu0 %vm12922_vm5, %v12921_v53 }
0x2e44   :  { %v9877_v23 = vmul.f32 %v12868_v13, %v14765_v8  ;;  %12247 = vmatprep.subr.mxu0 %v12921_v53 }
0x2e46   :  { %12235 = vmatmul.mubr.msk.f32.vlgmr.msra.gmra.mrb[118].mxu1 %vm222_vm6, %v9877_v23 }
0x2e47   :  { %12243 = vmatpush3.msra.mxu1 %v10113_v61  ;;  %12244 = vmatprep.mubr.msk.f32.mxu1 %vm12922_vm5, %v12921_v53 }
0x2e48   :  { %12252 = vmatprep.subr.mxu1 %v12921_v53 }
0x2e8d   :  { %v9855_v36 = vpop.xlane.xlu1 %9854 }
0x2e8e   :  { %12869 = vrcp.f32 %v9855_v36 }
0x2e91   :  { %v9852_v56 = vpop.xlane.xlu0 %9851 }
0x2e92   :  { %12871 = vrcp.f32 %v9852_v56  ;;  %v9861_v3 = vpop.xlane.xlu1 %9860 }
0x2e93   :  { %12873 = vrcp.f32 %v9861_v3 }
0x2e95   :  { %v9858_v4 = vpop.xlane.xlu0 %9857 }
0x2e96   :  { %12875 = vrcp.f32 %v9858_v4  ;;  %v9867_v20 = vpop.xlane.xlu1 %9866 }
0x2e97   :  { %12877 = vrcp.f32 %v9867_v20 }
0x2e98   :  { %v12870_v26 = vpop.eup %12869 }
0x2e99   :  { %v9879_v6 = vmul.f32 %v12870_v26, %v12854_v54  ;;  %v9864_v41 = vpop.xlane.xlu0 %9863 }
0x2e9a   :  { %12879 = vrcp.f32 %v9864_v41  ;;  %v10417_v49 = vpop.permute.xlu1 %10416 }
0x2e9b   :  { %12245 = vmatmul.mubr.msk.f32.vlgmr.msra.gmra.mrb[120].mxu1 %vm222_vm6, %v9879_v6 }
0x2e9c   :  { %v12872_v43 = vpop.eup %12871  ;;  %12253 = vmatpush3.msra.mxu1 %v10265_v15  ;;  %12254 = vmatprep.mubr.msk.f32.mxu1 %vm12922_vm5, %v12921_v53 }
0x2e9d   :  { %v12874_v47 = vpop.eup %12873  ;;  %v9878_v48 = vmul.f32 %v12872_v43, %v12856_v1  ;;  %12262 = vmatprep.subr.mxu1 %v12921_v53  ;;  %v10341_v5 = vpop.permute.xlu0 %10340 }
0x2e9e   :  { %v9881_v21 = vmul.f32 %v12874_v47, %v12858_v22  ;;  %v12606_v34 = vpop.permute.xlu1 %12605 }
0x2e9f   :  { %12240 = vmatmul.mubr.msk.f32.vlgmr.msra.gmra.mrb[98].mxu0 %vm222_vm6, %v9878_v48  ;;  %v12608_v59 = vunpack.i.h.bf16 %v12606_v34  ;;  %v12607_v58 = vunpack.i.l.bf16 %v12606_v34  ;;  %v11204_v34 = vld [vmem:[%s14935_s6 + $0xc8] sm:$0xff] }
0x2ea0   :  { %v12876_v8 = vpop.eup %12875  ;;  %12248 = vmatpush3.msra.mxu0 %v10189_v32  ;;  %12255 = vmatmul.mubr.msk.f32.vlgmr.msra.gmra.mrb[122].mxu1 %vm222_vm6, %v9881_v21 }
0x2ea1   :  { %v12878_v46 = vpop.eup %12877  ;;  %v9880_v55 = vmul.f32 %v12876_v8, %v12860_v28  ;;  %12263 = vmatpush3.msra.mxu1 %v10417_v49  ;;  %12249 = vmatprep.mubr.msk.f32.mxu0 %vm12922_vm5, %v12921_v53  ;;  %v12601_v60 = vpop.permute.xlu0 %12600  ;;  %v12488_v18 = vpack.c.bf16 %v12608_v59, %v12607_v58  ;;  %v11196_v49 = vld [vmem:[%s14934_s5 + $0x60] sm:$0xff]  ;;  %v11205_v59 = vld [vmem:[%s14935_s6 + $0xd0] sm:$0xff] }
0x2ea2   :  { %v9883_v29 = vmul.f32 %v12878_v46, %v14774_v39  ;;  %12257 = vmatprep.subr.mxu0 %v12921_v53  ;;  %12264 = vmatprep.mubr.msk.f32.mxu1 %vm12922_vm5, %v12921_v53  ;;  %v12603_v9 = vunpack.i.h.bf16 %v12601_v60  ;;  %v12602_v24 = vunpack.i.l.bf16 %v12601_v60  ;;  %v11197_v46 = vld [vmem:[%s14934_s5 + $0x68] sm:$0xff]  ;;  %v11206_v60 = vld [vmem:[%s14935_s6 + $0xd8] sm:$0xff] }
0x2ea3   :  { %12250 = vmatmul.mubr.msk.f32.vlgmr.msra.gmra.mrb[100].mxu0 %vm222_vm6, %v9880_v55  ;;  %v11198_v55 = vld [vmem:[%s14934_s5 + $0x70] sm:$0xff] }
0x2ea4   :  { %v12880_v25 = vpop.eup %12879  ;;  %12258 = vmatpush3.msra.mxu0 %v10341_v5  ;;  %12265 = vmatmul.mubr.msk.f32.vlgmr.msra.gmra.mrb[124].mxu1 %vm222_vm6, %v9883_v29  ;;  %v12484_v51 = vpack.c.bf16 %v12603_v9, %v12602_v24  ;;  %v12492_v29 = vpack.c.bf16 %v11197_v46, %v11196_v49  ;;  %v11199_v5 = vld [vmem:[%s14934_s5 + $0x78] sm:$0xff]  ;;  %v12504_v9 = vpack.c.bf16 %v11206_v60, %v11205_v59  ;;  %v11207_v24 = vld [vmem:[%s14935_s6 + $0xe0] sm:$0xff] }
0x2ea5   :  { %v9882_v63 = vmul.f32 %v12880_v25, %v14779_v52  ;;  %12259 = vmatprep.mubr.msk.f32.mxu0 %vm12922_vm5, %v12921_v53  ;;  %v12496_v25 = vpack.c.bf16 %v11199_v5, %v11198_v55 }
0x2ea6   :  { %12485 = vmatprep.subr.bf16.mxu0 %v12484_v51  ;;  %12493 = vmatprep.subr.bf16.mxu1 %v12492_v29 }
0x2ea7   :  { %12260 = vmatmul.mubr.msk.f32.vlgmr.msra.gmra.mrb[102].mxu0 %vm222_vm6, %v9882_v63  ;;  %12495 = vmatpush3.bf16.msra.mxu1 %v12492_v29  ;;  %v11203_v63 = vld [vmem:[%s14935_s6 + $0xc0] sm:$0xff] }
0x2ea8   :  { %12487 = vmatpush3.bf16.msra.mxu0 %v12484_v51  ;;  %12497 = vmatprep.subr.bf16.mxu1 %v12496_v25  ;;  %v12500_v58 = vpack.c.bf16 %v11204_v34, %v11203_v63 }
0x2ea9   :  { %12489 = vmatprep.subr.bf16.mxu0 %v12488_v18 }
0x2eab   :  { %12499 = vmatpush3.bf16.msra.mxu1 %v12496_v25 }
0x2eac   :  { %12491 = vmatpush3.bf16.msra.mxu0 %v12488_v18  ;;  %v11208_v18 = vld [vmem:[%s14935_s6 + $0xe8] sm:$0xff] }
0x2ead   :  { %12501 = vmatprep.subr.bf16.mxu0 %v12500_v58  ;;  %v12508_v51 = vpack.c.bf16 %v11208_v18, %v11207_v24 }
0x2f15   :  { %v9956_v10 = vpop.f32.mrb[96].mxu0 }
0x2f16   :  { %v12231_v31 = vpop.f32.mrb[97].mxu0 }
0x2f19   :  { %v10032_v33 = vpop.f32.mrb[118].mxu1 }
0x2f1a   :  { %v12236_v38 = vpop.f32.mrb[119].mxu1 }
0x2f6e   :  { %v10184_v45 = vpop.f32.mrb[120].mxu1 }
0x2f6f   :  { %10496 = vrot.lane.b32.xlu1 %v10184_v45, %s12929_s13  ;;  %v12246_v53 = vpop.f32.mrb[121].mxu1 }
0x2f72   :  { %v10108_v19 = vpop.f32.mrb[98].mxu0 }
0x2f73   :  { %v10336_v54 = vpop.f32.mrb[122].mxu1  ;;  %10494 = vrot.lane.b32.xlu0 %v10108_v19, %s12929_s13  ;;  %v12241_v11 = vpop.f32.mrb[99].mxu0 }
0x2f74   :  { %10504 = vrot.lane.b32.xlu1 %v10336_v54, %s12930_s14  ;;  %v12256_v17 = vpop.f32.mrb[123].mxu1 }
0x2f76   :  { %v10260_v0 = vpop.f32.mrb[100].mxu0 }
0x2f77   :  { %v10488_v1 = vpop.f32.mrb[124].mxu1  ;;  %10502 = vrot.lane.b32.xlu0 %v10260_v0, %s12930_s14  ;;  %v12251_v22 = vpop.f32.mrb[101].mxu0 }
0x2f78   :  { %10512 = vrot.lane.b32.xlu1 %v10488_v1, %s12931_s15  ;;  %v12266_v12 = vpop.f32.mrb[125].mxu1 }
0x2f7a   :  { %v10412_v16 = vpop.f32.mrb[102].mxu0 }
0x2f7b   :  { %10510 = vrot.lane.b32.xlu0 %v10412_v16, %s12931_s15  ;;  %v12261_v28 = vpop.f32.mrb[103].mxu0 }
0x2f7c   :  { %v11194_v28 = vld [vmem:[%s14937_s8 + $0x14] sm:$0x3] }
0x2f7f   :  { %10534 = vrot.lane.b32.xlu0 %v14630_v35, %s12928_s12 }
0x2fe1   :  { %v10497_v39 = vpop.permute.xlu1 %10496 }
0x2fe2   :  { %v10517_v61 = vsel %vm222_vm6, %v10032_v33, %v10497_v39 }
0x2fe5   :  { %v10495_v27 = vpop.permute.xlu0 %10494 }
0x2fe6   :  { %v10505_v57 = vpop.permute.xlu1 %10504  ;;  %v10516_v2 = vsel %vm222_vm6, %v9956_v10, %v10495_v27  ;;  %v10663_v27 = vrot.slane %v11194_v28, %v13028_v37 }
0x2fe7   :  { %v10519_v14 = vsel %vm1551_vm7, %v10517_v61, %v10505_v57  ;;  %v10671_v57 = vrot.slane %v11194_v28, %v13034_v42 }
0x2fe9   :  { %v10503_v52 = vpop.permute.xlu0 %10502 }
0x2fea   :  { %v10513_v7 = vpop.permute.xlu1 %10512  ;;  %v10518_v32 = vsel %vm1551_vm7, %v10516_v2, %v10503_v52 }
0x2feb   :  { %v10521_v30 = vsel %vm1554_vm8, %v10519_v14, %v10513_v7 }
0x2fed   :  { %v10511_v15 = vpop.permute.xlu0 %10510 }
0x2fee   :  { %v10520_v40 = vsel %vm1554_vm8, %v10518_v32, %v10511_v15 }
0x2fef   :  { %12275 = vmatprep.mubr.msk.f32.mxu0 %vm60_vm0, %v10520_v40 }
0x2ff0   :  { %12276 = vmatmul.mubr.msk.f32.vlgmr.msra.gmra.mrb[104].mxu0 %vm60_vm0, %v10521_v30  ;;  %v11200_v30 = vld [vmem:[%s14936_s7 + $0x3] ss:$0 sm:$0xff] }
0x2ff1   :  { %v10535_v35 = vpop.permute.xlu0 %10534  ;;  %12503 = vmatpush3.bf16.msra.mxu0 %v12500_v58 }
0x2ff2   :  { %12505 = vmatprep.subr.bf16.mxu0 %v12504_v9 }
0x2ff5   :  { %12507 = vmatpush3.bf16.msra.mxu0 %v12504_v9 }
0x2ff6   :  { %12509 = vmatprep.subr.bf16.mxu0 %v12508_v51 }
0x2ff9   :  { %12511 = vmatpush3.bf16.msra.mxu0 %v12508_v51 }
0x30c3   :  { %v12277_v50 = vpop.f32.mrb[104].mxu0 }
0x30c4   :  { %v10615_v13 = vadd.f32 %v12277_v50, %v10535_v35  ;;  %v10609_v23 = vpop.f32.mrb[105].mxu0  ;;  %v11210_v50 = vld [vmem:[%s14935_s6 + $0xf8] sm:$0xff] }
0x30c5   :  { %v10610_v36 = vadd.f32 %v10609_v23, %v10535_v35  ;;  %v11209_v35 = vld [vmem:[%s14935_s6 + $0xf0] sm:$0xff] }
0x30c6   :  { %v14836_v56 = vadd.f32 %v10615_v13, %v14589_v62  ;;  %v12512_v13 = vpack.c.bf16 %v11210_v50, %v11209_v35 }
0x30c7   :  { %v14839_v3 = vadd.f32 %v10610_v36, %v14592_v44 }
0x30c8   :  { %v10625_v4 = vsel %vm60_vm0, %v14836_v56, 0.0  ;;  %12513 = vmatprep.subr.bf16.mxu0 %v12512_v13 }
0x30c9   :  { %10626 = vadd.xlane.f32.xlu0 %v10625_v4  ;;  %v10622_v20 = vsel %vm60_vm0, %v14839_v3, 0.0  ;;  %12515 = vmatpush3.bf16.msra.mxu0 %v12512_v13 }
0x30ca   :  { %10623 = vadd.xlane.f32.xlu1 %v10622_v20 }
0x30db   :  { %10779 = vrot.lane.b32.xlu1 %v11200_v30, %s12927_s1  ;;  %s12932_s1 = smov [#allocation2]  }
0x30dc   :  { %s10926_s28 = sshll.u32 %s12932_s1, 4  ;;  %s10927_s28 = int_to_ptr.vmem [resolvable:$true] %s10926_s28 }
0x30dd   :  { %p12902_p1 = scmp.lt.s32.totalorder %s10927_s28, %s10927_s28 }
0x3156   :  { %v10627_v26 = vpop.xlane.xlu0 %10626 }
0x3157   :  { %v10629_v6 = vmul.f32 0.03125, %v10627_v26  ;;  %v10624_v41 = vpop.xlane.xlu1 %10623 }
0x3158   :  { %v10628_v43 = vmul.f32 0.03125, %v10624_v41 }
0x3159   :  { %v14846_v47 = vsub.f32 %v14836_v56, %v10629_v6 }
0x315a   :  { %v10630_v62 = vsub.f32 %v14839_v3, %v10628_v43 }
0x315b   :  { %v10633_v21 = vmul.f32 %v14846_v47, %v14846_v47  ;;  %v10665_v61 = vmul.f32 %v10663_v27, %v14846_v47  ;;  %v10780_v41 = vpop.permute.xlu1 %10779 }
0x315c   :  { %v10632_v48 = vmul.f32 %v10630_v62, %v10630_v62  ;;  %v10664_v52 = vmul.f32 %v10663_v27, %v10630_v62 }
0x315d   :  { %v10637_v8 = vsel %vm60_vm0, %v10633_v21, 0.0 }
0x315e   :  { %v10634_v44 = vsel %vm60_vm0, %v10632_v48, 0.0 }
0x315f   :  { %10635 = vadd.xlane.f32.xlu0 %v10634_v44 }
0x3163   :  { %10638 = vadd.xlane.f32.xlu0 %v10637_v8 }
0x31ec   :  { %v10636_v10 = vpop.xlane.xlu0 %10635 }
0x31ed   :  { %v10640_v31 = vmul.f32 0.032258064, %v10636_v10 }
0x31ef   :  { %12881 = vrsqrt.f32 %v10640_v31  ;;  %vm10644_vm5 = vcmp.eq.f32.partialorder %v10640_v31, inf  ;;  %v10647_v19 = vand.u32 2147483648, %v10640_v31  ;;  %vm10646_vm6 = vcmp.eq.f32.partialorder %v10640_v31, 0.0 }
0x31f0   :  { %v10639_v33 = vpop.xlane.xlu0 %10638 }
0x31f1   :  { %v10641_v38 = vmul.f32 0.032258064, %v10639_v33 }
0x31f3   :  { %12883 = vrsqrt.f32 %v10641_v38  ;;  %vm10651_vm7 = vcmp.eq.f32.partialorder %v10641_v38, inf  ;;  %v10654_v22 = vand.u32 2147483648, %v10641_v38  ;;  %vm10653_vm8 = vcmp.eq.f32.partialorder %v10641_v38, 0.0 }
0x31f9   :  { %v12882_v45 = vpop.eup %12881 }
0x31fa   :  { %v10643_v53 = vmul.f32 %v12882_v45, %v10640_v31 }
0x31fc   :  { %v10645_v54 = vsel %vm10644_vm5, %v10640_v31, %v10643_v53 }
0x31fd   :  { %v12884_v11 = vpop.eup %12883  ;;  %v10648_v17 = vsel %vm10646_vm6, %v10647_v19, %v10645_v54 }
0x31fe   :  { %v10650_v0 = vmul.f32 %v12884_v11, %v10641_v38  ;;  %v10656_v1 = vadd.f32 1e-06, %v10648_v17  ;;  %v11213_v17 = vld [vmem:[%s14937_s8 + $0x16] sm:$0x3]  ;;  %s12897_s8 = scalar_lea.vmem %s10927_s28, 256 }
0x31ff   :  { %p12898_p0 = scmp.ne.s32.totalorder %s10927_s28, %s12897_s8  ;;  %p12903_p2 = scmp.lt.s32.totalorder %s12897_s8, %s12897_s8 }
0x3200   :  { %v10652_v12 = vsel %vm10651_vm7, %v10641_v38, %v10650_v0  ;;  %12885 = vrcp.f32 %v10656_v1  ;;  %v10908_v1 = vrot.slane %v11213_v17, %v13028_v37 }
0x3201   :  { %v10655_v16 = vsel %vm10653_vm8, %v10654_v22, %v10652_v12  ;;  %v10916_v22 = vrot.slane %v11213_v17, %v13034_v42  ;;  %p12904_p3 = por %p12903_p2, %p12902_p1 }
0x3202   :  { %v10657_v39 = vadd.f32 1e-06, %v10655_v16 }
0x3203   :  { %p12905_p4 = pnand %p12904_p3, %p12898_p0 }
0x3204   :  { %12887 = vrcp.f32 %v10657_v39 }
0x320a   :  { %v12886_v2 = vpop.eup %12885 }
0x320b   :  { %v10666_v7 = vmul.f32 %v12886_v2, %v10664_v52 }
0x320d   :  { %v10672_v32 = vadd.f32 %v10671_v57, %v10666_v7 }
0x320e   :  { %v12888_v15 = vpop.eup %12887 }
0x320f   :  { %12286 = vmatprep.mubr.msk.f32.mxu1 %vm60_vm0, %v10672_v32  ;;  %v10667_v14 = vmul.f32 %v12888_v15, %v10665_v61 }
0x3211   :  { %v10673_v40 = vadd.f32 %v10671_v57, %v10667_v14 }
0x3213   :  { %12287 = vmatmul.mubr.msk.f32.vlgmr.msra.gmra.mrb[126].mxu1 %vm60_vm0, %v10673_v40 }
0x32e6   :  { %v12288_v23 = vpop.f32.mrb[126].mxu1 }
0x32e7   :  { %v10765_v36 = vadd.f32 %v12288_v23, %v11200_v30  ;;  %v10759_v4 = vpop.f32.mrb[127].mxu1 }
0x32e8   :  { %v10760_v20 = vadd.f32 %v11200_v30, %v10759_v4 }
0x32e9   :  { %v10769_v6 = vmax.f32 %v10765_v36, 0.0 }
0x32ea   :  { %v10768_v26 = vmax.f32 %v10760_v20, 0.0 }
0x32ec   :  { %12305 = vmatprep.mubr.msk.f32.mxu0 %vm1818_vm13, %v10768_v26 }
0x32ed   :  { %12306 = vmatmul.mubr.msk.f32.vlgmr.msra.gmra.mrb[106].mxu0 %vm1818_vm13, %v10769_v6 }
0x33c0   :  { %v12307_v43 = vpop.f32.mrb[106].mxu0 }
0x33c1   :  { %v10854_v47 = vpop.f32.mrb[107].mxu0  ;;  %v10860_v62 = vadd.f32 %v12307_v43, %v10780_v41 }
0x33c2   :  { %v10855_v48 = vadd.f32 %v10854_v47, %v10780_v41 }
0x33c3   :  { %v10864_v21 = vadd.f32 %v10860_v62, %v14836_v56 }
0x33c4   :  { %v10863_v44 = vadd.f32 %v10855_v48, %v14839_v3 }
0x33c5   :  { %v10870_v49 = vsel %vm60_vm0, %v10864_v21, 0.0 }
0x33c6   :  { %v10867_v8 = vsel %vm60_vm0, %v10863_v44, 0.0 }
0x33c7   :  { %10868 = vadd.xlane.f32.xlu0 %v10867_v8 }
0x33cb   :  { %10871 = vadd.xlane.f32.xlu0 %v10870_v49 }
0x3454   :  { %v10869_v46 = vpop.xlane.xlu0 %10868 }
0x3455   :  { %v10873_v55 = vmul.f32 0.03125, %v10869_v46 }
0x3457   :  { %v10875_v29 = vsub.f32 %v10863_v44, %v10873_v55 }
0x3458   :  { %v10872_v5 = vpop.xlane.xlu0 %10871 }
0x3459   :  { %v10874_v25 = vmul.f32 0.03125, %v10872_v5  ;;  %v10877_v63 = vmul.f32 %v10875_v29, %v10875_v29  ;;  %v10909_v12 = vmul.f32 %v10908_v1, %v10875_v29 }
0x345b   :  { %v10876_v34 = vsub.f32 %v10864_v21, %v10874_v25  ;;  %v10879_v59 = vsel %vm60_vm0, %v10877_v63, 0.0 }
0x345c   :  { %10880 = vadd.xlane.f32.xlu0 %v10879_v59 }
0x345d   :  { %v10878_v58 = vmul.f32 %v10876_v34, %v10876_v34  ;;  %v10910_v39 = vmul.f32 %v10908_v1, %v10876_v34 }
0x345f   :  { %v10882_v3 = vsel %vm60_vm0, %v10878_v58, 0.0 }
0x3460   :  { %10883 = vadd.xlane.f32.xlu0 %v10882_v3 }
0x34e9   :  { %v10881_v56 = vpop.xlane.xlu0 %10880 }
0x34ea   :  { %v10885_v60 = vmul.f32 0.032258064, %v10881_v56 }
0x34ec   :  { %12889 = vrsqrt.f32 %v10885_v60  ;;  %vm10889_vm13 = vcmp.eq.f32.partialorder %v10885_v60, inf  ;;  %v10892_v10 = vand.u32 2147483648, %v10885_v60  ;;  %vm10891_vm1 = vcmp.eq.f32.partialorder %v10885_v60, 0.0 }
0x34ed   :  { %v10884_v9 = vpop.xlane.xlu0 %10883 }
0x34ee   :  { %v10886_v24 = vmul.f32 0.032258064, %v10884_v9 }
0x34f0   :  { %12891 = vrsqrt.f32 %v10886_v24  ;;  %vm10896_vm2 = vcmp.eq.f32.partialorder %v10886_v24, inf  ;;  %v10899_v19 = vand.u32 2147483648, %v10886_v24  ;;  %vm10898_vm3 = vcmp.eq.f32.partialorder %v10886_v24, 0.0 }
0x34f6   :  { %v12890_v18 = vpop.eup %12889 }
0x34f7   :  { %v10888_v51 = vmul.f32 %v12890_v18, %v10885_v60 }
0x34f9   :  { %v10890_v31 = vsel %vm10889_vm13, %v10885_v60, %v10888_v51 }
0x34fa   :  { %v12892_v33 = vpop.eup %12891  ;;  %v10893_v38 = vsel %vm10891_vm1, %v10892_v10, %v10890_v31 }
0x34fb   :  { %v10901_v45 = vadd.f32 1e-06, %v10893_v38  ;;  %v10895_v53 = vmul.f32 %v12892_v33, %v10886_v24 }
0x34fd   :  { %12893 = vrcp.f32 %v10901_v45  ;;  %v10897_v54 = vsel %vm10896_vm2, %v10886_v24, %v10895_v53 }
0x34fe   :  { %v10900_v11 = vsel %vm10898_vm3, %v10899_v19, %v10897_v54 }
0x34ff   :  { %v10902_v0 = vadd.f32 1e-06, %v10900_v11 }
0x3501   :  { %12895 = vrcp.f32 %v10902_v0 }
0x3507   :  { %v12894_v16 = vpop.eup %12893 }
0x3508   :  { %v10911_v28 = vmul.f32 %v12894_v16, %v10909_v12 }
0x350a   :  { %v10917_v27 = vadd.f32 %v10916_v22, %v10911_v28 }
0x350b   :  { %v12896_v57 = vpop.eup %12895 }
0x350c   :  { %v10912_v52 = vmul.f32 %v12896_v57, %v10910_v39  ;;  %10919 = vst.msk [vmem:[#allocation2] sm:$0xff] %vm60_vm0, %v10917_v27 }
0x350e   :  { %v10918_v2 = vadd.f32 %v10916_v22, %v10912_v52 }
0x3510   :  { %10920 = vst.msk [vmem:[#allocation2 + $0x8] sm:$0xff] %vm60_vm0, %v10918_v2 }
0x3511   :  { %12908 = shalt.err (!%p12905_p4)
}
0x3512   :  { %s12909_s15 = scalar_lea.hbm %s14938_s9, 256 }
0x3513   :  { %p12910_p5 = scmp.ne.s32.totalorder %s14938_s9, %s12909_s15  ;;  %p12913_p6 = scmp.lt.u32.totalorder %s12909_s15, %s14938_s9 }
0x3515   :  { %p12915_p7 = pnand %p12913_p6, %p12910_p5 }
0x3517   :  { %12918 = shalt.err (!%p12915_p7)
}
0x3518   :  { %s12933_s16 = smov 128  }
0x3519   :  { %10932 = dma.vmem_to_hbm [thread:$0]  %s10927_s28, 256, %s14938_s9, [#allocation3], %s12933_s16, %s12933_s16, %s12929_s13  }
0x351a   :  { %12919 = dma.done.wait [#allocation3], 256  }
0x351b   :  { %12920 = vsyncadd [#allocation3], 4294967040 }
0x351c   :  { %10936 = vsyncpa [#allocation3], 1 }

</bundles_post_ra>
